<compile_context>
chip_gen: v7x
topology: tpu7x:2x2x1
jax: 0.10.0
libtpu: 0.0.40
codegen_flags: <defaults>
</compile_context>

<pallas_src>
import functools
import numpy as np
import jax
import jax.numpy as jnp
from jax.experimental import pallas as pl
from jax.experimental.pallas import tpu as pltpu

PI = 3.1415927410125732  # the constant used in the PyTorch code

IN_FEATS = 6                      # raw input features
PE_DIMEN = 4                      # args.pe_dimen
XYZ_DIMS = PE_DIMEN * 3 * 2 * 2   # 48
HIDDEN = 32
OUT_DIM = 1


def _mlp_kernel(x_ref, e_ref, off_ref,
                w0_ref, b0_ref, w1_ref, b1_ref, w2_ref, b2_ref,
                o_ref):
    # Feature-major: rows = features (sublanes), columns = points (lanes).
    x = x_ref[...]                                                    # (6, tn)

    # Positional encoding as a dense stage: sin(E @ x + off)           (48, tn)
    phase = jnp.dot(e_ref[...], x, preferred_element_type=jnp.float32) + off_ref[...]
    pe = jnp.sin(phase)

    # lin_0 + Sine (sin(30 x))                                         (32, tn)
    h = jnp.dot(w0_ref[...], pe, preferred_element_type=jnp.float32) + b0_ref[...]
    h = jnp.sin(30.0 * h)

    # lin_1 + Sine                                                     (32, tn)
    h = jnp.dot(w1_ref[...], h, preferred_element_type=jnp.float32) + b1_ref[...]
    h = jnp.sin(30.0 * h)

    # lin_2 (last layer, no Sine)                                      (1, tn)
    z = jnp.dot(w2_ref[...], h, preferred_element_type=jnp.float32) + b2_ref[...]

    # Softplus(beta=100) with PyTorch's threshold=20 linearization
    bz = 100.0 * z
    sp = jnp.where(bz > 20.0, z, jnp.log1p(jnp.exp(jnp.minimum(bz, 20.0))) / 100.0)
    o_ref[...] = sp.astype(o_ref.dtype)


@functools.partial(jax.jit, static_argnames=("block_n",))
def mlp_forward(x, params, block_n=4096):
    """x: (N, 6) float32.  params: (E, off, W0, b0, W1, b1, W2, b2),
    all weights in PyTorch (out_dim, in_dim) layout, biases (out_dim, 1)."""
    E, off, W0, b0, W1, b1, W2, b2 = params
    N, C = x.shape
    assert block_n % 128 == 0, "block_n must be a multiple of 128"

    # Big tiles amortize the ~0.35us per-grid-step overhead; but keep >= 2 grid
    # steps when N allows so both v7x TensorCores get work on the parallel axis.
    bn = block_n
    while bn > 128 and pl.cdiv(N, bn) < 2:
        bn //= 2
    n_pad = pl.cdiv(N, bn) * bn

    # Feature-major input (points on lanes).  Pad only the ragged tail.
    # TODO(synk): for very large N, accept x already as (6, N) 128-aligned to
    # skip this wrapper transpose/pad HBM pass entirely.
    x_t = x.T
    if n_pad != N:
        x_t = jnp.pad(x_t, ((0, 0), (0, n_pad - N)))

    full = lambda a: pl.BlockSpec(a.shape, lambda i: (0, 0))  # VMEM-resident param

    out = pl.pallas_call(
        _mlp_kernel,
        out_shape=jax.ShapeDtypeStruct((1, n_pad), jnp.float32),
        grid_spec=pltpu.PrefetchScalarGridSpec(
            num_scalar_prefetch=0,
            grid=(n_pad // bn,),
            in_specs=[
                pl.BlockSpec((C, bn), lambda i: (0, i)),   # x tile, feature-major
                full(E), full(off),
                full(W0), full(b0),
                full(W1), full(b1),
                full(W2), full(b2),
            ],
            out_specs=pl.BlockSpec((1, bn), lambda i: (0, i)),  # lane-dense output
        ),
        compiler_params=pltpu.CompilerParams(
            dimension_semantics=("parallel",),
            vmem_limit_bytes=32 * 1024 * 1024),
    )(x_t, E, off, W0, b0, W1, b1, W2, b2)
    return out[0, :N].reshape(N, 1)


def make_pe_matrix(in_dim=IN_FEATS, d=PE_DIMEN):
    """Frequency matrix E (in_dim*d*2, in_dim) and offset (in_dim*d*2, 1) such
    that sin(E @ x^T + off) reproduces positional_encoding(x, d)^T with the
    PyTorch column order (channel-major, then frequency, then [sin, cos])."""
    out_dim = in_dim * d * 2
    E = np.zeros((out_dim, in_dim), dtype=np.float32)
    off = np.zeros((out_dim, 1), dtype=np.float32)
    for c in range(in_dim):
        for k in range(d):
            freq = np.float32(2.0 ** k) * np.float32(PI)
            j_sin = c * d * 2 + k * 2 + 0
            j_cos = c * d * 2 + k * 2 + 1
            E[j_sin, c] = freq
            E[j_cos, c] = freq
            off[j_cos, 0] = np.float32(PI) / 2.0   # cos(z) = sin(z + pi/2)
    return jnp.asarray(E), jnp.asarray(off)


def init_params(key):
    """Weights in PyTorch (out_dim, in_dim) layout, following the module's
    sine-init scheme for layers 0/1; the last layer uses the default Linear
    init (the spec zeroes it, which would make the numeric check trivial)."""
    E, off = make_pe_matrix()
    dims = [XYZ_DIMS, HIDDEN, HIDDEN, OUT_DIM]
    keys = jax.random.split(key, 6)
    ws, bs = [], []
    for i in range(3):
        fan_in, out_d = dims[i], dims[i + 1]
        if i == 0:                               # first_layer_sine_init
            w_bound = 1.0 / fan_in
        elif i == 1:                             # sine_init
            w_bound = float(np.sqrt(6.0 / fan_in) / 30.0)
        else:                                    # default nn.Linear init
            w_bound = float(1.0 / np.sqrt(fan_in))
        b_bound = float(1.0 / np.sqrt(fan_in))   # PyTorch default bias init
        w = jax.random.uniform(keys[2 * i], (out_d, fan_in),
                               minval=-w_bound, maxval=w_bound, dtype=jnp.float32)
        b = jax.random.uniform(keys[2 * i + 1], (out_d, 1),
                               minval=-b_bound, maxval=b_bound, dtype=jnp.float32)
        ws.append(w)
        bs.append(b)
    return (E, off, ws[0], bs[0], ws[1], bs[1], ws[2], bs[2])


def reference_forward(x, params):
    """Pure-JAX reference mirroring the PyTorch forward (row-major, explicit
    sin/cos positional encoding, x @ W^T + b like nn.Linear)."""
    E, off, W0, b0, W1, b1, W2, b2 = params
    mm = functools.partial(jnp.matmul, precision=jax.lax.Precision.HIGHEST)
    dd = jnp.arange(PE_DIMEN, dtype=jnp.float32)
    phase = (2.0 ** dd)[None, None, :] * PI * x[..., None]          # (N, 6, d)
    pe = jnp.stack([jnp.sin(phase), jnp.cos(phase)], axis=-1)       # (N, 6, d, 2)
    pe = pe.reshape(x.shape[0], -1)                                 # (N, 48)
    h = jnp.sin(30.0 * (mm(pe, W0.T) + b0[:, 0]))
    h = jnp.sin(30.0 * (mm(h, W1.T) + b1[:, 0]))
    z = mm(h, W2.T) + b2[:, 0]
    bz = 100.0 * z
    return jnp.where(bz > 20.0, z, jnp.log1p(jnp.exp(jnp.minimum(bz, 20.0))) / 100.0)


if __name__ == "__main__":
    key = jax.random.PRNGKey(0)
    k_x, k_p = jax.random.split(key)

    num_points = 300   # small; exercises the ragged-tail padding path
    x = jax.random.uniform(k_x, (num_points, IN_FEATS), minval=-1.0, maxval=1.0,
                           dtype=jnp.float32)
    params = init_params(k_p)

    out = jax.block_until_ready(mlp_forward(x, params))
    ref = reference_forward(x, params)

    assert out.shape == (num_points, 1), out.shape
    # The omega=30 sine layers amplify f32 rounding / dot-association
    # differences (feature-major MXU dots in the kernel vs row-major dots in
    # the reference) by ~30x per layer, so ~1e-5..1e-4 deviations are expected;
    # any semantic bug would show up as O(0.1) errors.
    np.testing.assert_allclose(np.asarray(out), np.asarray(ref),
                               rtol=2e-3, atol=2e-4)
    print("KERNEL_OK")
</pallas_src>

<mosaic_0001>
module attributes {stable_mosaic.version = 11 : i64} {
  func.func @_mlp_kernel(%arg0: i32, %arg1: memref<6x256xf32, #tpu.memory_space<vmem>>, %arg2: memref<48x6xf32, #tpu.memory_space<vmem>>, %arg3: memref<48x1xf32, #tpu.memory_space<vmem>>, %arg4: memref<32x48xf32, #tpu.memory_space<vmem>>, %arg5: memref<32x1xf32, #tpu.memory_space<vmem>>, %arg6: memref<32x32xf32, #tpu.memory_space<vmem>>, %arg7: memref<32x1xf32, #tpu.memory_space<vmem>>, %arg8: memref<1x32xf32, #tpu.memory_space<vmem>>, %arg9: memref<1x1xf32, #tpu.memory_space<vmem>>, %arg10: memref<1x256xf32, #tpu.memory_space<vmem>>) attributes {dimension_semantics = [#tpu.dimension_semantics<parallel>], iteration_bounds = array<i64: 2>, scalar_prefetch = 0 : i64, scratch_operands = 0 : i64, tpu.core_type = #tpu.core_type<tc>, window_params = [{transform_indices = @transform_0, window_bounds = array<i64: 6, 256>}, {pipeline_mode = #tpu.pipeline_mode<synchronous>, transform_indices = @transform_1, window_bounds = array<i64: 48, 6>}, {pipeline_mode = #tpu.pipeline_mode<synchronous>, transform_indices = @transform_2, window_bounds = array<i64: 48, 1>}, {pipeline_mode = #tpu.pipeline_mode<synchronous>, transform_indices = @transform_3, window_bounds = array<i64: 32, 48>}, {pipeline_mode = #tpu.pipeline_mode<synchronous>, transform_indices = @transform_4, window_bounds = array<i64: 32, 1>}, {pipeline_mode = #tpu.pipeline_mode<synchronous>, transform_indices = @transform_5, window_bounds = array<i64: 32, 32>}, {pipeline_mode = #tpu.pipeline_mode<synchronous>, transform_indices = @transform_6, window_bounds = array<i64: 32, 1>}, {pipeline_mode = #tpu.pipeline_mode<synchronous>, transform_indices = @transform_7, window_bounds = array<i64: 1, 32>}, {pipeline_mode = #tpu.pipeline_mode<synchronous>, transform_indices = @transform_8, window_bounds = array<i64: 1, 1>}, {transform_indices = @transform_9, window_bounds = array<i64: 1, 256>}]} {
    %c0 = arith.constant 0 : index
    %c0_0 = arith.constant 0 : index
    %0 = vector.load %arg1[%c0, %c0_0] : memref<6x256xf32, #tpu.memory_space<vmem>>, vector<6x256xf32>
    %c0_1 = arith.constant 0 : index
    %c0_2 = arith.constant 0 : index
    %1 = vector.load %arg2[%c0_1, %c0_2] : memref<48x6xf32, #tpu.memory_space<vmem>>, vector<48x6xf32>
    %cst = arith.constant dense<0.000000e+00> : vector<48x256xf32>
    %2 = tpu.matmul %1, %0, %cst {dimension_numbers = #tpu.dot_dimension_numbers<[1], [0], [0], [1], [0, 0, 1, 1], [], []>} : vector<48x6xf32>, vector<6x256xf32>, vector<48x256xf32> -> vector<48x256xf32>
    %c0_3 = arith.constant 0 : index
    %c0_4 = arith.constant 0 : index
    %3 = vector.load %arg3[%c0_3, %c0_4] : memref<48x1xf32, #tpu.memory_space<vmem>>, vector<48x1xf32>
    %4 = vector.broadcast %3 : vector<48x1xf32> to vector<48x256xf32>
    %5 = arith.addf %2, %4 : vector<48x256xf32>
    %6 = math.sin %5 : vector<48x256xf32>
    %c0_5 = arith.constant 0 : index
    %c0_6 = arith.constant 0 : index
    %7 = vector.load %arg4[%c0_5, %c0_6] : memref<32x48xf32, #tpu.memory_space<vmem>>, vector<32x48xf32>
    %cst_7 = arith.constant dense<0.000000e+00> : vector<32x256xf32>
    %8 = tpu.matmul %7, %6, %cst_7 {dimension_numbers = #tpu.dot_dimension_numbers<[1], [0], [0], [1], [0, 0, 1, 1], [], []>} : vector<32x48xf32>, vector<48x256xf32>, vector<32x256xf32> -> vector<32x256xf32>
    %c0_8 = arith.constant 0 : index
    %c0_9 = arith.constant 0 : index
    %9 = vector.load %arg5[%c0_8, %c0_9] : memref<32x1xf32, #tpu.memory_space<vmem>>, vector<32x1xf32>
    %10 = vector.broadcast %9 : vector<32x1xf32> to vector<32x256xf32>
    %11 = arith.addf %8, %10 : vector<32x256xf32>
    %cst_10 = arith.constant 3.000000e+01 : f32
    %12 = vector.broadcast %cst_10 : f32 to vector<32x256xf32>
    %13 = arith.mulf %12, %11 : vector<32x256xf32>
    %14 = math.sin %13 : vector<32x256xf32>
    %c0_11 = arith.constant 0 : index
    %c0_12 = arith.constant 0 : index
    %15 = vector.load %arg6[%c0_11, %c0_12] : memref<32x32xf32, #tpu.memory_space<vmem>>, vector<32x32xf32>
    %cst_13 = arith.constant dense<0.000000e+00> : vector<32x256xf32>
    %16 = tpu.matmul %15, %14, %cst_13 {dimension_numbers = #tpu.dot_dimension_numbers<[1], [0], [0], [1], [0, 0, 1, 1], [], []>} : vector<32x32xf32>, vector<32x256xf32>, vector<32x256xf32> -> vector<32x256xf32>
    %c0_14 = arith.constant 0 : index
    %c0_15 = arith.constant 0 : index
    %17 = vector.load %arg7[%c0_14, %c0_15] : memref<32x1xf32, #tpu.memory_space<vmem>>, vector<32x1xf32>
    %18 = vector.broadcast %17 : vector<32x1xf32> to vector<32x256xf32>
    %19 = arith.addf %16, %18 : vector<32x256xf32>
    %cst_16 = arith.constant 3.000000e+01 : f32
    %20 = vector.broadcast %cst_16 : f32 to vector<32x256xf32>
    %21 = arith.mulf %20, %19 : vector<32x256xf32>
    %22 = math.sin %21 : vector<32x256xf32>
    %c0_17 = arith.constant 0 : index
    %c0_18 = arith.constant 0 : index
    %23 = vector.load %arg8[%c0_17, %c0_18] : memref<1x32xf32, #tpu.memory_space<vmem>>, vector<1x32xf32>
    %cst_19 = arith.constant dense<0.000000e+00> : vector<1x256xf32>
    %24 = tpu.matmul %23, %22, %cst_19 {dimension_numbers = #tpu.dot_dimension_numbers<[1], [0], [0], [1], [0, 0, 1, 1], [], []>} : vector<1x32xf32>, vector<32x256xf32>, vector<1x256xf32> -> vector<1x256xf32>
    %c0_20 = arith.constant 0 : index
    %c0_21 = arith.constant 0 : index
    %25 = vector.load %arg9[%c0_20, %c0_21] : memref<1x1xf32, #tpu.memory_space<vmem>>, vector<1x1xf32>
    %26 = vector.broadcast %25 : vector<1x1xf32> to vector<1x256xf32>
    %27 = arith.addf %24, %26 : vector<1x256xf32>
    %cst_22 = arith.constant 1.000000e+02 : f32
    %28 = vector.broadcast %cst_22 : f32 to vector<1x256xf32>
    %29 = arith.mulf %28, %27 : vector<1x256xf32>
    %cst_23 = arith.constant 2.000000e+01 : f32
    %30 = vector.broadcast %cst_23 : f32 to vector<1x256xf32>
    %31 = arith.cmpf ogt, %29, %30 : vector<1x256xf32>
    %cst_24 = arith.constant 2.000000e+01 : f32
    %32 = vector.broadcast %cst_24 : f32 to vector<1x256xf32>
    %33 = arith.minimumf %29, %32 : vector<1x256xf32>
    %34 = math.exp %33 : vector<1x256xf32>
    %35 = math.log1p %34 : vector<1x256xf32>
    %cst_25 = arith.constant 1.000000e+02 : f32
    %36 = vector.broadcast %cst_25 : f32 to vector<1x256xf32>
    %37 = arith.divf %35, %36 : vector<1x256xf32>
    %38 = arith.select %31, %27, %37 : vector<1x256xi1>, vector<1x256xf32>
    %c0_26 = arith.constant 0 : index
    %c0_27 = arith.constant 0 : index
    %39 = vector.load %arg10[%c0_26, %c0_27] : memref<1x256xf32, #tpu.memory_space<vmem>>, vector<1x256xf32>
    tpu.vector_store %arg10[%c0_26, %c0_27], %38 {strides = array<i32>} : memref<1x256xf32, #tpu.memory_space<vmem>>, vector<1x256xf32>,
    return
  }
  func.func @transform_0(%arg0: i32) -> (i32, i32) {
    %c0_i32 = arith.constant 0 : i32
    %c0_i32_0 = arith.constant 0 : i32
    return %c0_i32, %arg0 : i32, i32
  }
  func.func @transform_1(%arg0: i32) -> (i32, i32) {
    %c0_i32 = arith.constant 0 : i32
    %c0_i32_0 = arith.constant 0 : i32
    %c0_i32_1 = arith.constant 0 : i32
    return %c0_i32, %c0_i32_0 : i32, i32
  }
  func.func @transform_2(%arg0: i32) -> (i32, i32) {
    %c0_i32 = arith.constant 0 : i32
    %c0_i32_0 = arith.constant 0 : i32
    %c0_i32_1 = arith.constant 0 : i32
    return %c0_i32, %c0_i32_0 : i32, i32
  }
  func.func @transform_3(%arg0: i32) -> (i32, i32) {
    %c0_i32 = arith.constant 0 : i32
    %c0_i32_0 = arith.constant 0 : i32
    %c0_i32_1 = arith.constant 0 : i32
    return %c0_i32, %c0_i32_0 : i32, i32
  }
  func.func @transform_4(%arg0: i32) -> (i32, i32) {
    %c0_i32 = arith.constant 0 : i32
    %c0_i32_0 = arith.constant 0 : i32
    %c0_i32_1 = arith.constant 0 : i32
    return %c0_i32, %c0_i32_0 : i32, i32
  }
  func.func @transform_5(%arg0: i32) -> (i32, i32) {
    %c0_i32 = arith.constant 0 : i32
    %c0_i32_0 = arith.constant 0 : i32
    %c0_i32_1 = arith.constant 0 : i32
    return %c0_i32, %c0_i32_0 : i32, i32
  }
  func.func @transform_6(%arg0: i32) -> (i32, i32) {
    %c0_i32 = arith.constant 0 : i32
    %c0_i32_0 = arith.constant 0 : i32
    %c0_i32_1 = arith.constant 0 : i32
    return %c0_i32, %c0_i32_0 : i32, i32
  }
  func.func @transform_7(%arg0: i32) -> (i32, i32) {
    %c0_i32 = arith.constant 0 : i32
    %c0_i32_0 = arith.constant 0 : i32
    %c0_i32_1 = arith.constant 0 : i32
    return %c0_i32, %c0_i32_0 : i32, i32
  }
  func.func @transform_8(%arg0: i32) -> (i32, i32) {
    %c0_i32 = arith.constant 0 : i32
    %c0_i32_0 = arith.constant 0 : i32
    %c0_i32_1 = arith.constant 0 : i32
    return %c0_i32, %c0_i32_0 : i32, i32
  }
  func.func @transform_9(%arg0: i32) -> (i32, i32) {
    %c0_i32 = arith.constant 0 : i32
    %c0_i32_0 = arith.constant 0 : i32
    return %c0_i32, %arg0 : i32, i32
  }
}

</mosaic_0001>

<bundles_post_ra>
// kernel: mlp_forward.1
= control target key start
LH: loop header
LB: loop body
LE: loop exit
PB: predicated region body
PF: predicated region fallthrough
CT: control target
= control target key end

     0   :  { %s4376_s11 = smov 0   ;;  %s6899_s0 = inlined_call_operand.vmem [shape: f32[6,512], index: 0, kind: input, shape index: {}]   ;;  %s6900_s1 = inlined_call_operand.vmem [shape: f32[48,6], index: 1, kind: input, shape index: {}]   ;;  %s6901_s2 = inlined_call_operand.vmem [shape: f32[48,1], index: 2, kind: input, shape index: {}]   ;;  %s6902_s3 = inlined_call_operand.vmem [shape: f32[32,48], index: 3, kind: input, shape index: {}]   ;;  %s6903_s4 = inlined_call_operand.vmem [shape: f32[32,1], index: 4, kind: input, shape index: {}]   ;;  %s6904_s5 = inlined_call_operand.vmem [shape: f32[32,32], index: 5, kind: input, shape index: {}]   ;;  %s6905_s6 = inlined_call_operand.vmem [shape: f32[32,1], index: 6, kind: input, shape index: {}]   ;;  %s6906_s7 = inlined_call_operand.vmem [shape: f32[1,32], index: 7, kind: input, shape index: {}]   ;;  %s6907_s8 = inlined_call_operand.<no memory space> [shape: f32[1,1], index: 8, kind: input, shape index: {}]   ;;  %s6908_s9 = inlined_call_operand.vmem [shape: f32[1,512], index: 9, kind: output, shape index: {}]  }
   0x1   :  { %v14_v0 = vstv %s6907_s8 }
   0x2   :  { %15 = vst [vmem:[#allocation2] sm:$0x1] %v14_v0 }
   0x3 LB: > { %s3886_s12 = sadd.s32 4294967295, %s4312_s11   ;;  %p3890_p0 = scmp.ge.s32.totalorder %s4312_s11, 1  ;;  %s4312_s11 = sphi %s4376_s11, %s21_s11  }
   0x4   : > { %p290_p1 = scmp.lt.s32.totalorder %s4312_s11, 3 }
   0x6   : > { %p291_p2 = pnand %p3890_p0, %p290_p1 }
   0x8   : > { %294 = sbr.rel (%p291_p2) target bundleno = 1694 (0x69e), region = 56 }
   0xf   : > { %s3891_s13 = sshll.u32 %s3886_s12, 1  ;;  %v6909_v1 = vmov 0.0   ;;  %v4315_v2 = vmov 0   ;;  %v344_v3 = vld [vmem:[%s6901_s2] sm:$0xff]  ;;  %v346_v4 = vld [vmem:[%s6901_s2 + $0x10] sm:$0xff]  ;;  %v345_v5 = vld [vmem:[%s6901_s2 + $0x8] sm:$0xff] }
  0x10   : > { %p326_p3 = scmp.lt.s32.totalorder %s3891_s13, 3  ;;  %470 = vmatprep.mubr.f32.mxu0 %v6909_v1  ;;  %488 = vmatprep.mubr.f32.mxu1 %v6909_v1  ;;  %vm399_vm0 = vcmask 1045504   ;;  %v338_v6 = vld [vmem:[%s6900_s1] sm:$0xff]  ;;  %vm380_vm1 = vcmask 48128   ;;  %v341_v9 = vld [vmem:[%s6900_s1 + $0x18] sm:$0xff]  ;;  %v339_v12 = vld [vmem:[%s6900_s1 + $0x8] sm:$0xff] }
  0x11   : > { %4184 = vset.pattern.permute.xlu0 %v4315_v2  ;;  %4185 = vset.pattern.permute.xlu1 %v4315_v2  ;;  %v348_v10 = vld [vmem:[%s6901_s2 + $0x20] sm:$0xff]  ;;  %v347_v11 = vld [vmem:[%s6901_s2 + $0x18] sm:$0xff]  ;;  %v349_v15 = vld [vmem:[%s6901_s2 + $0x28] sm:$0xff] }
  0x12   : > { %s7113_s13 = smov (!%p326_p3, %s3891_s13), 3  ;;  %352 = vperm.xlu0 %4184, %v344_v3   ;;  %362 = vperm.xlu1 %4185, %v346_v4   ;;  %v342_v13 = vld [vmem:[%s6900_s1 + $0x20] sm:$0xff]  ;;  %v340_v16 = vld [vmem:[%s6900_s1 + $0x10] sm:$0xff]  ;;  %v343_v17 = vld [vmem:[%s6900_s1 + $0x28] sm:$0xff] }
  0x13   : > { %s3892_s19 = sshll.u32 %s7113_s13, 3  ;;  %v1759_v14 = vld [vmem:[%s6903_s4] sm:$0xff]  ;;  %v1761_v18 = vld [vmem:[%s6903_s4 + $0x10] sm:$0xff]  ;;  %v1760_v19 = vld [vmem:[%s6903_s4 + $0x8] sm:$0xff]  ;;  %s334_s17 = scalar_lea.vmem %s6908_s9, %s7113_s13 }
  0x14   : > { %s329_s22 = scalar_lea.vmem %s6899_s0, %s3892_s19  ;;  %v2729_v20 = vld [vmem:[%s6905_s6] sm:$0xff]  ;;  %v1762_v21 = vld [vmem:[%s6903_s4 + $0x18] sm:$0xff]  ;;  %v2731_v22 = vld [vmem:[%s6905_s6 + $0x10] sm:$0xff] }
  0x15   : > { %v337_v7 = vld [vmem:[%s329_s22 + $0x8] sm:$0x3f]  ;;  %v336_v8 = vld [vmem:[%s329_s22] sm:$0x3f]  ;;  %v2732_v25 = vld [vmem:[%s6905_s6 + $0x18] sm:$0xff] }
  0x16   : > { %357 = vperm.xlu0 %4184, %v345_v5   ;;  %3894 = vmatprep.subr.msk.mxu0 %vm399_vm0, %v337_v7  ;;  %v2730_v23 = vld [vmem:[%s6905_s6 + $0x8] sm:$0xff]  ;;  %v3696_v24 = vld [vmem:[#allocation2] sm:$0x1]  ;;  %v6922_v5 = vmov 683565275  }
  0x17   : > { %4053 = vmatprep.subr.msk.mxu1 %vm399_vm0, %v337_v7  ;;  %3895 = vmatpush1.msk.msra.mxu0 %vm399_vm0, %v336_v8 }
  0x18   : > { %4054 = vmatpush1.msk.msra.mxu1 %vm399_vm0, %v336_v8  ;;  %3896 = vmatmul.mubr.msk.f32.vlgmr.msra.gmra.mrb[0].mxu0 %vm380_vm1, %v338_v6 }
  0x19   : > { %3899 = vmatmul.mubr.msk.f32.vlgmr.msra.gmra.mrb[0].mxu1 %vm380_vm1, %v341_v9  ;;  %476 = vmatprep.mubr.f32.mxu0 %v6909_v1  ;;  %v6927_v9 = vmov 2475754826  }
  0x1a   : > { %494 = vmatprep.mubr.f32.mxu1 %v6909_v1  ;;  %372 = vperm.xlu0 %4184, %v348_v10  }
  0x1b   : > { %367 = vperm.xlu1 %4185, %v347_v11   ;;  %v6925_v11 = vmov 2131351028  }
  0x1c   : > { %3897 = vmatmul.mubr.msk.f32.gmra.mrb[2].mxu0 %vm380_vm1, %v339_v12 }
  0x1d   : > { %3900 = vmatmul.mubr.msk.f32.gmra.mrb[2].mxu1 %vm380_vm1, %v342_v13  ;;  %482 = vmatprep.mubr.f32.mxu0 %v6909_v1  ;;  %v6914_v13 = vmov 2102212464  }
  0x1e   : > { %500 = vmatprep.mubr.f32.mxu1 %v6909_v1  ;;  %1765 = vperm.xlu0 %4184, %v1759_v14  }
  0x1f   : > { %377 = vperm.xlu1 %4185, %v349_v15   ;;  %v6920_v15 = vmov 920167782  }
  0x20   : > { %3898 = vmatmul.mubr.msk.f32.gmra.mrb[4].mxu0 %vm380_vm1, %v340_v16 }
  0x21   : > { %3901 = vmatmul.mubr.msk.f32.gmra.mrb[4].mxu1 %vm380_vm1, %v343_v17  ;;  %2830 = vmatprep.mubr.f32.mxu0 %v6909_v1 }
  0x22   : > { %1860 = vmatprep.mubr.f32.mxu1 %v6909_v1  ;;  %1775 = vperm.xlu0 %4184, %v1761_v18  }
  0x23   : > { %1770 = vperm.xlu1 %4185, %v1760_v19  }
  0x26   : > { %2735 = vperm.xlu0 %4184, %v2729_v20  }
  0x27   : > { %1780 = vperm.xlu1 %4185, %v1762_v21  }
  0x2a   : > { %2745 = vperm.xlu0 %4184, %v2731_v22  }
  0x2b   : > { %2740 = vperm.xlu1 %4185, %v2730_v23   ;;  %v6918_v23 = vmov 1326507024  }
  0x2e   : > { %3699 = vperm.xlu0 %4184, %v3696_v24  }
  0x2f   : > { %2750 = vperm.xlu1 %4185, %v2732_v25  }
  0x91   : > { %v4464_v26 = vpop.permute.xlu1 %362  ;;  %v353_v27 = vpop.permute.xlu0 %352 }
  0x9a   : > { %v368_v28 = vpop.permute.xlu1 %367 }
  0xeb   : > { %v472_v29 = vpop.f32.mrb[0].mxu0 }
  0xec   : > { %v490_v30 = vpop.f32.mrb[0].mxu1  ;;  %v4466_v31 = vadd.f32 %v472_v29, %v353_v27  ;;  %v474_v33 = vpop.f32.mrb[1].mxu0 }
  0xed   : > { %v4468_v32 = vadd.f32 %v490_v30, %v368_v28  ;;  %v492_v34 = vpop.f32.mrb[1].mxu1  ;;  %v4470_v35 = vadd.f32 %v474_v33, %v353_v27 }
  0xee   : > { %v507_v36 = vand.u32 2147483647, %v4466_v31  ;;  %v510_v37 = vand.u32 2139095040, %v4466_v31  ;;  %v4489_v57 = vadd.f32 %v492_v34, %v368_v28 }
  0xef   : > { %6974 = vst [vmem:[#allocation3_spill] sm:$0xff] %v4468_v32  ;;  %v1131_v38 = vand.u32 2147483647, %v4468_v32  ;;  %v1134_v39 = vand.u32 2139095040, %v4468_v32  ;;  %v4476_v40 = vpop.f32.mrb[2].mxu0  ;;  %v614_v42 = vand.u32 2139095040, %v4470_v35 }
  0xf0   : > { %v511_v41 = vshrl.u32 %v510_v37, 23  ;;  %v514_v43 = vand.u32 8388607, %v507_v36  ;;  %v4483_v48 = vpop.f32.mrb[2].mxu1  ;;  %v4485_v52 = vpop.f32.mrb[3].mxu0  ;;  %6975 = vst [vmem:[#allocation4_spill] sm:$0xff] %v4489_v57 }
  0xf1   : > { %v1135_v44 = vshrl.u32 %v1134_v39, 23  ;;  %v1138_v45 = vand.u32 8388607, %v1131_v38  ;;  %v615_v47 = vshrl.u32 %v614_v42, 23  ;;  %v4487_v53 = vpop.f32.mrb[3].mxu1  ;;  %v1238_v3 = vand.u32 2139095040, %v4489_v57 }
  0xf2   : > { %v3902_v46 = vadd.s32 4294967169, %v511_v41  ;;  %v515_v54 = vor.u32 8388608, %v514_v43  ;;  %v6913_v2 = vand.u32 2147483647, %v4470_v35 }
  0xf3   : > { %v3926_v49 = vadd.s32 4294967169, %v1135_v44  ;;  %v3906_v51 = vadd.s32 4294967169, %v615_v47  ;;  %v1139_v55 = vor.u32 8388608, %v1138_v45  ;;  %v4506_v17 = vpop.f32.mrb[4].mxu0 }
  0xf4   : > { %v517_v50 = vadd.s32 1, %v3902_v46  ;;  %v4493_v63 = vshll.u32 %v515_v54, 8 }
  0xf5   : > { %v1141_v56 = vadd.s32 1, %v3926_v49  ;;  %v4491_v62 = vadd.s32 1, %v3906_v51  ;;  %v4495_v0 = vshll.u32 %v1139_v55, 8 }
  0xf6   : > { %vm518_vm2 = vcmp.gt.s32.totalorder %v517_v50, 0 }
  0xf7   : > { %v519_v58 = vsel %vm518_vm2, %v517_v50, 0  ;;  %vm1142_vm3 = vcmp.gt.s32.totalorder %v1141_v56, 0  ;;  %vm622_vm5 = vcmp.gt.s32.totalorder %v4491_v62, 0 }
  0xf8   : > { %v520_v59 = vshrl.u32 %v519_v58, 5  ;;  %v521_v60 = vand.u32 31, %v519_v58  ;;  %v1143_v61 = vsel %vm1142_vm3, %v1141_v56, 0 }
  0xf9   : > { %v4500_v7 = vshrl.u32 %v1143_v61, 5  ;;  %v1145_v8 = vand.u32 31, %v1143_v61 }
  0xfa   : > { %v522_v4 = vsub.s32 32, %v521_v60  ;;  %v524_v6 = vshll.u32 %v6922_v5, %v521_v60  ;;  %v527_v10 = vshll.u32 %v6927_v9, %v521_v60  ;;  %v530_v12 = vshll.u32 %v6925_v11, %v521_v60 }
  0xfb   : > { %v533_v14 = vshll.u32 %v6914_v13, %v521_v60  ;;  %v536_v16 = vshll.u32 %v6920_v15, %v521_v60  ;;  %vm539_vm4 = vcmp.lt.s32.totalorder %v520_v59, 1  ;;  %vm541_vm6 = vcmp.lt.s32.totalorder %v520_v59, 3 }
  0xfc   : > { %v525_v18 = vshrl.u32 %v6927_v9, %v522_v4  ;;  %v528_v19 = vshrl.u32 %v6925_v11, %v522_v4  ;;  %v531_v20 = vshrl.u32 %v6914_v13, %v522_v4  ;;  %v523_v21 = vshrl.u32 %v6922_v5, %v522_v4 }
  0xfd   : > { %v534_v22 = vshrl.u32 %v6920_v15, %v522_v4  ;;  %v537_v24 = vshrl.u32 %v6918_v23, %v522_v4  ;;  %v1146_v29 = vsub.s32 32, %v1145_v8  ;;  %vm542_vm7 = vcmp.lt.s32.totalorder %v520_v59, 4 }
  0xfe   : > { %v526_v25 = vor.u32 %v525_v18, %v524_v6  ;;  %v529_v27 = vor.u32 %v528_v19, %v527_v10  ;;  %v532_v28 = vor.u32 %v531_v20, %v530_v12  ;;  %v1148_v34 = vshll.u32 %v6922_v5, %v1145_v8 }
  0xff   : > { %v535_v30 = vor.u32 %v534_v22, %v533_v14  ;;  %v538_v33 = vor.u32 %v537_v24, %v536_v16  ;;  %v1151_v46 = vshll.u32 %v6927_v9, %v1145_v8  ;;  %vm540_vm8 = vcmp.lt.s32.totalorder %v520_v59, 2 }
 0x100   : > { %v543_v37 = vsel %vm539_vm4, %v523_v21, %v526_v25  ;;  %v544_v39 = vsel %vm542_vm7, %v532_v28, 2102212464  ;;  %v547_v41 = vsel %vm539_vm4, %v526_v25, %v529_v27  ;;  %v551_v42 = vsel %vm539_vm4, %v529_v27, %v532_v28 }
 0x101   : > { %v545_v43 = vsel %vm541_vm6, %v529_v27, %v544_v39  ;;  %v548_v44 = vsel %vm542_vm7, %v535_v30, 920167782  ;;  %v552_v45 = vsel %vm542_vm7, %v538_v33, 1326507024  ;;  %v1149_v50 = vshrl.u32 %v6927_v9, %v1146_v29 }
 0x102   : > { %v549_v47 = vsel %vm541_vm6, %v532_v28, %v548_v44  ;;  %v553_v49 = vsel %vm541_vm6, %v535_v30, %v552_v45  ;;  %v546_v51 = vsel %vm540_vm8, %v543_v37, %v545_v43  ;;  %v1152_v56 = vshrl.u32 %v6925_v11, %v1146_v29 }
 0x103   : > { %v550_v54 = vsel %vm540_vm8, %v547_v41, %v549_v47  ;;  %v554_v55 = vsel %vm540_vm8, %v551_v42, %v553_v49  ;;  %v1150_v6 = vor.u32 %v1149_v50, %v1148_v34  ;;  %v1154_v59 = vshll.u32 %v6925_v11, %v1145_v8 }
 0x104   : > { %v4526_v58 = vmul.u32.u64.low %v4493_v63, %v554_v55  ;;  %v4527_v60 = vmul.u32.u64.high %v4493_v63, %v554_v55, %v4526_v58  ;;  %v4530_v61 = vmul.u32.u64.low %v4493_v63, %v550_v54  ;;  %v4531_v4 = vmul.u32.u64.high %v4493_v63, %v550_v54, %v4530_v61  ;;  %v4564_v55 = vpop.f32.mrb[4].mxu1 }
 0x105   : > { %v1153_v10 = vor.u32 %v1152_v56, %v1151_v46  ;;  %v1155_v12 = vshrl.u32 %v6914_v13, %v1146_v29  ;;  %v1157_v14 = vshll.u32 %v6914_v13, %v1145_v8  ;;  %v1158_v16 = vshrl.u32 %v6920_v15, %v1146_v29 }
 0x106   : > { %v1160_v18 = vshll.u32 %v6920_v15, %v1145_v8  ;;  %v1161_v19 = vshrl.u32 %v6918_v23, %v1146_v29  ;;  %v562_v20 = vmul.u32 %v4493_v63, %v546_v51  ;;  %v1147_v21 = vshrl.u32 %v6922_v5, %v1146_v29 }
 0x107   : > { %v1156_v22 = vor.u32 %v1155_v12, %v1154_v59  ;;  %v623_v24 = vsel %vm622_vm5, %v4491_v62, 0  ;;  %vm564_vm9 = vc.u32 %v4527_v60, %v4530_v61  ;;  %v565_v25 = vadd.s32 1, %v4531_v4 }
 0x108   : > { %v1159_v27 = vor.u32 %v1158_v16, %v1157_v14  ;;  %vm1163_vm10 = vcmp.lt.s32.totalorder %v4500_v7, 1  ;;  %v1162_v8 = vor.u32 %v1161_v19, %v1160_v18  ;;  %vm1165_vm11 = vcmp.lt.s32.totalorder %v4500_v7, 3 }
 0x109   : > { %vm1166_vm12 = vcmp.lt.s32.totalorder %v4500_v7, 4  ;;  %v1171_v63 = vsel %vm1163_vm10, %v1150_v6, %v1153_v10  ;;  %v566_v28 = vsel %vm564_vm9, %v565_v25, %v4531_v4  ;;  %v1175_v33 = vsel %vm1163_vm10, %v1153_v10, %v1156_v22 }
 0x10a   : > { %v1168_v29 = vsel %vm1166_vm12, %v1156_v22, 2102212464  ;;  %v1172_v30 = vsel %vm1166_vm12, %v1159_v27, 920167782  ;;  %v567_v62 = vadd.s32 %v566_v28, %v562_v20  ;;  %vm1164_vm13 = vcmp.lt.s32.totalorder %v4500_v7, 2 }
 0x10b   : > { %v1173_v34 = vsel %vm1165_vm11, %v1156_v22, %v1172_v30  ;;  %v1176_v37 = vsel %vm1166_vm12, %v1162_v8, 1326507024  ;;  %v1167_v39 = vsel %vm1163_vm10, %v1147_v21, %v1150_v6  ;;  %v1169_v41 = vsel %vm1165_vm11, %v1153_v10, %v1168_v29 }
 0x10c   : > { %v1174_v42 = vsel %vm1164_vm13, %v1171_v63, %v1173_v34  ;;  %v1177_v43 = vsel %vm1165_vm11, %v1159_v27, %v1176_v37  ;;  %v568_v44 = vadd.s32 536870912, %v567_v62  ;;  %v625_v51 = vand.u32 31, %v623_v24 }
 0x10d   : > { %v1178_v45 = vsel %vm1164_vm13, %v1175_v33, %v1177_v43  ;;  %v4554_v46 = vmul.u32.u64.low %v4495_v0, %v1174_v42  ;;  %v4555_v47 = vmul.u32.u64.high %v4495_v0, %v1174_v42, %v4554_v46  ;;  %v1170_v7 = vsel %vm1164_vm13, %v1167_v39, %v1169_v41 }
 0x10e   : > { %v4559_v49 = vmul.u32.u64.low %v4495_v0, %v1178_v45  ;;  %v4560_v50 = vmul.u32.u64.high %v4495_v0, %v1178_v45, %v4559_v49  ;;  %v4562_v54 = vshrl.u32 %v568_v44, 30  ;;  %v626_v56 = vsub.s32 32, %v625_v51 }
 0x10f   : > { %v1189_v4 = vadd.s32 1, %v4555_v47  ;;  %v618_v6 = vand.u32 8388607, %v6913_v2  ;;  %v1239_v10 = vshrl.u32 %v1238_v3, 23  ;;  %v1186_v59 = vmul.u32 %v4495_v0, %v1170_v7 }
 0x110   : > { %v570_v58 = vshll.u32 %v4562_v54, 30  ;;  %vm1188_vm14 = vc.u32 %v4560_v50, %v4554_v46  ;;  %v4575_v12 = vshrl.u32 %v623_v24, 5  ;;  %v631_v14 = vshll.u32 %v6927_v9, %v625_v51 }
 0x111   : > { %v1190_v18 = vsel %vm1188_vm14, %v1189_v4, %v4555_v47  ;;  %v629_v19 = vshrl.u32 %v6927_v9, %v626_v56  ;;  %v632_v20 = vshrl.u32 %v6925_v11, %v626_v56  ;;  %v628_v3 = vshll.u32 %v6922_v5, %v625_v51 }
 0x112   : > { %v4578_v16 = vsub.s32 %v567_v62, %v570_v58  ;;  %v1191_v21 = vadd.s32 %v1190_v18, %v1186_v59  ;;  %v634_v0 = vshll.u32 %v6925_v11, %v625_v51  ;;  %v635_v22 = vshrl.u32 %v6914_v13, %v626_v56 }
 0x113   : > { %v633_v25 = vor.u32 %v632_v20, %v631_v14  ;;  %v637_v27 = vshll.u32 %v6914_v13, %v625_v51  ;;  %v638_v8 = vshrl.u32 %v6920_v15, %v626_v56  ;;  %v640_v29 = vshll.u32 %v6920_v15, %v625_v51 }
 0x114   : > { %v573_v24 = vsub.s32 0, %v4578_v16  ;;  %v1192_v63 = vadd.s32 536870912, %v1191_v21  ;;  %v636_v28 = vor.u32 %v635_v22, %v634_v0  ;;  %v641_v30 = vshrl.u32 %v6918_v23, %v626_v56 }
 0x115   : > { %v630_v62 = vor.u32 %v629_v19, %v628_v3  ;;  %v639_v34 = vor.u32 %v638_v8, %v637_v27  ;;  %vm646_vm15 = vcmp.lt.s32.totalorder %v4575_v12, 4  ;;  %v6912_v41 = vand.u32 2147483647, %v4489_v57 }
 0x116   : > { %v3903_v33 = vmin.u32 %v573_v24, %v4578_v16  ;;  %v4592_v37 = vshrl.u32 %v1192_v63, 30  ;;  %v642_v39 = vor.u32 %v641_v30, %v640_v29  ;;  %vm643_vm0 = vcmp.lt.s32.totalorder %v4575_v12, 1 }
 0x117   : > { %v652_v43 = vsel %vm646_vm15, %v639_v34, 920167782  ;;  %v3930_v44 = vadd.s32 4294967169, %v1239_v10  ;;  %v619_v47 = vor.u32 8388608, %v618_v6  ;;  %vm645_vm1 = vcmp.lt.s32.totalorder %v4575_v12, 3 }
 0x118   : > { %v575_v42 = vclz %v3903_v33  ;;  %v1194_v45 = vshll.u32 %v4592_v37, 30  ;;  %v655_v49 = vsel %vm643_vm0, %v633_v25, %v636_v28  ;;  %v651_v7 = vsel %vm643_vm0, %v630_v62, %v633_v25 }
 0x119   : > { %v653_v58 = vsel %vm645_vm1, %v636_v28, %v652_v43  ;;  %v656_v4 = vsel %vm646_vm15, %v642_v39, 1326507024  ;;  %vm644_vm2 = vcmp.lt.s32.totalorder %v4575_v12, 2  ;;  %v648_v6 = vsel %vm646_vm15, %v636_v28, 2102212464  ;;  %v4640_v43 = vpop.permute.xlu0 %357 }
 0x11a   : > { %v3904_v51 = vadd.s32 4294967294, %v575_v42  ;;  %v4609_v59 = vsub.s32 %v1191_v21, %v1194_v45  ;;  %v657_v10 = vsel %vm645_vm1, %v639_v34, %v656_v4  ;;  %v627_v14 = vshrl.u32 %v6922_v5, %v626_v56  ;;  %v4636_v42 = vpop.f32.mrb[5].mxu0 }
 0x11b   : > { %v658_v18 = vsel %vm644_vm2, %v655_v49, %v657_v10  ;;  %v1245_v19 = vadd.s32 1, %v3930_v44  ;;  %v654_v21 = vsel %vm644_vm2, %v651_v7, %v653_v58  ;;  %v659_v0 = vshll.u32 %v619_v47, 8 }
 0x11c   : > { %vm3905_vm3 = vcmp.lt.s32.totalorder %v3904_v51, 0  ;;  %v1197_v3 = vsub.s32 0, %v4609_v59  ;;  %v647_v24 = vsel %vm643_vm0, %v627_v14, %v630_v62  ;;  %v649_v27 = vsel %vm645_vm1, %v633_v25, %v648_v6 }
 0x11d   : > { %v578_v20 = vsel %vm3905_vm3, 0, %v3904_v51  ;;  %vm1246_vm4 = vcmp.gt.s32.totalorder %v1245_v19, 0  ;;  %v4627_v8 = vmul.u32.u64.low %v659_v0, %v658_v18  ;;  %v4628_v63 = vmul.u32.u64.high %v659_v0, %v658_v18, %v4627_v8 }
 0x11e   : > { %v583_v22 = vsub.s32 4294967266, %v578_v20  ;;  %v3927_v56 = vmin.u32 %v1197_v3, %v4609_v59  ;;  %v1247_v28 = vsel %vm1246_vm4, %v1245_v19, 0  ;;  %v1242_v33 = vand.u32 8388607, %v6912_v41 }
 0x11f   : > { %v4630_v29 = vmul.u32.u64.low %v659_v0, %v654_v21  ;;  %v4631_v30 = vmul.u32.u64.high %v659_v0, %v654_v21, %v4630_v29  ;;  %v1249_v62 = vand.u32 31, %v1247_v28  ;;  %v650_v25 = vsel %vm644_vm2, %v647_v24, %v649_v27 }
 0x120   : > { %v584_v34 = vadd.s32 127, %v583_v22  ;;  %v1199_v39 = vclz %v3927_v56  ;;  %v1243_v49 = vor.u32 8388608, %v1242_v33  ;;  %v4647_v51 = vadd.f32 %v4476_v40, %v4640_v43 }
 0x121   : > { %vm668_vm5 = vc.u32 %v4628_v63, %v4630_v29  ;;  %v1250_v45 = vsub.s32 32, %v1249_v62  ;;  %v669_v47 = vadd.s32 1, %v4631_v30  ;;  %v579_v7 = vsub.s32 32, %v578_v20 }
 0x122   : > { %v3928_v44 = vadd.s32 4294967294, %v1199_v39  ;;  %6976 = vst [vmem:[#allocation5_spill] sm:$0xff] %v4647_v51  ;;  %v585_v58 = vshll.u32 %v584_v34, 23  ;;  %v666_v4 = vmul.u32 %v659_v0, %v650_v25  ;;  %v563_v12 = vadd.s32 %v4530_v61, %v4527_v60 }
 0x123   : > { %v1187_v6 = vadd.s32 %v4554_v46, %v4560_v50  ;;  %v670_v14 = vsel %vm668_vm5, %v669_v47, %v4631_v30  ;;  %v1252_v3 = vshll.u32 %v6922_v5, %v1249_v62  ;;  %v1253_v40 = vshrl.u32 %v6927_v9, %v1250_v45 }
 0x124   : > { %vm3929_vm6 = vcmp.lt.s32.totalorder %v3928_v44, 0  ;;  %v671_v19 = vadd.s32 %v670_v14, %v666_v4  ;;  %v1255_v21 = vshll.u32 %v6927_v9, %v1249_v62  ;;  %v1256_v22 = vshrl.u32 %v6925_v11, %v1250_v45 }
 0x125   : > { %v1202_v10 = vsel %vm3929_vm6, 0, %v3928_v44  ;;  %v1258_v0 = vshll.u32 %v6925_v11, %v1249_v62  ;;  %v4659_v24 = vshll.u32 %v1243_v49, 8  ;;  %v581_v60 = vshrl.u32 %v563_v12, %v579_v7 }
 0x126   : > { %v1207_v18 = vsub.s32 4294967266, %v1202_v10  ;;  %v586_v61 = vor.u32 4788187, %v585_v58  ;;  %v672_v46 = vadd.s32 536870912, %v671_v19  ;;  %v1259_v50 = vshrl.u32 %v6914_v13, %v1250_v45 }
 0x127   : > { %v1261_v56 = vshll.u32 %v6914_v13, %v1249_v62  ;;  %v1262_v8 = vshrl.u32 %v6920_v15, %v1250_v45  ;;  %v1264_v30 = vshll.u32 %v6920_v15, %v1249_v62  ;;  %v580_v33 = vshll.u32 %v4578_v16, %v578_v20 }
 0x128   : > { %v1208_v27 = vadd.s32 127, %v1207_v18  ;;  %v4666_v34 = vshrl.u32 %v672_v46, 30  ;;  %v1248_v39 = vshrl.u32 %v1247_v28, 5  ;;  %v1254_v25 = vor.u32 %v1253_v40, %v1252_v3 }
 0x129   : > { %v1257_v44 = vor.u32 %v1256_v22, %v1255_v21  ;;  %v1260_v47 = vor.u32 %v1259_v50, %v1258_v0  ;;  %v1263_v49 = vor.u32 %v1262_v8, %v1261_v56  ;;  %v1265_v7 = vshrl.u32 %v6918_v23, %v1250_v45 }
 0x12a   : > { %v582_v58 = vor.u32 %v581_v60, %v580_v33  ;;  %v1203_v4 = vsub.s32 32, %v1202_v10  ;;  %v674_v12 = vshll.u32 %v4666_v34, 30  ;;  %v718_v14 = vand.u32 2139095040, %v4647_v51 }
 0x12b   : > { %v587_v18 = vand.u32 2147483647, %v586_v61  ;;  %v1209_v1 = vshll.u32 %v1208_v27, 23  ;;  %v1251_v62 = vshrl.u32 %v6922_v5, %v1250_v45  ;;  %v1266_v16 = vor.u32 %v1265_v7, %v1264_v30 }
 0x12c   : > { %v1204_v20 = vshll.u32 %v4609_v59, %v1202_v10  ;;  %v4673_v28 = vsub.s32 %v671_v19, %v674_v12  ;;  %vm1267_vm7 = vcmp.lt.s32.totalorder %v1248_v39, 1  ;;  %vm1270_vm8 = vcmp.lt.s32.totalorder %v1248_v39, 4 }
 0x12d   : > { %vm1269_vm9 = vcmp.lt.s32.totalorder %v1248_v39, 3  ;;  %v1272_v3 = vsel %vm1270_vm8, %v1260_v47, 2102212464  ;;  %v1275_v40 = vsel %vm1267_vm7, %v1254_v25, %v1257_v44  ;;  %v1276_v21 = vsel %vm1270_vm8, %v1263_v49, 920167782 }
 0x12e   : > { %v1205_v22 = vshrl.u32 %v1187_v6, %v1203_v4  ;;  %v677_v0 = vsub.s32 0, %v4673_v28  ;;  %vm1268_vm10 = vcmp.lt.s32.totalorder %v1248_v39, 2  ;;  %v1277_v60 = vsel %vm1269_vm9, %v1260_v47, %v1276_v21 }
 0x12f   : > { %v1210_v61 = vor.u32 4788187, %v1209_v1  ;;  %v1278_v46 = vsel %vm1268_vm10, %v1275_v40, %v1277_v60  ;;  %v1279_v45 = vsel %vm1267_vm7, %v1257_v44, %v1260_v47  ;;  %v1280_v50 = vsel %vm1270_vm8, %v1266_v16, 1326507024 }
 0x130   : > { %v3907_v59 = vmin.u32 %v677_v0, %v4673_v28  ;;  %v1271_v10 = vsel %vm1267_vm7, %v1251_v62, %v1254_v25  ;;  %v1273_v19 = vsel %vm1269_vm9, %v1257_v44, %v1272_v3  ;;  %v1281_v27 = vsel %vm1269_vm9, %v1263_v49, %v1280_v50  ;;  %v4700_v0 = vpop.permute.xlu0 %372 }
 0x131   : > { %v589_v56 = vcvt.s32.f32 %v582_v58  ;;  %v1282_v8 = vsel %vm1268_vm10, %v1279_v45, %v1281_v27  ;;  %v4680_v30 = vmul.u32.u64.low %v4659_v24, %v1278_v46  ;;  %v4681_v6 = vmul.u32.u64.high %v4659_v24, %v1278_v46, %v4680_v30 }
 0x132   : > { %v1206_v33 = vor.u32 %v1205_v22, %v1204_v20  ;;  %v679_v7 = vclz %v3907_v59  ;;  %v4685_v1 = vmul.u32.u64.low %v4659_v24, %v1282_v8  ;;  %v4686_v4 = vmul.u32.u64.high %v4659_v24, %v1282_v8, %v4685_v1  ;;  %v4698_v22 = vpop.f32.mrb[5].mxu1 }
 0x133   : > { %v590_v47 = vmul.f32 %v589_v56, %v587_v18  ;;  %v1274_v12 = vsel %vm1268_vm10, %v1271_v10, %v1273_v19  ;;  %v719_v25 = vshrl.u32 %v718_v14, 23  ;;  %v1211_v44 = vand.u32 2147483647, %v1210_v61 }
 0x134   : > { %v3908_v49 = vadd.s32 4294967294, %v679_v7  ;;  %v6911_v58 = vand.u32 2147483647, %v4647_v51  ;;  %v593_v62 = vsub.s32 4, %v4562_v54  ;;  %v1293_v16 = vadd.s32 1, %v4681_v6 }
 0x135   : > { %v3910_v3 = vadd.s32 4294967169, %v719_v25  ;;  %v1213_v40 = vcvt.s32.f32 %v1206_v33  ;;  %v1290_v20 = vmul.u32 %v4659_v24, %v1274_v12  ;;  %vm1292_vm12 = vc.u32 %v4686_v4, %v4680_v30 }
 0x136   : > { %vm3909_vm11 = vcmp.lt.s32.totalorder %v3908_v49, 0  ;;  %v591_v18 = vxor.u32 2147483648, %v590_v47  ;;  %v1294_v14 = vsel %vm1292_vm12, %v1293_v16, %v4681_v6  ;;  %v722_v24 = vand.u32 8388607, %v6911_v58 }
 0x137   : > { %v4695_v39 = vsel %vm3909_vm11, 0, %v3908_v49  ;;  %v725_v21 = vadd.s32 1, %v3910_v3  ;;  %v4702_v60 = vmul.f32 %v1213_v40, %v1211_v44  ;;  %v1295_v46 = vadd.s32 %v1294_v14, %v1290_v20 }
 0x138   : > { %v687_v61 = vsub.s32 4294967266, %v4695_v39  ;;  %v4709_v45 = vadd.f32 %v4483_v48, %v4700_v0  ;;  %vm509_vm14 = vcmp.lt.s32.totalorder %v4466_v31, 0  ;;  %v1217_v27 = vsub.s32 4, %v4592_v37 }
 0x139   : > { %vm726_vm13 = vcmp.gt.s32.totalorder %v725_v21, 0  ;;  %v1296_v59 = vadd.s32 536870912, %v1295_v46  ;;  %v4713_v19 = vsel %vm509_vm14, %v593_v62, %v4562_v54  ;;  %v667_v56 = vadd.s32 %v4630_v29, %v4628_v63 }
 0x13a   : > { %6977 = vst [vmem:[#allocation6_spill] sm:$0xff] %v4709_v45  ;;  %v688_v50 = vadd.s32 127, %v687_v61  ;;  %v727_v10 = vsel %vm726_vm13, %v725_v21, 0  ;;  %v592_v6 = vsel %vm509_vm14, %v591_v18, %v590_v47  ;;  %v1215_v33 = vxor.u32 2147483648, %v4702_v60 }
 0x13b   : > { %v729_v8 = vand.u32 31, %v727_v10  ;;  %v4719_v7 = vshrl.u32 %v1296_v59, 30  ;;  %v723_v48 = vor.u32 8388608, %v722_v24  ;;  %v683_v1 = vsub.s32 32, %v4695_v39 }
 0x13c   : > { %v728_v12 = vshrl.u32 %v727_v10, 5  ;;  %v1342_v44 = vand.u32 2139095040, %v4709_v45  ;;  %v689_v54 = vshll.u32 %v688_v50, 23  ;;  %vm4732_vm15 = vcmp.le.f32.partialorder %v507_v36, 0.7853982 }
 0x13d   : > { %6978 = vst [vmem:[#allocation7_spill] sm:$0xff] %v4719_v7  ;;  %v730_v25 = vsub.s32 32, %v729_v8  ;;  %v1298_v49 = vshll.u32 %v4719_v7, 30  ;;  %v732_v62 = vshll.u32 %v6922_v5, %v729_v8  ;;  %v735_v63 = vshll.u32 %v6927_v9, %v729_v8 }
 0x13e   : > { %v738_v16 = vshll.u32 %v6925_v11, %v729_v8  ;;  %v741_v18 = vshll.u32 %v6914_v13, %v729_v8  ;;  %v744_v21 = vshll.u32 %v6920_v15, %v729_v8  ;;  %vm1133_vm0 = vcmp.lt.s32.totalorder %v4468_v32, 0 }
 0x13f   : > { %v733_v29 = vshrl.u32 %v6927_v9, %v730_v25  ;;  %v736_v47 = vshrl.u32 %v6925_v11, %v730_v25  ;;  %v739_v3 = vshrl.u32 %v6914_v13, %v730_v25  ;;  %v4736_v20 = vsub.s32 %v1295_v46, %v1298_v49 }
 0x140   : > { %v742_v14 = vshrl.u32 %v6920_v15, %v730_v25  ;;  %v745_v59 = vshrl.u32 %v6918_v23, %v730_v25  ;;  %v684_v36 = vshll.u32 %v4673_v28, %v4695_v39  ;;  %v763_v49 = vshll.u32 %v723_v48, 8 }
 0x141   : > { %v734_v61 = vor.u32 %v733_v29, %v732_v62  ;;  %v737_v24 = vor.u32 %v736_v47, %v735_v63  ;;  %v740_v50 = vor.u32 %v739_v3, %v738_v16  ;;  %v1301_v10 = vsub.s32 0, %v4736_v20 }
 0x142   : > { %v743_v46 = vor.u32 %v742_v14, %v741_v18  ;;  %v685_v58 = vshrl.u32 %v667_v56, %v683_v1  ;;  %v690_v41 = vor.u32 4788187, %v689_v54  ;;  %v746_v2 = vor.u32 %v745_v59, %v744_v21 }
 0x143   : > { %v1343_v13 = vshrl.u32 %v1342_v44, 23  ;;  %v3931_v8 = vmin.u32 %v1301_v10, %v4736_v20  ;;  %v731_v62 = vshrl.u32 %v6922_v5, %v730_v25  ;;  %vm747_vm1 = vcmp.lt.s32.totalorder %v728_v12, 1 }
 0x144   : > { %vm750_vm2 = vcmp.lt.s32.totalorder %v728_v12, 4  ;;  %vm4750_vm3 = vcmp.le.f32.partialorder %v1131_v38, 0.7853982  ;;  %v6981_v63 = vmov 0  ;;  %vm749_vm4 = vcmp.lt.s32.totalorder %v728_v12, 3 }
 0x145   : > { %v6982_v63 = vsel %vm4750_vm3, 4294967295, %v6981_v63  ;;  %v752_v28 = vsel %vm750_vm2, %v740_v50, 2102212464  ;;  %v755_v39 = vsel %vm747_vm1, %v734_v61, %v737_v24  ;;  %v756_v48 = vsel %vm750_vm2, %v743_v46, 920167782 }
 0x146   : > { %6983 = vst [vmem:[#allocation8_spill] sm:$0xff] %v6982_v63  ;;  %v1303_v56 = vclz %v3931_v8  ;;  %vm748_vm5 = vcmp.lt.s32.totalorder %v728_v12, 2  ;;  %v757_v1 = vsel %vm749_vm4, %v740_v50, %v756_v48  ;;  %v759_v44 = vsel %vm747_vm1, %v737_v24, %v740_v50 }
 0x147   : > { %v686_v54 = vor.u32 %v685_v58, %v684_v36  ;;  %v751_v29 = vsel %vm747_vm1, %v731_v62, %v734_v61  ;;  %v758_v25 = vsel %vm748_vm5, %v755_v39, %v757_v1  ;;  %v760_v47 = vsel %vm750_vm2, %v746_v2, 1326507024 }
 0x148   : > { %v3932_v16 = vadd.s32 4294967294, %v1303_v56  ;;  %v753_v3 = vsel %vm749_vm4, %v737_v24, %v752_v28  ;;  %v761_v18 = vsel %vm749_vm4, %v743_v46, %v760_v47  ;;  %v3934_v38 = vadd.s32 4294967169, %v1343_v13 }
 0x149   : > { %v595_v14 = vsel %vm4732_vm15, %v4466_v31, %v592_v6  ;;  %v762_v21 = vsel %vm748_vm5, %v759_v44, %v761_v18  ;;  %v4759_v59 = vmul.u32.u64.low %v763_v49, %v758_v25  ;;  %v4760_v10 = vmul.u32.u64.high %v763_v49, %v758_v25, %v4759_v59 }
 0x14a   : > { %v691_v50 = vand.u32 2147483647, %v690_v41  ;;  %vm3933_vm6 = vcmp.lt.s32.totalorder %v3932_v16, 0  ;;  %v4763_v58 = vmul.u32.u64.low %v763_v49, %v762_v21  ;;  %v4764_v61 = vmul.u32.u64.high %v763_v49, %v762_v21, %v4763_v58 }
 0x14b   : > { %v1216_v2 = vsel %vm1133_vm0, %v1215_v33, %v4702_v60  ;;  %v754_v13 = vsel %vm748_vm5, %v751_v29, %v753_v3  ;;  %v6916_v24 = vand.u32 2147483647, %v4709_v45  ;;  %v1349_v6 = vadd.s32 1, %v3934_v38 }
 0x14c   : > { %v596_v36 = vsel %vm4732_vm15, 0, %v4713_v19  ;;  %v693_v46 = vcvt.s32.f32 %v686_v54  ;;  %v4774_v8 = vsel %vm3933_vm6, 0, %v3932_v16  ;;  %v4778_v41 = vadd.f32 %v4485_v52, %v4640_v43 }
 0x14d   : > { %4186 = vcosq.f32 %v595_v14  ;;  %v4785_v60 = vsel %vm1133_vm0, %v1217_v27, %v4592_v37  ;;  %v773_v33 = vadd.s32 1, %v4760_v10  ;;  %vm1350_vm7 = vcmp.gt.s32.totalorder %v1349_v6, 0 }
 0x14e   : > { %6984 = vst [vmem:[#allocation9_spill] sm:$0xff] %v4785_v60  ;;  %v4791_v19 = vsel %vm4750_vm3, %v4468_v32, %v1216_v2  ;;  %v4793_v12 = vmul.f32 %v693_v46, %v691_v50  ;;  %v770_v52 = vmul.u32 %v763_v49, %v754_v13  ;;  %vm772_vm8 = vc.u32 %v4764_v61, %v4759_v59 }
 0x14f   : > { %v1311_v43 = vsub.s32 4294967266, %v4774_v8  ;;  %v774_v40 = vsel %vm772_vm8, %v773_v33, %v4760_v10  ;;  %v1346_v37 = vand.u32 8388607, %v6916_v24  ;;  %v1351_v27 = vsel %vm1350_vm7, %v1349_v6, 0 }
 0x150   : > { %4188 = vsinq.f32 %v595_v14  ;;  %v775_v62 = vadd.s32 %v774_v40, %v770_v52  ;;  %v822_v28 = vand.u32 2139095040, %v4778_v41  ;;  %v4802_v39 = vadd.s32 3, %v596_v36 }
 0x151   : > { %4190 = vcosq.f32 %v4791_v19  ;;  %v1353_v48 = vand.u32 31, %v1351_v27  ;;  %v695_v56 = vxor.u32 2147483648, %v4793_v12  ;;  %v1291_v1 = vadd.s32 %v4680_v30, %v4686_v4 }
 0x152   : > { %v776_v44 = vadd.s32 536870912, %v775_v62  ;;  %v6917_v54 = vand.u32 2147483647, %v4778_v41  ;;  %v1307_v29 = vsub.s32 32, %v4774_v8  ;;  %v1312_v25 = vadd.s32 127, %v1311_v43 }
 0x153   : > { %v1347_v47 = vor.u32 8388608, %v1346_v37  ;;  %v1354_v16 = vsub.s32 32, %v1353_v48  ;;  %v1356_v18 = vshll.u32 %v6922_v5, %v1353_v48  ;;  %v1359_v38 = vshll.u32 %v6927_v9, %v1353_v48 }
 0x154   : > { %v4813_v3 = vshrl.u32 %v776_v44, 30  ;;  %v823_v14 = vshrl.u32 %v822_v28, 23  ;;  %v1362_v30 = vshll.u32 %v6925_v11, %v1353_v48  ;;  %v6985_v4 = vmov 2102212464  }
 0x155   : > { %v1357_v21 = vshrl.u32 %v6927_v9, %v1354_v16  ;;  %v1360_v10 = vshrl.u32 %v6925_v11, %v1354_v16  ;;  %v1363_v50 = vshrl.u32 %v6985_v4, %v1354_v16  ;;  %v1352_v2 = vshrl.u32 %v1351_v27, 5 }
 0x156   : > { %v778_v58 = vshll.u32 %v4813_v3, 30  ;;  %v1365_v13 = vshll.u32 %v6985_v4, %v1353_v48  ;;  %v1366_v6 = vshrl.u32 %v6920_v15, %v1354_v16  ;;  %v1369_v43 = vshrl.u32 %v6918_v23, %v1354_v16 }
 0x157   : > { %v4824_v36 = vpop.eup %4186  ;;  %v1358_v46 = vor.u32 %v1357_v21, %v1356_v18  ;;  %v1361_v33 = vor.u32 %v1360_v10, %v1359_v38  ;;  %v1364_v52 = vor.u32 %v1363_v50, %v1362_v30  ;;  %vm613_vm9 = vcmp.lt.s32.totalorder %v4470_v35, 0 }
 0x158   : > { %v1313_v40 = vshll.u32 %v1312_v25, 23  ;;  %v4828_v37 = vsub.s32 %v775_v62, %v778_v58  ;;  %v1367_v28 = vor.u32 %v1366_v6, %v1365_v13  ;;  %v1368_v44 = vshll.u32 %v6920_v15, %v1353_v48 }
 0x159   : > { %v1308_v27 = vshll.u32 %v4736_v20, %v4774_v8  ;;  %v1309_v49 = vshrl.u32 %v1291_v1, %v1307_v29  ;;  %v1387_v24 = vshll.u32 %v1347_v47, 8  ;;  %v826_v18 = vand.u32 8388607, %v6917_v54 }
 0x15a   : > { %v4835_v38 = vpop.eup %4188  ;;  %v781_v21 = vsub.s32 0, %v4828_v37  ;;  %v1370_v10 = vor.u32 %v1369_v43, %v1368_v44  ;;  %vm1371_vm10 = vcmp.lt.s32.totalorder %v1352_v2, 1  ;;  %vm1374_vm11 = vcmp.lt.s32.totalorder %v1352_v2, 4 }
 0x15b   : > { %v4838_v62 = vpop.eup %4190  ;;  %v6987_v25 = vand.u32 2147483647, %v4470_v35  ;;  %v1355_v20 = vshrl.u32 %v6922_v5, %v1354_v16  ;;  %v1376_v8 = vsel %vm1374_vm11, %v1364_v52, 2102212464  ;;  %v1379_v1 = vsel %vm1371_vm10, %v1358_v46, %v1361_v33 }
 0x15c   : > { %6986 = vst [vmem:[#allocation10_spill] sm:$0xff] %v4838_v62  ;;  %v3914_v29 = vadd.s32 4294967169, %v823_v14  ;;  %v1314_v47 = vor.u32 4788187, %v1313_v40  ;;  %v3911_v30 = vmin.u32 %v781_v21, %v4828_v37  ;;  %vm1373_vm13 = vcmp.lt.s32.totalorder %v1352_v2, 3 }
 0x15d   : > { %vm4842_vm12 = vcmp.le.f32.partialorder %v6987_v25, 0.7853982  ;;  %v1380_v50 = vsel %vm1374_vm11, %v1367_v28, 920167782  ;;  %vm1372_vm14 = vcmp.lt.s32.totalorder %v1352_v2, 2  ;;  %v1375_v58 = vsel %vm1371_vm10, %v1355_v20, %v1358_v46 }
 0x15e   : > { %v1381_v13 = vsel %vm1373_vm13, %v1364_v52, %v1380_v50  ;;  %v1383_v6 = vsel %vm1371_vm10, %v1361_v33, %v1364_v52  ;;  %v783_v43 = vclz %v3911_v30  ;;  %v1377_v44 = vsel %vm1373_vm13, %v1361_v33, %v1376_v8 }
 0x15f   : > { %v1382_v25 = vsel %vm1372_vm14, %v1379_v1, %v1381_v13  ;;  %v1384_v16 = vsel %vm1374_vm11, %v1370_v10, 1326507024  ;;  %v829_v14 = vadd.s32 1, %v3914_v29  ;;  %v1310_v40 = vor.u32 %v1309_v49, %v1308_v27 }
 0x160   : > { %v1385_v54 = vsel %vm1373_vm13, %v1367_v28, %v1384_v16  ;;  %v4852_v23 = vmul.u32.u64.low %v1387_v24, %v1382_v25  ;;  %v4853_v15 = vmul.u32.u64.high %v1387_v24, %v1382_v25, %v4852_v23  ;;  %v3912_v21 = vadd.s32 4294967294, %v783_v43 }
 0x161   : > { %v1386_v5 = vsel %vm1372_vm14, %v1383_v6, %v1385_v54  ;;  %v4859_v46 = vadd.f32 %v4487_v53, %v4700_v0  ;;  %v696_v33 = vsel %vm613_vm9, %v695_v56, %v4793_v12  ;;  %vm830_vm15 = vcmp.gt.s32.totalorder %v829_v14, 0 }
 0x162   : > { %v4866_v52 = vmul.u32.u64.low %v1387_v24, %v1386_v5  ;;  %v4867_v28 = vmul.u32.u64.high %v1387_v24, %v1386_v5, %v4866_v52  ;;  %vm3913_vm0 = vcmp.lt.s32.totalorder %v3912_v21, 0  ;;  %v1378_v49 = vsel %vm1372_vm14, %v1375_v58, %v1377_v44 }
 0x163   : > { %6990 = vst [vmem:[#allocation11_spill] sm:$0xff] %v4859_v46  ;;  %v827_v27 = vor.u32 8388608, %v826_v18  ;;  %v831_v10 = vsel %vm830_vm15, %v829_v14, 0  ;;  %v1315_v54 = vand.u32 2147483647, %v1314_v47  ;;  %v786_v20 = vsel %vm3913_vm0, 0, %v3912_v21 }
 0x164   : > { %v1397_v53 = vadd.s32 1, %v4853_v15  ;;  %v833_v0 = vand.u32 31, %v831_v10  ;;  %v4874_v8 = vsel %vm4842_vm12, %v4470_v35, %v696_v33  ;;  %v1317_v12 = vcvt.s32.f32 %v1310_v40 }
 0x165   : > { %v771_v5 = vadd.s32 %v4759_v59, %v4764_v61  ;;  %v791_v56 = vsub.s32 4294967266, %v786_v20  ;;  %v787_v1 = vsub.s32 32, %v786_v20  ;;  %v1394_v2 = vmul.u32 %v1387_v24, %v1378_v49 }
 0x166   : > { %vm1396_vm1 = vc.u32 %v4867_v28, %v4852_v23  ;;  %v834_v18 = vsub.s32 32, %v833_v0  ;;  %v4881_v30 = vshll.u32 %v827_v27, 8  ;;  %v6924_v50 = vand.u32 2147483647, %v4859_v46 }
 0x167   : > { %v792_v29 = vadd.s32 127, %v791_v56  ;;  %v1398_v47 = vsel %vm1396_vm1, %v1397_v53, %v4853_v15  ;;  %v4884_v58 = vmul.f32 %v1317_v12, %v1315_v54  ;;  %v6991_v24 = vmov 683565275  }
 0x168   : > { %v1399_v13 = vadd.s32 %v1398_v47, %v1394_v2  ;;  %v837_v6 = vshrl.u32 %v6927_v9, %v834_v18  ;;  %v840_v59 = vshrl.u32 %v6925_v11, %v834_v18  ;;  %v836_v43 = vshll.u32 %v6991_v24, %v833_v0 }
 0x169   : > { %v793_v61 = vshll.u32 %v792_v29, 23  ;;  %v839_v44 = vshll.u32 %v6927_v9, %v833_v0  ;;  %v843_v25 = vshrl.u32 %v6985_v4, %v834_v18  ;;  %v789_v16 = vshrl.u32 %v771_v5, %v787_v1 }
 0x16a   : > { %v1400_v15 = vadd.s32 536870912, %v1399_v13  ;;  %v832_v14 = vshrl.u32 %v831_v10, 5  ;;  %v842_v40 = vshll.u32 %v6925_v11, %v833_v0  ;;  %v838_v21 = vor.u32 %v837_v6, %v836_v43 }
 0x16b   : > { %v841_v33 = vor.u32 %v840_v59, %v839_v44  ;;  %v845_v52 = vshll.u32 %v6985_v4, %v833_v0  ;;  %v6992_v49 = vmov 920167782   ;;  %v788_v54 = vshll.u32 %v4828_v37, %v786_v20 }
 0x16c   : > { %v846_v27 = vshrl.u32 %v6992_v49, %v834_v18  ;;  %v4895_v53 = vshrl.u32 %v1400_v15, 30  ;;  %v6994_v12 = vmov 1326507024   ;;  %v1446_v2 = vand.u32 2139095040, %v4859_v46 }
 0x16d   : > { %v849_v56 = vshrl.u32 %v6994_v12, %v834_v18  ;;  %v794_v29 = vor.u32 4788187, %v793_v61  ;;  %v844_v5 = vor.u32 %v843_v25, %v842_v40  ;;  %v848_v10 = vshll.u32 %v6992_v49, %v833_v0 }
 0x16e   : > { %6993 = vst [vmem:[#allocation12_spill] sm:$0xff] %v4895_v53  ;;  %v847_v1 = vor.u32 %v846_v27, %v845_v52  ;;  %v801_v47 = vsub.s32 4, %v4813_v3  ;;  %v1402_v6 = vshll.u32 %v4895_v53, 30  ;;  %vm851_vm2 = vcmp.lt.s32.totalorder %v832_v14, 1 }
 0x16f   : > { %v1450_v59 = vand.u32 8388607, %v6924_v50  ;;  %vm717_vm4 = vcmp.lt.s32.totalorder %v4647_v51, 0  ;;  %v790_v37 = vor.u32 %v789_v16, %v788_v54  ;;  %v850_v20 = vor.u32 %v849_v56, %v848_v10 }
 0x170   : > { %vm854_vm5 = vcmp.lt.s32.totalorder %v832_v14, 4  ;;  %v859_v43 = vsel %vm851_vm2, %v838_v21, %v841_v33  ;;  %vm1237_vm6 = vcmp.lt.s32.totalorder %v4489_v57, 0  ;;  %v4907_v61 = vsub.s32 %v1399_v13, %v1402_v6 }
 0x171   : > { %vm853_vm7 = vcmp.lt.s32.totalorder %v832_v14, 3  ;;  %v860_v0 = vsel %vm854_vm5, %v847_v1, 920167782  ;;  %v1447_v44 = vshrl.u32 %v1446_v2, 23  ;;  %v795_v25 = vand.u32 2147483647, %v794_v29 }
 0x172   : > { %vm852_vm8 = vcmp.lt.s32.totalorder %v832_v14, 2  ;;  %v856_v15 = vsel %vm854_vm5, %v844_v5, 2102212464  ;;  %v861_v40 = vsel %vm853_vm7, %v844_v5, %v860_v0  ;;  %v1405_v16 = vsub.s32 0, %v4907_v61 }
 0x173   : > { %v835_v52 = vshrl.u32 %v6991_v24, %v834_v18  ;;  %v862_v27 = vsel %vm852_vm8, %v859_v43, %v861_v40  ;;  %v863_v54 = vsel %vm851_vm2, %v841_v33, %v844_v5  ;;  %v797_v13 = vcvt.s32.f32 %v790_v37 }
 0x174   : > { %v864_v56 = vsel %vm854_vm5, %v850_v20, 1326507024  ;;  %v4918_v10 = vmul.u32.u64.low %v4881_v30, %v862_v27  ;;  %v4919_v2 = vmul.u32.u64.high %v4881_v30, %v862_v27, %v4918_v10  ;;  %v3935_v29 = vmin.u32 %v1405_v16, %v4907_v61 }
 0x175   : > { %v855_v6 = vsel %vm851_vm2, %v835_v52, %v838_v21  ;;  %v857_v0 = vsel %vm853_vm7, %v841_v33, %v856_v15  ;;  %v865_v18 = vsel %vm853_vm7, %v847_v1, %v864_v56  ;;  %v1319_v43 = vxor.u32 2147483648, %v4884_v58 }
 0x176   : > { %v4927_v40 = vmul.f32 %v797_v13, %v795_v25  ;;  %v866_v5 = vsel %vm852_vm8, %v863_v54, %v865_v18  ;;  %v3938_v37 = vadd.s32 4294967169, %v1447_v44  ;;  %4192 = vsinq.f32 %v4791_v19 }
 0x177   : > { %v1407_v20 = vclz %v3935_v29  ;;  %v4932_v27 = vmul.u32.u64.low %v4881_v30, %v866_v5  ;;  %v4933_v50 = vmul.u32.u64.high %v4881_v30, %v866_v5, %v4932_v27  ;;  %v858_v21 = vsel %vm852_vm8, %v855_v6, %v857_v0 }
 0x178   : > { %v877_v33 = vadd.s32 1, %v4919_v2  ;;  %v1451_v15 = vor.u32 8388608, %v1450_v59  ;;  %v1453_v1 = vadd.s32 1, %v3938_v37  ;;  %4194 = vcosq.f32 %v4874_v8 }
 0x179   : > { %v4941_v25 = vsel %vm717_vm4, %v801_v47, %v4813_v3  ;;  %v3936_v44 = vadd.s32 4294967294, %v1407_v20  ;;  %v4945_v19 = vadd.f32 %v4506_v17, %v4464_v26  ;;  %v4950_v14 = vsel %vm1237_vm6, %v1319_v43, %v4884_v58 }
 0x17a   : > { %v1395_v16 = vadd.s32 %v4852_v23, %v4867_v28  ;;  %vm1454_vm10 = vcmp.gt.s32.totalorder %v1453_v1, 0  ;;  %v874_v3 = vmul.u32 %v4881_v30, %v858_v21  ;;  %vm876_vm13 = vc.u32 %v4933_v50, %v4918_v10 }
 0x17b   : > { %vm3937_vm11 = vcmp.lt.s32.totalorder %v3936_v44, 0  ;;  %v1455_v47 = vsel %vm1454_vm10, %v1453_v1, 0  ;;  %v878_v52 = vsel %vm876_vm13, %v877_v33, %v4919_v2  ;;  %v4959_v13 = vshll.u32 %v1451_v15, 8 }
 0x17c   : > { %v1410_v17 = vsel %vm3937_vm11, 0, %v3936_v44  ;;  %v1457_v54 = vand.u32 31, %v1455_v47  ;;  %v879_v29 = vadd.s32 %v878_v52, %v874_v3  ;;  %v4963_v28 = vshrl.u32 %v1455_v47, 5 }
 0x17d   : > { %v1411_v58 = vsub.s32 32, %v1410_v17  ;;  %v1415_v56 = vsub.s32 4294967266, %v1410_v17  ;;  %v1412_v23 = vshll.u32 %v4907_v61, %v1410_v17  ;;  %v6996_v3 = vand.u32 2147483647, %v4489_v57 }
 0x17e   : > { %v1458_v30 = vsub.s32 32, %v1457_v54  ;;  %v1460_v0 = vshll.u32 %v6991_v24, %v1457_v54  ;;  %v880_v5 = vadd.s32 536870912, %v879_v29  ;;  %v1463_v2 = vshll.u32 %v6927_v9, %v1457_v54 }
 0x17f   : > { %v1413_v18 = vshrl.u32 %v1395_v16, %v1411_v58  ;;  %v1416_v43 = vadd.s32 127, %v1415_v56  ;;  %v1466_v27 = vshll.u32 %v6925_v11, %v1457_v54  ;;  %v1469_v1 = vshll.u32 %v6985_v4, %v1457_v54  ;;  %v4977_v16 = vpop.permute.xlu1 %377 }
 0x180   : > { %v1461_v37 = vshrl.u32 %v6927_v9, %v1458_v30  ;;  %v1464_v20 = vshrl.u32 %v6925_v11, %v1458_v30  ;;  %v1467_v21 = vshrl.u32 %v6985_v4, %v1458_v30  ;;  %v4971_v33 = vpop.eup %4192  ;;  %v4973_v15 = vshrl.u32 %v880_v5, 30 }
 0x181   : > { %6995 = vst [vmem:[#allocation13_spill] sm:$0xff] %v4971_v33  ;;  %v1417_v61 = vshll.u32 %v1416_v43, 23  ;;  %v1470_v44 = vshrl.u32 %v6992_v49, %v1458_v30  ;;  %vm4981_vm14 = vcmp.le.f32.partialorder %v6996_v3, 0.7853982  ;;  %v6997_v47 = vmov 0 }
 0x182   : > { %v6998_v47 = vsel %vm4981_vm14, 4294967295, %v6997_v47  ;;  %v1462_v17 = vor.u32 %v1461_v37, %v1460_v0  ;;  %v1465_v52 = vor.u32 %v1464_v20, %v1463_v2  ;;  %v1468_v58 = vor.u32 %v1467_v21, %v1466_v27  ;;  %v4986_v43 = vpop.eup %4194 }
 0x183   : > { %6999 = vst [vmem:[#allocation14_spill] sm:$0xff] %v6998_v47  ;;  %v926_v56 = vand.u32 2139095040, %v4945_v19  ;;  %v1414_v5 = vor.u32 %v1413_v18, %v1412_v23  ;;  %v882_v11 = vshll.u32 %v4973_v15, 30  ;;  %v1471_v9 = vor.u32 %v1470_v44, %v1469_v1 }
 0x184   : > { %v4991_v6 = vadd.f32 %v4564_v55, %v4977_v16  ;;  %v7000_v3 = vand.u32 2147483647, %v4647_v51  ;;  %v1418_v0 = vor.u32 4788187, %v1417_v61  ;;  %v1459_v2 = vshrl.u32 %v6991_v24, %v1458_v30 }
 0x185   : > { %v1472_v37 = vshll.u32 %v6992_v49, %v1457_v54  ;;  %v1473_v23 = vshrl.u32 %v6994_v12, %v1458_v30  ;;  %v5002_v18 = vsub.s32 %v879_v29, %v882_v11  ;;  %vm1475_vm0 = vcmp.lt.s32.totalorder %v4963_v28, 1 }
 0x186   : > { %vm4995_vm15 = vcmp.le.f32.partialorder %v7000_v3, 0.7853982  ;;  %vm1477_vm1 = vcmp.lt.s32.totalorder %v4963_v28, 3  ;;  %vm1478_vm2 = vcmp.lt.s32.totalorder %v4963_v28, 4  ;;  %v1483_v27 = vsel %vm1475_vm0, %v1462_v17, %v1465_v52 }
 0x187   : > { %v1474_v55 = vor.u32 %v1473_v23, %v1472_v37  ;;  %v1480_v20 = vsel %vm1478_vm2, %v1468_v58, 2102212464  ;;  %v1484_v21 = vsel %vm1478_vm2, %v1471_v9, 920167782  ;;  %v1421_v61 = vcvt.s32.f32 %v1414_v5 }
 0x188   : > { %v885_v1 = vsub.s32 0, %v5002_v18  ;;  %vm1476_vm5 = vcmp.lt.s32.totalorder %v4963_v28, 2  ;;  %v1485_v11 = vsel %vm1477_vm1, %v1468_v58, %v1484_v21  ;;  %v1419_v54 = vand.u32 2147483647, %v1418_v0 }
 0x189   : > { %v1486_v29 = vsel %vm1476_vm5, %v1483_v27, %v1485_v11  ;;  %v1487_v30 = vsel %vm1475_vm0, %v1465_v52, %v1468_v58  ;;  %v1488_v44 = vsel %vm1478_vm2, %v1474_v55, 1326507024  ;;  %v1479_v5 = vsel %vm1475_vm0, %v1459_v2, %v1462_v17 }
 0x18a   : > { %v3915_v3 = vmin.u32 %v885_v1, %v5002_v18  ;;  %v1481_v37 = vsel %vm1477_vm1, %v1465_v52, %v1480_v20  ;;  %v1489_v23 = vsel %vm1477_vm1, %v1471_v9, %v1488_v44  ;;  %v927_v58 = vshrl.u32 %v926_v56, 23 }
 0x18b   : > { %v1490_v0 = vsel %vm1476_vm5, %v1487_v30, %v1489_v23  ;;  %v5027_v27 = vmul.u32.u64.low %v4959_v13, %v1486_v29  ;;  %v5028_v21 = vmul.u32.u64.high %v4959_v13, %v1486_v29, %v5027_v27  ;;  %v1323_v17 = vsel %vm4981_vm14, %v4489_v57, %v4950_v14 }
 0x18c   : > { %vm6955_vm7 = vcmp.lt.s32.totalorder %v4709_v45, 0  ;;  %v887_v52 = vclz %v3915_v3  ;;  %v5037_v2 = vmul.u32.u64.low %v4959_v13, %v1490_v0  ;;  %v5038_v9 = vmul.u32.u64.high %v4959_v13, %v1490_v0, %v5037_v2 }
 0x18d   : > { %v7003_v55 = vxor.u32 2147483648, %v4927_v40  ;;  %v1422_v1 = vmul.f32 %v1421_v61, %v1419_v54  ;;  %v1482_v56 = vsel %vm1476_vm5, %v1479_v5, %v1481_v37  ;;  %v3918_v11 = vadd.s32 4294967169, %v927_v58 }
 0x18e   : > { %4196 = vsinq.f32 %v4874_v8  ;;  %v804_v14 = vsel %vm4995_vm15, 0, %v4941_v25  ;;  %v3916_v29 = vadd.s32 4294967294, %v887_v52  ;;  %v7004_v30 = vand.u32 2147483647, %v4945_v19 }
 0x18f   : > { %v800_v20 = vsel %vm717_vm4, %v7003_v55, %v4927_v40  ;;  %4198 = vcosq.f32 %v1323_v17  ;;  %v1501_v3 = vadd.s32 1, %v5028_v21  ;;  %v933_v23 = vadd.s32 1, %v3918_v11 }
 0x190   : > { %v930_v44 = vand.u32 8388607, %v7004_v30  ;;  %v1550_v40 = vand.u32 2139095040, %v4991_v6  ;;  %v803_v28 = vsel %vm4995_vm15, %v4647_v51, %v800_v20  ;;  %vm3917_vm4 = vcmp.lt.s32.totalorder %v3916_v29, 0 }
 0x191   : > { %v1498_v8 = vmul.u32 %v4959_v13, %v1482_v56  ;;  %vm1500_vm8 = vc.u32 %v5038_v9, %v5027_v27  ;;  %v1423_v25 = vxor.u32 2147483648, %v1422_v1  ;;  %v890_v61 = vsel %vm3917_vm4, 0, %v3916_v29 }
 0x192   : > { %v1502_v54 = vsel %vm1500_vm8, %v1501_v3, %v5028_v21  ;;  %vm934_vm10 = vcmp.gt.s32.totalorder %v933_v23, 0  ;;  %4200 = vsinq.f32 %v1323_v17  ;;  %v895_v5 = vsub.s32 4294967266, %v890_v61 }
 0x193   : > { %v1503_v37 = vadd.s32 %v1502_v54, %v1498_v8  ;;  %v931_v0 = vor.u32 8388608, %v930_v44  ;;  %4202 = vcosq.f32 %v803_v28  ;;  %v891_v58 = vsub.s32 32, %v890_v61 }
 0x194   : > { %v935_v52 = vsel %vm934_vm10, %v933_v23, 0  ;;  %v1551_v59 = vshrl.u32 %v1550_v40, 23  ;;  %4204 = vsinq.f32 %v803_v28  ;;  %v5062_v2 = vadd.s32 3, %v804_v14 }
 0x195   : > { %v896_v13 = vadd.s32 127, %v895_v5  ;;  %v1504_v55 = vadd.s32 536870912, %v1503_v37  ;;  %v5066_v20 = vsel %vm6955_vm7, %v1423_v25, %v1422_v1  ;;  %v875_v21 = vadd.s32 %v4918_v10, %v4933_v50 }
 0x196   : > { %v937_v17 = vand.u32 31, %v935_v52  ;;  %v892_v11 = vshll.u32 %v5002_v18, %v890_v61  ;;  %v5074_v44 = vshll.u32 %v931_v0, 8  ;;  %v936_v3 = vshrl.u32 %v935_v52, 5 }
 0x197   : > { %v897_v29 = vshll.u32 %v896_v13, 23  ;;  %v5072_v30 = vshrl.u32 %v1504_v55, 30  ;;  %v893_v14 = vshrl.u32 %v875_v21, %v891_v58  ;;  %v3942_v40 = vadd.s32 4294967169, %v1551_v59 }
 0x198   : > { %v938_v23 = vsub.s32 32, %v937_v17  ;;  %v5076_v28 = vpop.eup %4196  ;;  %v940_v50 = vshll.u32 %v6991_v24, %v937_v17  ;;  %v7006_v10 = vmov 2475754826   ;;  %v7007_v25 = vmov 2131351028  }
 0x199   : > { %7005 = vst [vmem:[#allocation15_spill] sm:$0xff] %v5072_v30  ;;  %v1506_v1 = vshll.u32 %v5072_v30, 30  ;;  %v943_v8 = vshll.u32 %v7006_v10, %v937_v17  ;;  %v946_v54 = vshll.u32 %v7007_v25, %v937_v17  ;;  %v5082_v18 = vpop.eup %4198  ;;  %v898_v61 = vor.u32 4788187, %v897_v29 }
 0x19a   : > { %7008 = vst [vmem:[#allocation16_spill] sm:$0xff] %v5082_v18  ;;  %v941_v5 = vshrl.u32 %v7006_v10, %v938_v23  ;;  %v944_v0 = vshrl.u32 %v7007_v25, %v938_v23  ;;  %v947_v58 = vshrl.u32 %v6985_v4, %v938_v23  ;;  %v949_v59 = vshll.u32 %v6985_v4, %v937_v17 }
 0x19b   : > { %v5087_v52 = vsub.s32 %v1503_v37, %v1506_v1  ;;  %v950_v13 = vshrl.u32 %v6992_v49, %v938_v23  ;;  %v952_v55 = vshll.u32 %v6992_v49, %v937_v17  ;;  %v953_v30 = vshrl.u32 %v6994_v12, %v938_v23 }
 0x19c   : > { %v942_v21 = vor.u32 %v941_v5, %v940_v50  ;;  %v945_v56 = vor.u32 %v944_v0, %v943_v8  ;;  %v948_v32 = vor.u32 %v947_v58, %v946_v54  ;;  %v5093_v29 = vpop.eup %4200  ;;  %v7010_v62 = vand.u32 2147483647, %v4709_v45 }
 0x19d   : > { %7009 = vst [vmem:[#allocation17_spill] sm:$0xff] %v5093_v29  ;;  %v7011_v33 = vmov 0  ;;  %v894_v37 = vor.u32 %v893_v14, %v892_v11  ;;  %v1509_v1 = vsub.s32 0, %v5087_v52  ;;  %v951_v18 = vor.u32 %v950_v13, %v949_v59  ;;  %v5102_v60 = vpop.eup %4202 }
 0x19e   : > { %vm5097_vm11 = vcmp.le.f32.partialorder %v7010_v62, 0.7853982  ;;  %v1557_v53 = vadd.s32 1, %v3942_v40  ;;  %v939_v17 = vshrl.u32 %v6991_v24, %v938_v23  ;;  %v954_v50 = vor.u32 %v953_v30, %v952_v55  ;;  %v5105_v8 = vpop.eup %4204 }
 0x19f   : > { %v7012_v33 = vsel %vm5097_vm11, 4294967295, %v7011_v33  ;;  %vm955_vm13 = vcmp.lt.s32.totalorder %v936_v3, 1  ;;  %vm958_vm15 = vcmp.lt.s32.totalorder %v936_v3, 4  ;;  %v899_v54 = vand.u32 2147483647, %v898_v61 }
 0x1a0   : > { %7013 = vst [vmem:[#allocation18_spill] sm:$0xff] %v7012_v33  ;;  %v3939_v62 = vmin.u32 %v1509_v1, %v5087_v52  ;;  %v960_v5 = vsel %vm958_vm15, %v948_v32, 2102212464  ;;  %v963_v0 = vsel %vm955_vm13, %v942_v21, %v945_v56  ;;  %vm957_vm0 = vcmp.lt.s32.totalorder %v936_v3, 3 }
 0x1a1   : > { %v964_v11 = vsel %vm958_vm15, %v951_v18, 920167782  ;;  %v967_v14 = vsel %vm955_vm13, %v945_v56, %v948_v32  ;;  %v968_v58 = vsel %vm958_vm15, %v954_v50, 1326507024  ;;  %v901_v59 = vcvt.s32.f32 %v894_v37 }
 0x1a2   : > { %v1511_v40 = vclz %v3939_v62  ;;  %vm956_vm1 = vcmp.lt.s32.totalorder %v936_v3, 2  ;;  %v965_v13 = vsel %vm957_vm0, %v948_v32, %v964_v11  ;;  %v959_v29 = vsel %vm955_vm13, %v939_v17, %v942_v21 }
 0x1a3   : > { %v961_v23 = vsel %vm957_vm0, %v945_v56, %v960_v5  ;;  %v966_v30 = vsel %vm956_vm1, %v963_v0, %v965_v13  ;;  %v969_v55 = vsel %vm957_vm0, %v951_v18, %v968_v58  ;;  %v7014_v61 = vand.u32 2147483647, %v4991_v6 }
 0x1a4   : > { %v3940_v63 = vadd.s32 4294967294, %v1511_v40  ;;  %v970_v47 = vsel %vm956_vm1, %v967_v14, %v969_v55  ;;  %vm1558_vm2 = vcmp.gt.s32.totalorder %v1557_v53, 0  ;;  %v902_v1 = vmul.f32 %v901_v59, %v899_v54 }
 0x1a5   : > { %v5110_v57 = vand.u32 8388607, %v7014_v61  ;;  %v5113_v7 = vmul.u32.u64.low %v5074_v44, %v970_v47  ;;  %v5114_v51 = vmul.u32.u64.high %v5074_v44, %v970_v47, %v5113_v7  ;;  %v1559_v37 = vsel %vm1558_vm2, %v1557_v53, 0 }
 0x1a6   : > { %vm3941_vm5 = vcmp.lt.s32.totalorder %v3940_v63, 0  ;;  %v962_v3 = vsel %vm956_vm1, %v959_v29, %v961_v23  ;;  %v5117_v32 = vmul.u32.u64.low %v5074_v44, %v966_v30  ;;  %v5118_v56 = vmul.u32.u64.high %v5074_v44, %v966_v30, %v5117_v32 }
 0x1a7   : > { %v5125_v18 = vsel %vm5097_vm11, %v4709_v45, %v5066_v20  ;;  %v1514_v21 = vsel %vm3941_vm5, 0, %v3940_v63  ;;  %v1561_v17 = vand.u32 31, %v1559_v37  ;;  %v5129_v47 = vadd.f32 %v4636_v42, %v4464_v26 }
 0x1a8   : > { %vm821_vm4 = vcmp.lt.s32.totalorder %v4778_v41, 0  ;;  %v1499_v7 = vadd.s32 %v5027_v27, %v5038_v9  ;;  %v1515_v53 = vsub.s32 32, %v1514_v21  ;;  %v1519_v29 = vsub.s32 4294967266, %v1514_v21 }
 0x1a9   : > { %v1555_v50 = vor.u32 8388608, %v5110_v57  ;;  %v903_v54 = vxor.u32 2147483648, %v902_v1  ;;  %v978_v62 = vmul.u32 %v5074_v44, %v962_v3  ;;  %vm980_vm8 = vc.u32 %v5114_v51, %v5117_v32 }
 0x1aa   : > { %v1562_v63 = vsub.s32 32, %v1561_v17  ;;  %v1516_v20 = vshll.u32 %v5087_v52, %v1514_v21  ;;  %v1517_v26 = vshrl.u32 %v1499_v7, %v1515_v53  ;;  %v1520_v42 = vadd.s32 127, %v1519_v29 }
 0x1ab   : > { %v981_v5 = vadd.s32 1, %v5118_v56  ;;  %v1564_v0 = vshll.u32 %v6991_v24, %v1561_v17  ;;  %v1567_v9 = vshll.u32 %v7006_v10, %v1561_v17  ;;  %v5146_v52 = vshrl.u32 %v1559_v37, 5 }
 0x1ac   : > { %v1565_v27 = vshrl.u32 %v7006_v10, %v1562_v63  ;;  %v1568_v57 = vshrl.u32 %v7007_v25, %v1562_v63  ;;  %v1518_v11 = vor.u32 %v1517_v26, %v1516_v20  ;;  %v1521_v44 = vshll.u32 %v1520_v42, 23 }
 0x1ad   : > { %v982_v14 = vsel %vm980_vm8, %v981_v5, %v5118_v56  ;;  %v1571_v58 = vshrl.u32 %v6985_v4, %v1562_v63  ;;  %v1570_v13 = vshll.u32 %v7007_v25, %v1561_v17  ;;  %v7015_v23 = vand.u32 2147483647, %v4778_v41 }
 0x1ae   : > { %v983_v59 = vadd.s32 %v982_v14, %v978_v62  ;;  %v1566_v40 = vor.u32 %v1565_v27, %v1564_v0  ;;  %v1522_v55 = vor.u32 4788187, %v1521_v44  ;;  %v1569_v61 = vor.u32 %v1568_v57, %v1567_v9 }
 0x1af   : > { %vm5151_vm10 = vcmp.le.f32.partialorder %v7015_v23, 0.7853982  ;;  %v1573_v3 = vshll.u32 %v6985_v4, %v1561_v17  ;;  %v1574_v56 = vshrl.u32 %v6992_v49, %v1562_v63  ;;  %v1572_v7 = vor.u32 %v1571_v58, %v1570_v13 }
 0x1b0   : > { %v984_v21 = vadd.s32 536870912, %v983_v59  ;;  %v1576_v37 = vshll.u32 %v6992_v49, %v1561_v17  ;;  %v1577_v53 = vshrl.u32 %v6994_v12, %v1562_v63  ;;  %4206 = vcosq.f32 %v5125_v18 }
 0x1b1   : > { %v1523_v29 = vand.u32 2147483647, %v1522_v55  ;;  %v1525_v62 = vcvt.s32.f32 %v1518_v11  ;;  %vm925_vm13 = vcmp.lt.s32.totalorder %v4945_v19, 0  ;;  %v1575_v20 = vor.u32 %v1574_v56, %v1573_v3 }
 0x1b2   : > { %v904_v26 = vsel %vm821_vm4, %v903_v54, %v902_v1  ;;  %vm1445_vm15 = vcmp.lt.s32.totalorder %v4859_v46, 0  ;;  %v985_v42 = vshrl.u32 %v984_v21, 30  ;;  %v1578_v5 = vor.u32 %v1577_v53, %v1576_v37 }
 0x1b3   : > { %vm1582_vm0 = vcmp.lt.s32.totalorder %v5146_v52, 4  ;;  %v1526_v0 = vmul.f32 %v1525_v62, %v1523_v29  ;;  %vm1579_vm1 = vcmp.lt.s32.totalorder %v5146_v52, 1  ;;  %vm1581_vm2 = vcmp.lt.s32.totalorder %v5146_v52, 3 }
 0x1b4   : > { %v1588_v17 = vsel %vm1582_vm0, %v1575_v20, 920167782  ;;  %v986_v27 = vshll.u32 %v985_v42, 30  ;;  %v1587_v9 = vsel %vm1579_vm1, %v1566_v40, %v1569_v61  ;;  %v1595_v1 = vshll.u32 %v1555_v50, 8 }
 0x1b5   : > { %v1589_v57 = vsel %vm1581_vm2, %v1572_v7, %v1588_v17  ;;  %v1563_v54 = vshrl.u32 %v6991_v24, %v1562_v63  ;;  %vm1580_vm5 = vcmp.lt.s32.totalorder %v5146_v52, 2  ;;  %v1591_v11 = vsel %vm1579_vm1, %v1569_v61, %v1572_v7 }
 0x1b6   : > { %v1592_v44 = vsel %vm1582_vm0, %v1578_v5, 1326507024  ;;  %v5175_v14 = vsub.s32 %v983_v59, %v986_v27  ;;  %v1009_v58 = vsub.s32 4, %v985_v42  ;;  %v1584_v13 = vsel %vm1582_vm0, %v1572_v7, 2102212464 }
 0x1b7   : > { %v1593_v23 = vsel %vm1581_vm2, %v1575_v20, %v1592_v44  ;;  %v1527_v55 = vxor.u32 2147483648, %v1526_v0  ;;  %v1590_v3 = vsel %vm1580_vm5, %v1587_v9, %v1589_v57  ;;  %v1030_v63 = vand.u32 2139095040, %v5129_v47 }
 0x1b8   : > { %v1594_v50 = vsel %vm1580_vm5, %v1591_v11, %v1593_v23  ;;  %v907_v56 = vsel %vm5151_vm10, %v4778_v41, %v904_v26  ;;  %v989_v59 = vsub.s32 0, %v5175_v14  ;;  %v1583_v21 = vsel %vm1579_vm1, %v1563_v54, %v1566_v40 }
 0x1b9   : > { %v6946_v7 = vand.u32 2147483647, %v5129_v47  ;;  %v1585_v37 = vsel %vm1581_vm2, %v1569_v61, %v1584_v13  ;;  %v5193_v53 = vmul.u32.u64.low %v1595_v1, %v1594_v50  ;;  %v5194_v29 = vmul.u32.u64.high %v1595_v1, %v1594_v50, %v5193_v53 }
 0x1ba   : > { %v1031_v62 = vshrl.u32 %v1030_v63, 23  ;;  %v3919_v20 = vmin.u32 %v989_v59, %v5175_v14  ;;  %v1010_v5 = vsel %vm925_vm13, %v1009_v58, %v985_v42  ;;  %v5203_v27 = vpop.eup %4206  ;;  %4208 = vsinq.f32 %v5125_v18 }
 0x1bb   : > { %v5199_v26 = vmul.u32.u64.low %v1595_v1, %v1590_v3  ;;  %v5200_v17 = vmul.u32.u64.high %v1595_v1, %v1590_v3, %v5199_v26  ;;  %7018 = vst [vmem:[#allocation19_spill] sm:$0xff] %v5203_v27  ;;  %v7019_v40 = vand.u32 2147483647, %v4859_v46  ;;  %v7020_v61 = vmov 0 }
 0x1bc   : > { %v1528_v9 = vsel %vm1445_vm15, %v1527_v55, %v1526_v0  ;;  %v3922_v57 = vadd.s32 4294967169, %v1031_v62  ;;  %4210 = vcosq.f32 %v907_v56  ;;  %v7023_v42 = vand.u32 2147483647, %v4945_v19 }
 0x1bd   : > { %vm5208_vm8 = vcmp.le.f32.partialorder %v7019_v40, 0.7853982  ;;  %v991_v11 = vclz %v3919_v20  ;;  %v1586_v18 = vsel %vm1580_vm5, %v1583_v21, %v1585_v37  ;;  %4212 = vsinq.f32 %v907_v56 }
 0x1be   : > { %v7021_v61 = vsel %vm5208_vm8, 4294967295, %v7020_v61  ;;  %vm5216_vm0 = vcmp.le.f32.partialorder %v7023_v42, 0.7853982  ;;  %vm1604_vm1 = vc.u32 %v5194_v29, %v5199_v26  ;;  %v1037_v0 = vadd.s32 1, %v3922_v57 }
 0x1bf   : > { %7022 = vst [vmem:[#allocation20_spill] sm:$0xff] %v7021_v61  ;;  %v1012_v44 = vsel %vm5216_vm0, 0, %v1010_v5  ;;  %v5229_v58 = vsel %vm5208_vm8, %v4859_v46, %v1528_v9  ;;  %v3920_v13 = vadd.s32 4294967294, %v991_v11  ;;  %v1605_v23 = vadd.s32 1, %v5200_v17 }
 0x1c0   : > { %v1034_v52 = vand.u32 8388607, %v6946_v7  ;;  %v979_v55 = vadd.s32 %v5117_v32, %v5114_v51  ;;  %v1602_v3 = vmul.u32 %v1595_v1, %v1586_v18  ;;  %vm1038_vm2 = vcmp.gt.s32.totalorder %v1037_v0, 0 }
 0x1c1   : > { %v5238_v50 = vadd.f32 %v4698_v22, %v4977_v16  ;;  %vm3921_vm5 = vcmp.lt.s32.totalorder %v3920_v13, 0  ;;  %v5240_v63 = vadd.s32 3, %v1012_v44  ;;  %v1606_v56 = vsel %vm1604_vm1, %v1605_v23, %v5200_v17 }
 0x1c2   : > { %v1039_v59 = vsel %vm1038_vm2, %v1037_v0, 0  ;;  %4214 = vcosq.f32 %v5229_v58  ;;  %v994_v21 = vsel %vm3921_vm5, 0, %v3920_v13  ;;  %v1607_v37 = vadd.s32 %v1606_v56, %v1602_v3 }
 0x1c3   : > { %v1041_v53 = vand.u32 31, %v1039_v59  ;;  %v995_v62 = vsub.s32 32, %v994_v21  ;;  %v999_v20 = vsub.s32 4294967266, %v994_v21  ;;  %v1035_v51 = vor.u32 8388608, %v1034_v52 }
 0x1c4   : > { %v996_v1 = vshll.u32 %v5175_v14, %v994_v21  ;;  %v1608_v22 = vadd.s32 536870912, %v1607_v37  ;;  %v1654_v5 = vand.u32 2139095040, %v5238_v50  ;;  %v5249_v42 = vpop.eup %4208  ;;  %v1040_v21 = vshrl.u32 %v1039_v59, 5 }
 0x1c5   : > { %v1042_v16 = vsub.s32 32, %v1041_v53  ;;  %v997_v40 = vshrl.u32 %v979_v55, %v995_v62  ;;  %v1000_v9 = vadd.s32 127, %v999_v20  ;;  %v1044_v17 = vshll.u32 %v6991_v24, %v1041_v53  ;;  %7026 = vst [vmem:[#allocation21_spill] sm:$0xff] %v5249_v42 }
 0x1c6   : > { %v1047_v57 = vshll.u32 %v7006_v10, %v1041_v53  ;;  %v5251_v11 = vshrl.u32 %v1608_v22, 30  ;;  %v1050_v14 = vshll.u32 %v7007_v25, %v1041_v53  ;;  %v5256_v0 = vpop.eup %4210  ;;  %v1053_v62 = vshll.u32 %v6985_v4, %v1041_v53 }
 0x1c7   : > { %v1045_v18 = vshrl.u32 %v7006_v10, %v1042_v16  ;;  %v1048_v44 = vshrl.u32 %v7007_v25, %v1042_v16  ;;  %v998_v13 = vor.u32 %v997_v40, %v996_v1  ;;  %v1001_v23 = vshll.u32 %v1000_v9, 23  ;;  %v5260_v3 = vpop.eup %4212 }
 0x1c8   : > { %v1051_v52 = vshrl.u32 %v6985_v4, %v1042_v16  ;;  %v1054_v55 = vshrl.u32 %v6992_v49, %v1042_v16  ;;  %v1610_v56 = vshll.u32 %v5251_v11, 30  ;;  %v5264_v20 = vshll.u32 %v1035_v51, 8 }
 0x1c9   : > { %v1002_v22 = vor.u32 4788187, %v1001_v23  ;;  %v1046_v7 = vor.u32 %v1045_v18, %v1044_v17  ;;  %v1049_v32 = vor.u32 %v1048_v44, %v1047_v57  ;;  %v1056_v40 = vshll.u32 %v6992_v49, %v1041_v53 }
 0x1ca   : > { %v1052_v27 = vor.u32 %v1051_v52, %v1050_v14  ;;  %v5266_v42 = vsub.s32 %v1607_v37, %v1610_v56  ;;  %v1055_v1 = vor.u32 %v1054_v55, %v1053_v62  ;;  %v1057_v9 = vshrl.u32 %v6994_v12, %v1042_v16 }
 0x1cb   : > { %v1003_v33 = vand.u32 2147483647, %v1002_v22  ;;  %v1005_v61 = vcvt.s32.f32 %v998_v13  ;;  %v1043_v45 = vshrl.u32 %v6991_v24, %v1042_v16  ;;  %v1655_v59 = vshrl.u32 %v1654_v5, 23 }
 0x1cc   : > { %v5271_v46 = vpop.eup %4214  ;;  %v1613_v51 = vsub.s32 0, %v5266_v42  ;;  %v1058_v23 = vor.u32 %v1057_v9, %v1056_v40  ;;  %vm1059_vm1 = vcmp.lt.s32.totalorder %v1040_v21, 1  ;;  %vm1060_vm2 = vcmp.lt.s32.totalorder %v1040_v21, 2 }
 0x1cd   : > { %v1006_v17 = vmul.f32 %v1005_v61, %v1003_v33  ;;  %vm1061_vm5 = vcmp.lt.s32.totalorder %v1040_v21, 3  ;;  %vm1062_vm7 = vcmp.lt.s32.totalorder %v1040_v21, 4  ;;  %v1067_v37 = vsel %vm1059_vm1, %v1046_v7, %v1049_v32 }
 0x1ce   : > { %v3943_v53 = vmin.u32 %v1613_v51, %v5266_v42  ;;  %v1064_v57 = vsel %vm1062_vm7, %v1052_v27, 2102212464  ;;  %v1068_v18 = vsel %vm1062_vm7, %v1055_v1, 920167782  ;;  %v1071_v44 = vsel %vm1059_vm1, %v1049_v32, %v1052_v27 }
 0x1cf   : > { %v1007_v14 = vxor.u32 2147483648, %v1006_v17  ;;  %v1063_v13 = vsel %vm1059_vm1, %v1043_v45, %v1046_v7  ;;  %v1069_v16 = vsel %vm1061_vm5, %v1052_v27, %v1068_v18  ;;  %v1072_v5 = vsel %vm1062_vm7, %v1058_v23, 1326507024 }
 0x1d0   : > { %v1615_v52 = vclz %v3943_v53  ;;  %v1065_v55 = vsel %vm1061_vm5, %v1049_v32, %v1064_v57  ;;  %v1070_v56 = vsel %vm1060_vm2, %v1067_v37, %v1069_v16  ;;  %v1073_v62 = vsel %vm1061_vm5, %v1055_v1, %v1072_v5 }
 0x1d1   : > { %v1008_v33 = vsel %vm925_vm13, %v1007_v14, %v1006_v17  ;;  %v1074_v61 = vsel %vm1060_vm2, %v1071_v44, %v1073_v62  ;;  %v5280_v22 = vmul.u32.u64.low %v5264_v20, %v1070_v56  ;;  %v5281_v40 = vmul.u32.u64.high %v5264_v20, %v1070_v56, %v5280_v22 }
 0x1d2   : > { %v3944_v9 = vadd.s32 4294967294, %v1615_v52  ;;  %v5285_v45 = vmul.u32.u64.low %v5264_v20, %v1074_v61  ;;  %v5286_v7 = vmul.u32.u64.high %v5264_v20, %v1074_v61, %v5285_v45  ;;  %v6956_v27 = vand.u32 2147483647, %v5238_v50 }
 0x1d3   : > { %v1011_v32 = vsel %vm5216_vm0, %v4945_v19, %v1008_v33  ;;  %v3946_v1 = vadd.s32 4294967169, %v1655_v59  ;;  %v708_v51 = vxor.u32 2147483648, %v5076_v28  ;;  %v711_v23 = vxor.u32 2147483648, %v4986_v43 }
 0x1d4   : > { %v1603_v17 = vadd.s32 %v5199_v26, %v5194_v29  ;;  %vm3945_vm7 = vcmp.lt.s32.totalorder %v3944_v9, 0  ;;  %v1066_v37 = vsel %vm1060_vm2, %v1063_v13, %v1065_v55  ;;  %v7027_v53 = vsub.s32 4, %v4666_v34 }
 0x1d5   : > { %v1618_v18 = vsel %vm3945_vm7, 0, %v3944_v9  ;;  %v1085_v54 = vadd.s32 1, %v5281_v40  ;;  %v1661_v59 = vadd.s32 1, %v3946_v1  ;;  %v905_v44 = vsub.s32 4, %v4973_v15 }
 0x1d6   : > { %v698_v57 = vsel %vm613_vm9, %v7027_v53, %v4666_v34  ;;  %4216 = vcosq.f32 %v1011_v32  ;;  %v1619_v14 = vsub.s32 32, %v1618_v18  ;;  %v1623_v16 = vsub.s32 4294967266, %v1618_v18 }
 0x1d7   : > { %v1658_v29 = vand.u32 8388607, %v6956_v27  ;;  %v1082_v26 = vmul.u32 %v5264_v20, %v1066_v37  ;;  %vm1084_vm13 = vc.u32 %v5286_v7, %v5280_v22  ;;  %vm1662_vm0 = vcmp.gt.s32.totalorder %v1661_v59, 0 }
 0x1d8   : > { %v700_v34 = vsel %vm4842_vm12, 0, %v698_v57  ;;  %v1621_v21 = vshrl.u32 %v1603_v17, %v1619_v14  ;;  %v1624_v13 = vadd.s32 127, %v1623_v16  ;;  %v1086_v5 = vsel %vm1084_vm13, %v1085_v54, %v5281_v40 }
 0x1d9   : > { %v1663_v52 = vsel %vm1662_vm0, %v1661_v59, 0  ;;  %4218 = vsinq.f32 %v1011_v32  ;;  %v1620_v55 = vshll.u32 %v5266_v42, %v1618_v18  ;;  %v1087_v56 = vadd.s32 %v1086_v5, %v1082_v26 }
 0x1da   : > { %v1665_v62 = vand.u32 31, %v1663_v52  ;;  %v1625_v33 = vshll.u32 %v1624_v13, 23  ;;  %v1659_v61 = vor.u32 8388608, %v1658_v29  ;;  %v704_v20 = vadd.s32 3, %v700_v34 }
 0x1db   : > { %v5316_v9 = vsel %vm821_vm4, %v905_v44, %v4973_v15  ;;  %v1622_v48 = vor.u32 %v1621_v21, %v1620_v55  ;;  %v1088_v45 = vadd.s32 536870912, %v1087_v56  ;;  %v1664_v1 = vshrl.u32 %v1663_v52, 5 }
 0x1dc   : > { %v1666_v17 = vsub.s32 32, %v1665_v62  ;;  %v1626_v37 = vor.u32 4788187, %v1625_v33  ;;  %v1668_v40 = vshll.u32 %v6991_v24, %v1665_v62  ;;  %v1671_v32 = vshll.u32 %v7006_v10, %v1665_v62 }
 0x1dd   : > { %v1674_v42 = vshll.u32 %v7007_v25, %v1665_v62  ;;  %v5321_v53 = vshrl.u32 %v1088_v45, 30  ;;  %v1677_v15 = vshll.u32 %v6985_v4, %v1665_v62  ;;  %v1680_v14 = vshll.u32 %v6992_v49, %v1665_v62 }
 0x1de   : > { %v1669_v57 = vshrl.u32 %v7006_v10, %v1666_v17  ;;  %v1672_v18 = vshrl.u32 %v7007_v25, %v1666_v17  ;;  %v1627_v54 = vand.u32 2147483647, %v1626_v37  ;;  %v1675_v59 = vshrl.u32 %v6985_v4, %v1666_v17 }
 0x1df   : > { %v1678_v44 = vshrl.u32 %v6992_v49, %v1666_v17  ;;  %v1090_v16 = vshll.u32 %v5321_v53, 30  ;;  %v1681_v34 = vshrl.u32 %v6994_v12, %v1666_v17  ;;  %v1629_v13 = vcvt.s32.f32 %v1622_v48 }
 0x1e0   : > { %v1670_v29 = vor.u32 %v1669_v57, %v1668_v40  ;;  %v1673_v26 = vor.u32 %v1672_v18, %v1671_v32  ;;  %v5331_v21 = vpop.eup %4216  ;;  %v1676_v5 = vor.u32 %v1675_v59, %v1674_v42  ;;  %v1699_v55 = vshll.u32 %v1659_v61, 8 }
 0x1e1   : > { %v1679_v52 = vor.u32 %v1678_v44, %v1677_v15  ;;  %v5333_v33 = vsub.s32 %v1087_v56, %v1090_v16  ;;  %v1682_v45 = vor.u32 %v1681_v34, %v1680_v14  ;;  %vm1683_vm9 = vcmp.lt.s32.totalorder %v1664_v1, 1 }
 0x1e2   : > { %v705_v37 = vand.u32 3, %v704_v20  ;;  %v5335_v27 = vmul.f32 %v1629_v13, %v1627_v54  ;;  %v1667_v62 = vshrl.u32 %v6991_v24, %v1666_v17  ;;  %vm1686_vm12 = vcmp.lt.s32.totalorder %v1664_v1, 4 }
 0x1e3   : > { %v1691_v40 = vsel %vm1683_vm9, %v1670_v29, %v1673_v26  ;;  %v5339_v32 = vpop.eup %4218  ;;  %v1093_v57 = vsub.s32 0, %v5333_v33  ;;  %vm1685_vm4 = vcmp.lt.s32.totalorder %v1664_v1, 3  ;;  %v1688_v48 = vsel %vm1686_vm12, %v1676_v5, 2102212464 }
 0x1e4   : > { %v1692_v42 = vsel %vm1686_vm12, %v1679_v52, 920167782  ;;  %vm703_vm1 = vweird.f32 %v4470_v35  ;;  %vm1684_vm2 = vcmp.lt.s32.totalorder %v1664_v1, 2  ;;  %v1695_v61 = vsel %vm1683_vm9, %v1673_v26, %v1676_v5 }
 0x1e5   : > { %v1693_v56 = vsel %vm1685_vm4, %v1676_v5, %v1692_v42  ;;  %v1696_v20 = vsel %vm1686_vm12, %v1682_v45, 1326507024  ;;  %v3923_v18 = vmin.u32 %v1093_v57, %v5333_v33  ;;  %v1687_v17 = vsel %vm1683_vm9, %v1667_v62, %v1670_v29 }
 0x1e6   : > { %v1689_v15 = vsel %vm1685_vm4, %v1673_v26, %v1688_v48  ;;  %v1694_v54 = vsel %vm1684_vm2, %v1691_v40, %v1693_v56  ;;  %v1697_v59 = vsel %vm1685_vm4, %v1679_v52, %v1696_v20  ;;  %v908_v16 = vsel %vm5151_vm10, 0, %v5316_v9 }
 0x1e7   : > { %v5346_v44 = vmul.u32.u64.low %v1699_v55, %v1694_v54  ;;  %v5347_v14 = vmul.u32.u64.high %v1699_v55, %v1694_v54, %v5346_v44  ;;  %v1631_v34 = vxor.u32 2147483648, %v5335_v27  ;;  %v1083_v13 = vadd.s32 %v5280_v22, %v5286_v7 }
 0x1e8   : > { %v1095_v5 = vclz %v3923_v18  ;;  %v1698_v45 = vsel %vm1684_vm2, %v1695_v61, %v1697_v59  ;;  %v1690_v1 = vsel %vm1684_vm2, %v1687_v17, %v1689_v15  ;;  %vm707_vm5 = vcmp.eq.s32.totalorder %v705_v37, 0 }
 0x1e9   : > { %v5356_v29 = vmul.u32.u64.low %v1699_v55, %v1698_v45  ;;  %v5357_v26 = vmul.u32.u64.high %v1699_v55, %v1698_v45, %v5356_v29  ;;  %vm911_vm7 = vweird.f32 %v4778_v41  ;;  %vm1549_vm13 = vcmp.lt.s32.totalorder %v4991_v6, 0 }
 0x1ea   : > { %v3924_v52 = vadd.s32 4294967294, %v1095_v5  ;;  %v709_v30 = vsel %vm707_vm5, %v4986_v43, %v708_v51  ;;  %vm710_vm10 = vcmp.eq.s32.totalorder %v705_v37, 2  ;;  %v912_v9 = vadd.s32 3, %v908_v16 }
 0x1eb   : > { %v1709_v22 = vadd.s32 1, %v5347_v14  ;;  %vm706_vm0 = vcmp.lt.s32.totalorder %v705_v37, 2  ;;  %v712_v7 = vsel %vm710_vm10, %v711_v23, %v5076_v28  ;;  %v916_v62 = vxor.u32 2147483648, %v5260_v3 }
 0x1ec   : > { %vm3925_vm9 = vcmp.lt.s32.totalorder %v3924_v52, 0  ;;  %v713_v40 = vsel %vm706_vm0, %v709_v30, %v712_v7  ;;  %v913_v57 = vand.u32 3, %v912_v9  ;;  %v919_v48 = vxor.u32 2147483648, %v5256_v0 }
 0x1ed   : > { %v1098_v42 = vsel %vm3925_vm9, 0, %v3924_v52  ;;  %v1706_v56 = vmul.u32 %v1699_v55, %v1690_v1  ;;  %vm1708_vm12 = vc.u32 %v5357_v26, %v5346_v44  ;;  %v714_v51 = vsel %vm703_vm1, nan, %v713_v40 }
 0x1ee   : > { %v1099_v37 = vsub.s32 32, %v1098_v42  ;;  %v1100_v61 = vshll.u32 %v5333_v33, %v1098_v42  ;;  %v1103_v43 = vsub.s32 4294967266, %v1098_v42  ;;  %v1710_v28 = vsel %vm1708_vm12, %v1709_v22, %v5347_v14  ;;  %v7041_v14 = vld [vmem:[#allocation12_spill] sm:$0xff] }
 0x1ef   : > { %v1711_v23 = vadd.s32 %v1710_v28, %v1706_v56  ;;  %vm914_vm4 = vcmp.lt.s32.totalorder %v913_v57, 2  ;;  %vm915_vm2 = vcmp.eq.s32.totalorder %v913_v57, 0  ;;  %vm918_vm5 = vcmp.eq.s32.totalorder %v913_v57, 2  ;;  %v7034_v57 = vld [vmem:[#allocation5_spill] sm:$0xff] }
 0x1f0   : > { %v1101_v20 = vshrl.u32 %v1083_v13, %v1099_v37  ;;  %v1104_v18 = vadd.s32 127, %v1103_v43  ;;  %v917_v55 = vsel %vm915_vm2, %v5256_v0, %v916_v62  ;;  %v920_v17 = vsel %vm918_vm5, %v919_v48, %v5260_v3 }
 0x1f1   : > { %vm1029_vm10 = vcmp.lt.s32.totalorder %v5129_v47, 0  ;;  %v1712_v35 = vadd.s32 536870912, %v1711_v23  ;;  %v921_v15 = vsel %vm914_vm4, %v917_v55, %v920_v17  ;;  %v601_v54 = vand.u32 3, %v4802_v39  ;;  %v7036_v55 = vld [vmem:[#allocation4_spill] sm:$0xff] }
 0x1f2   : > { %v604_v33 = vxor.u32 2147483648, %v4835_v38  ;;  %v7028_v59 = vand.u32 2147483647, %v5129_v47  ;;  %v1102_v16 = vor.u32 %v1101_v20, %v1100_v61  ;;  %v1105_v13 = vshll.u32 %v1104_v18, 23 }
 0x1f3   : > { %v922_v0 = vsel %vm911_vm7, nan, %v921_v15  ;;  %v607_v3 = vxor.u32 2147483648, %v4824_v36  ;;  %v1632_v5 = vsel %vm1549_vm13, %v1631_v34, %v5335_v27  ;;  %v5393_v39 = vshrl.u32 %v1712_v35, 30 }
 0x1f4   : > { %vm5383_vm1 = vcmp.le.f32.partialorder %v7028_v59, 0.7853982  ;;  %v4025_v45 = vpack.c.bf16 %v922_v0, %v714_v51  ;;  %vm603_vm0 = vcmp.eq.s32.totalorder %v601_v54, 0  ;;  %v1106_v1 = vor.u32 4788187, %v1105_v13  ;;  %v7035_v51 = vld [vmem:[#allocation7_spill] sm:$0xff] }
 0x1f5   : > { %vm599_vm9 = vweird.f32 %v4466_v31  ;;  %v605_v29 = vsel %vm603_vm0, %v4824_v36, %v604_v33  ;;  %vm606_vm12 = vcmp.eq.s32.totalorder %v601_v54, 2  ;;  %v7031_v52 = vand.u32 2147483647, %v4991_v6  ;;  %v7039_v0 = vld [vmem:[#allocation9_spill] sm:$0xff] }
 0x1f6   : > { %v1714_v30 = vshll.u32 %v5393_v39, 30  ;;  %4026 = vmatprep.subr.bf16.mxu1 %v4025_v45  ;;  %vm602_vm7 = vcmp.lt.s32.totalorder %v601_v54, 2  ;;  %v608_v27 = vsel %vm606_vm12, %v607_v3, %v4835_v38  ;;  %v809_v34 = vand.u32 3, %v5062_v2 }
 0x1f7   : > { %vm5399_vm4 = vcmp.le.f32.partialorder %v7031_v52, 0.7853982  ;;  %v1107_v9 = vand.u32 2147483647, %v1106_v1  ;;  %v1109_v22 = vcvt.s32.f32 %v1102_v16  ;;  %v812_v7 = vxor.u32 2147483648, %v5105_v8 }
 0x1f8   : > { %v815_v36 = vxor.u32 2147483648, %v5102_v60  ;;  %v5408_v62 = vsub.s32 %v1711_v23, %v1714_v30  ;;  %v609_v40 = vsel %vm602_vm7, %v605_v29, %v608_v27  ;;  %vm807_vm2 = vweird.f32 %v7034_v57 }
 0x1f9   : > { %vm811_vm5 = vcmp.eq.s32.totalorder %v809_v34, 0  ;;  %v1110_v48 = vmul.f32 %v1109_v22, %v1107_v9  ;;  %vm814_vm0 = vcmp.eq.s32.totalorder %v809_v34, 2  ;;  %v1113_v38 = vsub.s32 4, %v5321_v53  ;;  %v7043_v22 = vld [vmem:[#allocation16_spill] sm:$0xff] }
 0x1fa   : > { %v813_v42 = vsel %vm811_vm5, %v5102_v60, %v812_v7  ;;  %v1717_v2 = vsub.s32 0, %v5408_v62  ;;  %vm810_vm12 = vcmp.lt.s32.totalorder %v809_v34, 2  ;;  %v816_v56 = vsel %vm814_vm0, %v815_v36, %v5105_v8  ;;  %v7042_v34 = vld [vmem:[#allocation17_spill] sm:$0xff] }
 0x1fb   : > { %v1321_v37 = vsub.s32 4, %v7035_v51  ;;  %v1111_v61 = vxor.u32 2147483648, %v1110_v48  ;;  %v610_v43 = vsel %vm599_vm9, nan, %v609_v40  ;;  %v817_v28 = vsel %vm810_vm12, %v813_v42, %v816_v56 }
 0x1fc   : > { %v1114_v23 = vsel %vm1029_vm10, %v1113_v38, %v5321_v53  ;;  %v3947_v60 = vmin.u32 %v1717_v2, %v5408_v62  ;;  %v818_v20 = vsel %vm807_vm2, nan, %v817_v28  ;;  %v1633_v53 = vsub.s32 4, %v5251_v11 }
 0x1fd   : > { %v1116_v18 = vsel %vm5383_vm1, 0, %v1114_v23  ;;  %v1322_v8 = vsel %vm1237_vm6, %v1321_v37, %v7035_v51  ;;  %v1112_v17 = vsel %vm1029_vm10, %v1111_v61, %v1110_v48  ;;  %v4027_v31 = vpack.c.bf16 %v818_v20, %v610_v43  ;;  %v7044_v51 = vld [vmem:[#allocation13_spill] sm:$0xff]  ;;  %v7045_v61 = vld [vmem:[#allocation10_spill] sm:$0xff] }
 0x1fe   : > { %v1120_v35 = vadd.s32 3, %v1116_v18  ;;  %v1324_v54 = vsel %vm4981_vm14, 0, %v1322_v8  ;;  %v1115_v33 = vsel %vm5383_vm1, %v5129_v47, %v1112_v17  ;;  %v1719_v59 = vclz %v3947_v60 }
 0x1ff   : > { %v1328_v16 = vadd.s32 3, %v1324_v54  ;;  %v7040_v3 = vsel %vm4750_vm3, 0, %v7039_v0  ;;  %v1635_v1 = vsel %vm5399_vm4, %v4991_v6, %v1632_v5  ;;  %4220 = vcosq.f32 %v1115_v33  ;;  %4028 = vmatpush1.bf16.msra.mxu1 %v4027_v31 }
 0x200   : > { %v1224_v45 = vadd.s32 3, %v7040_v3  ;;  %4222 = vsinq.f32 %v1115_v33  ;;  %v3948_v29 = vadd.s32 4294967294, %v1719_v59  ;;  %v5442_v52 = vand.u32 3, %v1120_v35 }
 0x201   : > { %v1329_v30 = vand.u32 3, %v1328_v16  ;;  %v1425_v27 = vsub.s32 4, %v7041_v14  ;;  %4224 = vsinq.f32 %v5229_v58  ;;  %v1332_v9 = vxor.u32 2147483648, %v7042_v34 }
 0x202   : > { %v1335_v7 = vxor.u32 2147483648, %v7043_v22  ;;  %v5451_v36 = vsel %vm1549_vm13, %v1633_v53, %v5251_v11  ;;  %4226 = vcosq.f32 %v1635_v1  ;;  %vm3949_vm3 = vcmp.lt.s32.totalorder %v3948_v29, 0 }
 0x203   : > { %v1017_v5 = vand.u32 3, %v5240_v63  ;;  %4228 = vsinq.f32 %v1635_v1  ;;  %v1707_v40 = vadd.s32 %v5346_v44, %v5357_v26  ;;  %v1722_v57 = vsel %vm3949_vm3, 0, %v3948_v29 }
 0x204   : > { %v1020_v58 = vxor.u32 2147483648, %v5339_v32  ;;  %v1723_v48 = vsub.s32 32, %v1722_v57  ;;  %v1727_v42 = vsub.s32 4294967266, %v1722_v57  ;;  %vm1123_vm6 = vcmp.eq.s32.totalorder %v5442_v52, 0 }
 0x205   : > { %vm1331_vm14 = vcmp.eq.s32.totalorder %v1329_v30, 0  ;;  %vm1334_vm10 = vcmp.eq.s32.totalorder %v1329_v30, 2  ;;  %vm1327_vm13 = vweird.f32 %v7036_v55  ;;  %vm1330_vm1 = vcmp.lt.s32.totalorder %v1329_v30, 2 }
 0x206   : > { %v1333_v11 = vsel %vm1331_vm14, %v7043_v22, %v1332_v9  ;;  %v1336_v63 = vsel %vm1334_vm10, %v1335_v7, %v7042_v34  ;;  %v1023_v38 = vxor.u32 2147483648, %v5331_v21  ;;  %v1724_v44 = vshll.u32 %v5408_v62, %v1722_v57  ;;  %v7047_v7 = vld [vmem:[#allocation3_spill] sm:$0xff] }
 0x207   : > { %v1725_v26 = vshrl.u32 %v1707_v40, %v1723_v48  ;;  %v1728_v2 = vadd.s32 127, %v1727_v42  ;;  %vm1119_vm9 = vweird.f32 %v5129_v47  ;;  %vm1019_vm7 = vcmp.eq.s32.totalorder %v1017_v5, 0 }
 0x208   : > { %vm1022_vm2 = vcmp.eq.s32.totalorder %v1017_v5, 2  ;;  %v1225_v56 = vand.u32 3, %v1224_v45  ;;  %v1228_v37 = vxor.u32 2147483648, %v7044_v51  ;;  %v1231_v43 = vxor.u32 2147483648, %v7045_v61 }
 0x209   : > { %v1726_v28 = vor.u32 %v1725_v26, %v1724_v44  ;;  %v1729_v23 = vshll.u32 %v1728_v2, 23  ;;  %v1021_v60 = vsel %vm1019_vm7, %v5331_v21, %v1020_v58  ;;  %v1024_v20 = vsel %vm1022_vm2, %v1023_v38, %v5339_v32  ;;  %v4221_v18 = vpop.eup %4220  ;;  %v7046_v32 = vld [vmem:[#allocation15_spill] sm:$0xff] }
 0x20a   : > { %vm1126_vm5 = vcmp.eq.s32.totalorder %v5442_v52, 2  ;;  %v1337_v62 = vsel %vm1330_vm1, %v1333_v11, %v1336_v63  ;;  %vm1018_vm0 = vcmp.lt.s32.totalorder %v1017_v5, 2  ;;  %vm1227_vm12 = vcmp.eq.s32.totalorder %v1225_v56, 0  ;;  %v4223_v8 = vpop.eup %4222  ;;  %v7048_v5 = vld [vmem:[#allocation11_spill] sm:$0xff] }
 0x20b   : > { %v1730_v17 = vor.u32 4788187, %v1729_v23  ;;  %v1127_v31 = vxor.u32 2147483648, %v4221_v18  ;;  %v1229_v35 = vsel %vm1227_vm12, %v7045_v61, %v1228_v37  ;;  %vm1230_vm3 = vcmp.eq.s32.totalorder %v1225_v56, 2  ;;  %v5471_v15 = vpop.eup %4224 }
 0x20c   : > { %v1124_v54 = vxor.u32 2147483648, %v4223_v8  ;;  %v1025_v53 = vsel %vm1018_vm0, %v1021_v60, %v1024_v20  ;;  %v1232_v21 = vsel %vm1230_vm3, %v1231_v43, %v7044_v51  ;;  %v1529_v33 = vsub.s32 4, %v7046_v32  ;;  %v4227_v59 = vpop.eup %4226 }
 0x20d   : > { %v1731_v16 = vand.u32 2147483647, %v1730_v17  ;;  %v1733_v13 = vcvt.s32.f32 %v1726_v28  ;;  %v1128_v0 = vsel %vm1126_vm5, %v1127_v31, %v4223_v8  ;;  %vm1226_vm14 = vcmp.lt.s32.totalorder %v1225_v56, 2  ;;  %v4229_v3 = vpop.eup %4228  ;;  %v7055_v8 = vld [vmem:[#allocation19_spill] sm:$0xff] }
 0x20e   : > { %vm1122_vm10 = vcmp.lt.s32.totalorder %v5442_v52, 2  ;;  %v1125_v45 = vsel %vm1123_vm6, %v4221_v18, %v1124_v54  ;;  %vm1015_vm1 = vweird.f32 %v4945_v19  ;;  %v1233_v1 = vsel %vm1226_vm14, %v1229_v35, %v1232_v21  ;;  %v7049_v19 = vld [vmem:[#allocation6_spill] sm:$0xff]  ;;  %v7054_v18 = vld [vmem:[#allocation21_spill] sm:$0xff] }
 0x20f   : > { %v1734_v29 = vmul.f32 %v1733_v13, %v1731_v16  ;;  %v1129_v30 = vsel %vm1122_vm10, %v1125_v45, %v1128_v0  ;;  %v1338_v34 = vsel %vm1327_vm13, nan, %v1337_v62  ;;  %v1026_v9 = vsel %vm1015_vm1, nan, %v1025_v53 }
 0x210   : > { %v1130_v22 = vsel %vm1119_vm9, nan, %v1129_v30  ;;  %vm1223_vm7 = vweird.f32 %v7047_v7  ;;  %v1530_v40 = vsel %vm1445_vm15, %v1529_v33, %v7046_v32  ;;  %v1737_v52 = vsub.s32 4, %v5393_v39 }
 0x211   : > { %vm7050_vm6 = vcmp.lt.s32.totalorder %v7049_v19, 0  ;;  %v1735_v55 = vxor.u32 2147483648, %v1734_v29  ;;  %v4029_v58 = vpack.c.bf16 %v1338_v34, %v1130_v22  ;;  %v1234_v48 = vsel %vm1223_vm7, nan, %v1233_v1 }
 0x212   : > { %v1426_v57 = vsel %vm7050_vm6, %v1425_v27, %v7041_v14  ;;  %v1636_v47 = vsel %vm5399_vm4, 0, %v5451_v36  ;;  %vm1653_vm13 = vcmp.lt.s32.totalorder %v5238_v50, 0  ;;  %v4031_v42 = vpack.c.bf16 %v1234_v48, %v1026_v9 }
 0x213   : > { %v7051_v11 = vand.u32 2147483647, %v5238_v50  ;;  %v1736_v63 = vsel %vm1653_vm13, %v1735_v55, %v1734_v29  ;;  %4030 = vmatprep.subr.bf16.mxu1 %v4029_v58  ;;  %v1532_v44 = vsel %vm5208_vm8, 0, %v1530_v40  ;;  %v1738_v14 = vsel %vm1653_vm13, %v1737_v52, %v5393_v39  ;;  %v1755_v52 = vld [vmem:[%s6902_s3] sm:$0xff] }
 0x214   : > { %v1428_v26 = vsel %vm5097_vm11, 0, %v1426_v57  ;;  %4032 = vmatpush1.bf16.msra.mxu1 %v4031_v42  ;;  %v1640_v41 = vadd.s32 3, %v1636_v47  ;;  %v1536_v36 = vadd.s32 3, %v1532_v44  ;;  %v1644_v28 = vxor.u32 2147483648, %v4229_v3  ;;  %v1766_v57 = vpop.permute.xlu0 %1765 }
 0x215   : > { %vm1652_vm15 = vcmp.le.f32.partialorder %v7051_v11, 0.7853982  ;;  %v1432_v51 = vadd.s32 3, %v1428_v26  ;;  %v1647_v23 = vxor.u32 2147483648, %v4227_v59  ;;  %v1540_v60 = vxor.u32 2147483648, %v5471_v15  ;;  %v1771_v11 = vpop.permute.xlu1 %1770 }
 0x216   : > { %v1739_v2 = vsel %vm1652_vm15, %v5238_v50, %v1736_v63  ;;  %v1740_v56 = vsel %vm1652_vm15, 0, %v1738_v14  ;;  %v1641_v61 = vand.u32 3, %v1640_v41  ;;  %v1537_v43 = vand.u32 3, %v1536_v36 }
 0x217   : > { %4230 = vcosq.f32 %v1739_v2  ;;  %v1744_v37 = vadd.s32 3, %v1740_v56  ;;  %v1543_v39 = vxor.u32 2147483648, %v5271_v46  ;;  %v1433_v20 = vand.u32 3, %v1432_v51 }
 0x218   : > { %4232 = vsinq.f32 %v1739_v2  ;;  %v1436_v62 = vxor.u32 2147483648, %v7054_v18  ;;  %v1439_v17 = vxor.u32 2147483648, %v7055_v8  ;;  %vm1643_vm11 = vcmp.eq.s32.totalorder %v1641_v61, 0 }
 0x219   : > { %v1745_v31 = vand.u32 3, %v1744_v37  ;;  %vm1646_vm8 = vcmp.eq.s32.totalorder %v1641_v61, 2  ;;  %vm1539_vm4 = vcmp.eq.s32.totalorder %v1537_v43, 0  ;;  %vm1542_vm9 = vcmp.eq.s32.totalorder %v1537_v43, 2 }
 0x21a   : > { %v1645_v35 = vsel %vm1643_vm11, %v4227_v59, %v1644_v28  ;;  %v1648_v54 = vsel %vm1646_vm8, %v1647_v23, %v4229_v3  ;;  %v1541_v21 = vsel %vm1539_vm4, %v5271_v46, %v1540_v60  ;;  %v1544_v32 = vsel %vm1542_vm9, %v1543_v39, %v5471_v15 }
 0x21b   : > { %vm1435_vm2 = vcmp.eq.s32.totalorder %v1433_v20, 0  ;;  %vm1438_vm5 = vcmp.eq.s32.totalorder %v1433_v20, 2  ;;  %vm1642_vm0 = vcmp.lt.s32.totalorder %v1641_v61, 2  ;;  %vm1538_vm12 = vcmp.lt.s32.totalorder %v1537_v43, 2 }
 0x21c   : > { %v1437_v13 = vsel %vm1435_vm2, %v7055_v8, %v1436_v62  ;;  %v1440_v0 = vsel %vm1438_vm5, %v1439_v17, %v7054_v18  ;;  %vm1750_vm3 = vcmp.eq.s32.totalorder %v1745_v31, 2  ;;  %v1649_v1 = vsel %vm1642_vm0, %v1645_v35, %v1648_v54 }
 0x21d   : > { %v1545_v59 = vsel %vm1538_vm12, %v1541_v21, %v1544_v32  ;;  %vm1747_vm14 = vcmp.eq.s32.totalorder %v1745_v31, 0  ;;  %vm1434_vm10 = vcmp.lt.s32.totalorder %v1433_v20, 2  ;;  %vm1746_vm1 = vcmp.lt.s32.totalorder %v1745_v31, 2 }
 0x21e   : > { %v1441_v15 = vsel %vm1434_vm10, %v1437_v13, %v1440_v0  ;;  %vm1639_vm7 = vweird.f32 %v4991_v6  ;;  %vm1535_vm6 = vweird.f32 %v7048_v5  ;;  %vm1743_vm13 = vweird.f32 %v5238_v50  ;;  %v1756_v50 = vld [vmem:[%s6902_s3 + $0x8] sm:$0xff]  ;;  %v1757_v5 = vld [vmem:[%s6902_s3 + $0x10] sm:$0xff] }
 0x21f   : > { %v1650_v30 = vsel %vm1639_vm7, nan, %v1649_v1  ;;  %v1546_v34 = vsel %vm1535_vm6, nan, %v1545_v59  ;;  %vm1431_vm15 = vweird.f32 %v7049_v19  ;;  %vm1783_vm11 = vcmask 392192   ;;  %v1758_v19 = vld [vmem:[%s6902_s3 + $0x18] sm:$0xff] }
 0x220   : > { %v1442_v7 = vsel %vm1431_vm15, nan, %v1441_v15  ;;  %v7056_v6 = vmov 0.0  }
 0x221   : > { %v4231_v53 = vpop.eup %4230  ;;  %v4035_v40 = vpack.c.bf16 %v1650_v30, %v1442_v7 }
 0x222   : > { %v4233_v33 = vpop.eup %4232  ;;  %v1751_v16 = vxor.u32 2147483648, %v4231_v53 }
 0x223   : > { %v1748_v45 = vxor.u32 2147483648, %v4233_v33 }
 0x224   : > { %v1752_v3 = vsel %vm1750_vm3, %v1751_v16, %v4233_v33 }
 0x225   : > { %v1749_v46 = vsel %vm1747_vm14, %v4231_v53, %v1748_v45 }
 0x226   : > { %v1753_v29 = vsel %vm1746_vm1, %v1749_v46, %v1752_v3 }
 0x227   : > { %v1754_v9 = vsel %vm1743_vm13, nan, %v1753_v29 }
 0x228   : > { %v4033_v22 = vpack.c.bf16 %v1754_v9, %v1546_v34 }
 0x22a   : > { %4034 = vmatprep.subr.bf16.mxu1 %v4033_v22 }
 0x22b   : > { %4036 = vmatpush1.bf16.msra.mxu1 %v4035_v40 }
 0x22e   : > { %3950 = vmatmul.mubr.msk.f32.vlgmr.msra.gmra.mrb[6].mxu1 %vm1783_vm11, %v1755_v52 }
 0x22f   : > { %1866 = vmatprep.mubr.f32.mxu1 %v7056_v6 }
 0x232   : > { %3951 = vmatmul.mubr.msk.f32.gmra.mrb[8].mxu1 %vm1783_vm11, %v1756_v50 }
 0x233   : > { %1872 = vmatprep.mubr.f32.mxu1 %v7056_v6 }
 0x236   : > { %3952 = vmatmul.mubr.msk.f32.gmra.mrb[10].mxu1 %vm1783_vm11, %v1757_v5 }
 0x237   : > { %1878 = vmatprep.mubr.f32.mxu1 %v7056_v6 }
 0x23a   : > { %3953 = vmatmul.mubr.msk.f32.gmra.mrb[12].mxu1 %vm1783_vm11, %v1758_v19 }
 0x23b   : > { %3773 = vmatprep.mubr.f32.mxu1 %v7056_v6 }
 0x301   : > { %v1862_v55 = vpop.f32.mrb[6].mxu1 }
 0x302   : > { %v1863_v58 = vadd.f32 %v1862_v55, %v1766_v57  ;;  %v1864_v48 = vpop.f32.mrb[7].mxu1 }
 0x303   : > { %v1865_v47 = vadd.f32 %v1864_v48, %v1766_v57 }
 0x304   : > { %v5535_v42 = vmul.f32 30.0, %v1863_v58 }
 0x305   : > { %v5537_v63 = vmul.f32 30.0, %v1865_v47  ;;  %v1868_v38 = vpop.f32.mrb[8].mxu1 }
 0x306   : > { %v1893_v44 = vand.u32 2147483647, %v5535_v42  ;;  %v1896_v14 = vand.u32 2139095040, %v5535_v42  ;;  %v1869_v27 = vadd.f32 %v1868_v38, %v1771_v11  ;;  %v1870_v26 = vpop.f32.mrb[9].mxu1 }
 0x307   : > { %v1997_v2 = vand.u32 2147483647, %v5537_v63  ;;  %v2000_v41 = vand.u32 2139095040, %v5537_v63  ;;  %v1871_v62 = vadd.f32 %v1870_v26, %v1771_v11 }
 0x308   : > { %v1897_v36 = vshrl.u32 %v1896_v14, 23  ;;  %v1900_v56 = vand.u32 8388607, %v1893_v44  ;;  %v5545_v51 = vmul.f32 30.0, %v1869_v27 }
 0x309   : > { %v2001_v37 = vshrl.u32 %v2000_v41, 23  ;;  %v2004_v61 = vand.u32 8388607, %v1997_v2  ;;  %v5549_v28 = vpop.f32.mrb[10].mxu1  ;;  %v5559_v0 = vmul.f32 30.0, %v1871_v62 }
 0x30a   : > { %v3954_v43 = vadd.s32 4294967169, %v1897_v36  ;;  %v2104_v60 = vand.u32 2139095040, %v5545_v51  ;;  %v5552_v39 = vpop.f32.mrb[11].mxu1  ;;  %v1901_v20 = vor.u32 8388608, %v1900_v56  ;;  %v2101_v31 = vand.u32 2147483647, %v5545_v51 }
 0x30b   : > { %v3958_v23 = vadd.s32 4294967169, %v2001_v37  ;;  %v2005_v8 = vor.u32 8388608, %v2004_v61 }
 0x30c   : > { %v1903_v18 = vadd.s32 1, %v3954_v43  ;;  %v2105_v35 = vshrl.u32 %v2104_v60, 23  ;;  %v5561_v45 = vshll.u32 %v1901_v20, 8  ;;  %v5569_v3 = vand.u32 8388607, %v2101_v31 }
 0x30d   : > { %v2007_v17 = vadd.s32 1, %v3958_v23  ;;  %v5555_v54 = vpop.f32.mrb[12].mxu1  ;;  %v5565_v59 = vshll.u32 %v2005_v8, 8 }
 0x30e   : > { %vm1904_vm8 = vcmp.gt.s32.totalorder %v1903_v18, 0  ;;  %v5557_v53 = vpop.f32.mrb[13].mxu1  ;;  %v3962_v32 = vadd.s32 4294967169, %v2105_v35 }
 0x30f   : > { %v1905_v21 = vsel %vm1904_vm8, %v1903_v18, 0  ;;  %vm2008_vm4 = vcmp.gt.s32.totalorder %v2007_v17, 0 }
 0x310   : > { %v1906_v33 = vshrl.u32 %v1905_v21, 5  ;;  %v1907_v16 = vand.u32 31, %v1905_v21  ;;  %v2009_v13 = vsel %vm2008_vm4, %v2007_v17, 0  ;;  %v5572_v30 = vadd.s32 1, %v3962_v32 }
 0x311   : > { %v5563_v1 = vshrl.u32 %v2009_v13, 5  ;;  %v2011_v29 = vand.u32 31, %v2009_v13 }
 0x312   : > { %v1908_v46 = vsub.s32 32, %v1907_v16  ;;  %v1910_v15 = vshll.u32 %v6991_v24, %v1907_v16  ;;  %v1913_v34 = vshll.u32 %v7006_v10, %v1907_v16  ;;  %v1916_v9 = vshll.u32 %v7007_v25, %v1907_v16 }
 0x313   : > { %v1919_v22 = vshll.u32 %v6985_v4, %v1907_v16  ;;  %v1922_v7 = vshll.u32 %v6992_v49, %v1907_v16  ;;  %vm1925_vm9 = vcmp.lt.s32.totalorder %v1906_v33, 1  ;;  %vm1926_vm2 = vcmp.lt.s32.totalorder %v1906_v33, 2 }
 0x314   : > { %v1911_v40 = vshrl.u32 %v7006_v10, %v1908_v46  ;;  %v1914_v52 = vshrl.u32 %v7007_v25, %v1908_v46  ;;  %v1917_v50 = vshrl.u32 %v6985_v4, %v1908_v46  ;;  %v1909_v5 = vshrl.u32 %v6991_v24, %v1908_v46 }
 0x315   : > { %v1920_v19 = vshrl.u32 %v6992_v49, %v1908_v46  ;;  %v1923_v57 = vshrl.u32 %v6994_v12, %v1908_v46  ;;  %v2012_v47 = vsub.s32 32, %v2011_v29  ;;  %vm1927_vm5 = vcmp.lt.s32.totalorder %v1906_v33, 3 }
 0x316   : > { %v1912_v55 = vor.u32 %v1911_v40, %v1910_v15  ;;  %v1915_v58 = vor.u32 %v1914_v52, %v1913_v34  ;;  %v1918_v48 = vor.u32 %v1917_v50, %v1916_v9  ;;  %vm1928_vm0 = vcmp.lt.s32.totalorder %v1906_v33, 4 }
 0x317   : > { %v1921_v11 = vor.u32 %v1920_v19, %v1919_v22  ;;  %v1924_v38 = vor.u32 %v1923_v57, %v1922_v7  ;;  %v2014_v61 = vshll.u32 %v6991_v24, %v2011_v29  ;;  %v2015_v60 = vshrl.u32 %v7006_v10, %v2012_v47 }
 0x318   : > { %v1929_v14 = vsel %vm1925_vm9, %v1909_v5, %v1912_v55  ;;  %v1930_v27 = vsel %vm1928_vm0, %v1918_v48, 2102212464  ;;  %v1933_v26 = vsel %vm1925_vm9, %v1912_v55, %v1915_v58  ;;  %v1937_v41 = vsel %vm1925_vm9, %v1915_v58, %v1918_v48 }
 0x319   : > { %v1931_v36 = vsel %vm1927_vm5, %v1915_v58, %v1930_v27  ;;  %v1934_v56 = vsel %vm1928_vm0, %v1921_v11, 920167782  ;;  %v1938_v37 = vsel %vm1928_vm0, %v1924_v38, 1326507024  ;;  %v2017_v20 = vshll.u32 %v7006_v10, %v2011_v29 }
 0x31a   : > { %v1935_v43 = vsel %vm1927_vm5, %v1918_v48, %v1934_v56  ;;  %v1939_v23 = vsel %vm1927_vm5, %v1921_v11, %v1938_v37  ;;  %v1932_v18 = vsel %vm1926_vm2, %v1929_v14, %v1931_v36  ;;  %v2018_v17 = vshrl.u32 %v7007_v25, %v2012_v47 }
 0x31b   : > { %v1936_v62 = vsel %vm1926_vm2, %v1933_v26, %v1935_v43  ;;  %v1940_v8 = vsel %vm1926_vm2, %v1937_v41, %v1939_v23  ;;  %v2016_v13 = vor.u32 %v2015_v60, %v2014_v61  ;;  %v2020_v15 = vshll.u32 %v7007_v25, %v2011_v29 }
 0x31c   : > { %v5595_v35 = vmul.u32.u64.low %v5561_v45, %v1940_v8  ;;  %v5596_v21 = vmul.u32.u64.high %v5561_v45, %v1940_v8, %v5595_v35  ;;  %v5599_v32 = vmul.u32.u64.low %v5561_v45, %v1936_v62  ;;  %v5600_v16 = vmul.u32.u64.high %v5561_v45, %v1936_v62, %v5599_v32 }
 0x31d   : > { %v2019_v46 = vor.u32 %v2018_v17, %v2017_v20  ;;  %v2021_v34 = vshrl.u32 %v6985_v4, %v2012_v47  ;;  %v2013_v33 = vshrl.u32 %v6991_v24, %v2012_v47  ;;  %v2023_v9 = vshll.u32 %v6985_v4, %v2011_v29 }
 0x31e   : > { %v2024_v22 = vshrl.u32 %v6992_v49, %v2012_v47  ;;  %v2027_v7 = vshrl.u32 %v6994_v12, %v2012_v47  ;;  %v1948_v40 = vmul.u32 %v5561_v45, %v1932_v18  ;;  %v2026_v50 = vshll.u32 %v6992_v49, %v2011_v29 }
 0x31f   : > { %v2022_v52 = vor.u32 %v2021_v34, %v2020_v15  ;;  %vm2029_vm12 = vcmp.lt.s32.totalorder %v5563_v1, 1  ;;  %vm1950_vm3 = vc.u32 %v5596_v21, %v5599_v32  ;;  %v1951_v5 = vadd.s32 1, %v5600_v16 }
 0x320   : > { %v2025_v19 = vor.u32 %v2024_v22, %v2023_v9  ;;  %vm2030_vm14 = vcmp.lt.s32.totalorder %v5563_v1, 2  ;;  %v2028_v57 = vor.u32 %v2027_v7, %v2026_v50  ;;  %vm2031_vm10 = vcmp.lt.s32.totalorder %v5563_v1, 3 }
 0x321   : > { %vm2032_vm1 = vcmp.lt.s32.totalorder %v5563_v1, 4  ;;  %v2037_v55 = vsel %vm2029_vm12, %v2016_v13, %v2019_v46  ;;  %v1952_v45 = vsel %vm1950_vm3, %v1951_v5, %v5600_v16  ;;  %v2041_v48 = vsel %vm2029_vm12, %v2019_v46, %v2022_v52 }
 0x322   : > { %v2034_v58 = vsel %vm2032_vm1, %v2022_v52, 2102212464  ;;  %v2038_v29 = vsel %vm2032_vm1, %v2025_v19, 920167782  ;;  %v1953_v47 = vadd.s32 %v1952_v45, %v1948_v40  ;;  %v2033_v11 = vsel %vm2029_vm12, %v2013_v33, %v2016_v13 }
 0x323   : > { %v2039_v38 = vsel %vm2031_vm10, %v2022_v52, %v2038_v29  ;;  %v2042_v14 = vsel %vm2032_vm1, %v2028_v57, 1326507024  ;;  %v2035_v27 = vsel %vm2031_vm10, %v2019_v46, %v2034_v58  ;;  %vm2112_vm7 = vcmp.gt.s32.totalorder %v5572_v30, 0 }
 0x324   : > { %v2040_v26 = vsel %vm2030_vm14, %v2037_v55, %v2039_v38  ;;  %v2043_v41 = vsel %vm2031_vm10, %v2025_v19, %v2042_v14  ;;  %v1954_v36 = vadd.s32 536870912, %v1953_v47  ;;  %v2113_v60 = vsel %vm2112_vm7, %v5572_v30, 0 }
 0x325   : > { %v2044_v56 = vsel %vm2030_vm14, %v2041_v48, %v2043_v41  ;;  %v5625_v37 = vmul.u32.u64.low %v5565_v59, %v2040_v26  ;;  %v5626_v61 = vmul.u32.u64.high %v5565_v59, %v2040_v26, %v5625_v37  ;;  %v2208_v20 = vand.u32 2139095040, %v5559_v0 }
 0x326   : > { %v5630_v43 = vmul.u32.u64.low %v5565_v59, %v2044_v56  ;;  %v5631_v23 = vmul.u32.u64.high %v5565_v59, %v2044_v56, %v5630_v43  ;;  %v5635_v18 = vshrl.u32 %v1954_v36, 30  ;;  %v2036_v62 = vsel %vm2030_vm14, %v2033_v11, %v2035_v27 }
 0x327   : > { %v2115_v8 = vand.u32 31, %v2113_v60  ;;  %v2055_v35 = vadd.s32 1, %v5626_v61  ;;  %v2052_v13 = vmul.u32 %v5565_v59, %v2036_v62  ;;  %v2109_v30 = vor.u32 8388608, %v5569_v3 }
 0x328   : > { %v1956_v17 = vshll.u32 %v5635_v18, 30  ;;  %vm2054_vm6 = vc.u32 %v5631_v23, %v5625_v37  ;;  %v2209_v46 = vshrl.u32 %v2208_v20, 23  ;;  %v2114_v1 = vshrl.u32 %v2113_v60, 5 }
 0x329   : > { %v2116_v16 = vsub.s32 32, %v2115_v8  ;;  %v2056_v34 = vsel %vm2054_vm6, %v2055_v35, %v5626_v61  ;;  %v2118_v33 = vshll.u32 %v6991_v24, %v2115_v8  ;;  %v2121_v7 = vshll.u32 %v7006_v10, %v2115_v8 }
 0x32a   : > { %v5645_v15 = vsub.s32 %v1953_v47, %v1956_v17  ;;  %v2057_v9 = vadd.s32 %v2056_v34, %v2052_v13  ;;  %v2124_v52 = vshll.u32 %v7007_v25, %v2115_v8  ;;  %v2127_v50 = vshll.u32 %v6985_v4, %v2115_v8 }
 0x32b   : > { %v2119_v22 = vshrl.u32 %v7006_v10, %v2116_v16  ;;  %v2122_v59 = vshrl.u32 %v7007_v25, %v2116_v16  ;;  %v2125_v3 = vshrl.u32 %v6985_v4, %v2116_v16  ;;  %v2128_v55 = vshrl.u32 %v6992_v49, %v2116_v16 }
 0x32c   : > { %v1959_v40 = vsub.s32 0, %v5645_v15  ;;  %v2058_v5 = vadd.s32 536870912, %v2057_v9  ;;  %v2130_v29 = vshll.u32 %v6992_v49, %v2115_v8  ;;  %v2131_v48 = vshrl.u32 %v6994_v12, %v2116_v16 }
 0x32d   : > { %v2120_v19 = vor.u32 %v2119_v22, %v2118_v33  ;;  %v2123_v57 = vor.u32 %v2122_v59, %v2121_v7  ;;  %v2126_v58 = vor.u32 %v2125_v3, %v2124_v52  ;;  %v2129_v11 = vor.u32 %v2128_v55, %v2127_v50 }
 0x32e   : > { %v3955_v45 = vmin.u32 %v1959_v40, %v5645_v15  ;;  %v5660_v47 = vshrl.u32 %v2058_v5, 30  ;;  %v2205_v38 = vand.u32 2147483647, %v5559_v0  ;;  %v2132_v27 = vor.u32 %v2131_v48, %v2130_v29  ;;  %v1776_v29 = vpop.permute.xlu0 %1775 }
 0x32f   : > { %v2149_v26 = vshll.u32 %v2109_v30, 8  ;;  %v3966_v41 = vadd.s32 4294967169, %v2209_v46  ;;  %vm2133_vm13 = vcmp.lt.s32.totalorder %v2114_v1, 1  ;;  %vm2135_vm15 = vcmp.lt.s32.totalorder %v2114_v1, 3 }
 0x330   : > { %v1961_v14 = vclz %v3955_v45  ;;  %v2060_v36 = vshll.u32 %v5660_v47, 30  ;;  %vm2136_vm11 = vcmp.lt.s32.totalorder %v2114_v1, 4  ;;  %v2141_v61 = vsel %vm2133_vm13, %v2120_v19, %v2123_v57 }
 0x331   : > { %v2142_v43 = vsel %vm2136_vm11, %v2129_v11, 920167782  ;;  %v2145_v60 = vsel %vm2133_vm13, %v2123_v57, %v2126_v58  ;;  %v2138_v62 = vsel %vm2136_vm11, %v2126_v58, 2102212464  ;;  %v2146_v17 = vsel %vm2136_vm11, %v2132_v27, 1326507024 }
 0x332   : > { %v3956_v56 = vadd.s32 4294967294, %v1961_v14  ;;  %v5666_v20 = vsub.s32 %v2057_v9, %v2060_v36  ;;  %v2143_v8 = vsel %vm2135_vm15, %v2126_v58, %v2142_v43  ;;  %v2117_v35 = vshrl.u32 %v6991_v24, %v2116_v16 }
 0x333   : > { %vm2134_vm4 = vcmp.lt.s32.totalorder %v2114_v1, 2  ;;  %v2147_v13 = vsel %vm2135_vm15, %v2129_v11, %v2146_v17  ;;  %v2215_v33 = vadd.s32 1, %v3966_v41  ;;  %v2139_v7 = vsel %vm2135_vm15, %v2123_v57, %v2138_v62 }
 0x334   : > { %vm3957_vm8 = vcmp.lt.s32.totalorder %v3956_v56, 0  ;;  %v2063_v30 = vsub.s32 0, %v5666_v20  ;;  %v2144_v46 = vsel %vm2134_vm4, %v2141_v61, %v2143_v8  ;;  %v2148_v34 = vsel %vm2134_vm4, %v2145_v60, %v2147_v13 }
 0x335   : > { %v1964_v22 = vsel %vm3957_vm8, 0, %v3956_v56  ;;  %v2137_v9 = vsel %vm2133_vm13, %v2117_v35, %v2120_v19  ;;  %v5677_v40 = vmul.u32.u64.low %v2149_v26, %v2148_v34  ;;  %v5678_v52 = vmul.u32.u64.high %v2149_v26, %v2148_v34, %v5677_v40 }
 0x336   : > { %v3959_v59 = vmin.u32 %v2063_v30, %v5666_v20  ;;  %vm2216_vm9 = vcmp.gt.s32.totalorder %v2215_v33, 0  ;;  %v5680_v16 = vmul.u32.u64.low %v2149_v26, %v2144_v46  ;;  %v5681_v3 = vmul.u32.u64.high %v2149_v26, %v2144_v46, %v5680_v16 }
 0x337   : > { %v2212_v50 = vand.u32 8388607, %v2205_v38  ;;  %v1965_v5 = vsub.s32 32, %v1964_v22  ;;  %v2217_v45 = vsel %vm2216_vm9, %v2215_v33, 0  ;;  %v1969_v58 = vsub.s32 4294967266, %v1964_v22 }
 0x338   : > { %v2065_v55 = vclz %v3959_v59  ;;  %v2140_v19 = vsel %vm2134_vm4, %v2137_v9, %v2139_v7  ;;  %v2219_v57 = vand.u32 31, %v2217_v45  ;;  %v1949_v48 = vadd.s32 %v5599_v32, %v5596_v21 }
 0x339   : > { %vm2158_vm2 = vc.u32 %v5678_v52, %v5680_v16  ;;  %v2159_v14 = vadd.s32 1, %v5681_v3  ;;  %v2213_v27 = vor.u32 8388608, %v2212_v50  ;;  %v1875_v41 = vadd.f32 %v5549_v28, %v1776_v29 }
 0x33a   : > { %v3960_v11 = vadd.s32 4294967294, %v2065_v55  ;;  %v1967_v36 = vshrl.u32 %v1949_v48, %v1965_v5  ;;  %v2156_v56 = vmul.u32 %v2149_v26, %v2140_v19  ;;  %v1877_v1 = vadd.f32 %v5552_v39, %v1776_v29 }
 0x33b   : > { %v1970_v61 = vadd.s32 127, %v1969_v58  ;;  %v2160_v60 = vsel %vm2158_vm2, %v2159_v14, %v5681_v3  ;;  %v2220_v21 = vsub.s32 32, %v2219_v57  ;;  %v1966_v62 = vshll.u32 %v5645_v15, %v1964_v22 }
 0x33c   : > { %vm3961_vm5 = vcmp.lt.s32.totalorder %v3960_v11, 0  ;;  %v2161_v32 = vadd.s32 %v2160_v60, %v2156_v56  ;;  %v2053_v8 = vadd.s32 %v5625_v37, %v5631_v23  ;;  %v5700_v17 = vshll.u32 %v2213_v27, 8 }
 0x33d   : > { %v5694_v43 = vsel %vm3961_vm5, 0, %v3960_v11  ;;  %v5703_v26 = vmul.f32 30.0, %v1875_v41  ;;  %v5705_v39 = vmul.f32 30.0, %v1877_v1  ;;  %v1968_v13 = vor.u32 %v1967_v36, %v1966_v62 }
 0x33e   : > { %v2073_v28 = vsub.s32 4294967266, %v5694_v43  ;;  %v2162_v35 = vadd.s32 536870912, %v2161_v32  ;;  %v1971_v30 = vshll.u32 %v1970_v61, 23  ;;  %v2223_v46 = vshrl.u32 %v7006_v10, %v2220_v21 }
 0x33f   : > { %v2226_v34 = vshrl.u32 %v7007_v25, %v2220_v21  ;;  %v2222_v15 = vshll.u32 %v6991_v24, %v2219_v57  ;;  %v2229_v37 = vshrl.u32 %v6985_v4, %v2220_v21  ;;  %v2232_v23 = vshrl.u32 %v6992_v49, %v2220_v21 }
 0x340   : > { %v5709_v33 = vshrl.u32 %v2162_v35, 30  ;;  %v2069_v22 = vsub.s32 32, %v5694_v43  ;;  %v2225_v9 = vshll.u32 %v7006_v10, %v2219_v57  ;;  %v2231_v7 = vshll.u32 %v6985_v4, %v2219_v57 }
 0x341   : > { %v2235_v59 = vshrl.u32 %v6994_v12, %v2220_v21  ;;  %v2074_v40 = vadd.s32 127, %v2073_v28  ;;  %v2218_v50 = vshrl.u32 %v2217_v45, 5  ;;  %v2228_v5 = vshll.u32 %v7007_v25, %v2219_v57 }
 0x342   : > { %v2164_v3 = vshll.u32 %v5709_v33, 30  ;;  %v2224_v55 = vor.u32 %v2223_v46, %v2222_v15  ;;  %v2227_v58 = vor.u32 %v2226_v34, %v2225_v9  ;;  %v2233_v19 = vor.u32 %v2232_v23, %v2231_v7 }
 0x343   : > { %v2234_v29 = vshll.u32 %v6992_v49, %v2219_v57  ;;  %v1972_v48 = vor.u32 4788187, %v1971_v30  ;;  %v2230_v14 = vor.u32 %v2229_v37, %v2228_v5  ;;  %v6959_v27 = vand.u32 2147483647, %v5703_v26 }
 0x344   : > { %v5721_v11 = vsub.s32 %v2161_v32, %v2164_v3  ;;  %v1975_v41 = vcvt.s32.f32 %v1968_v13  ;;  %v2071_v36 = vshrl.u32 %v2053_v8, %v2069_v22  ;;  %v2221_v56 = vshrl.u32 %v6991_v24, %v2220_v21 }
 0x345   : > { %v2236_v1 = vor.u32 %v2235_v59, %v2234_v29  ;;  %v2075_v61 = vshll.u32 %v2074_v40, 23  ;;  %vm2237_vm0 = vcmp.lt.s32.totalorder %v2218_v50, 1  ;;  %vm2240_vm12 = vcmp.lt.s32.totalorder %v2218_v50, 4 }
 0x346   : > { %v2167_v45 = vsub.s32 0, %v5721_v11  ;;  %vm2238_vm3 = vcmp.lt.s32.totalorder %v2218_v50, 2  ;;  %vm2239_vm14 = vcmp.lt.s32.totalorder %v2218_v50, 3  ;;  %v2245_v57 = vsel %vm2237_vm0, %v2224_v55, %v2227_v58 }
 0x347   : > { %v2246_v60 = vsel %vm2240_vm12, %v2233_v19, 920167782  ;;  %v2242_v62 = vsel %vm2240_vm12, %v2230_v14, 2102212464  ;;  %v2249_v35 = vsel %vm2237_vm0, %v2227_v58, %v2230_v14  ;;  %v1973_v8 = vand.u32 2147483647, %v1972_v48 }
 0x348   : > { %v3963_v32 = vmin.u32 %v2167_v45, %v5721_v11  ;;  %v2247_v28 = vsel %vm2239_vm14, %v2230_v14, %v2246_v60  ;;  %v2070_v21 = vshll.u32 %v5666_v20, %v5694_v43  ;;  %v2250_v30 = vsel %vm2240_vm12, %v2236_v1, 1326507024 }
 0x349   : > { %v2248_v13 = vsel %vm2238_vm3, %v2245_v57, %v2247_v28  ;;  %v2076_v46 = vor.u32 4788187, %v2075_v61  ;;  %v2241_v15 = vsel %vm2237_vm0, %v2221_v56, %v2224_v55  ;;  %v2251_v37 = vsel %vm2239_vm14, %v2233_v19, %v2250_v30  ;;  %v5753_v57 = vpop.permute.xlu1 %1780 }
 0x34a   : > { %v2169_v34 = vclz %v3963_v32  ;;  %v2243_v23 = vsel %vm2239_vm14, %v2227_v58, %v2242_v62  ;;  %v2252_v22 = vsel %vm2238_vm3, %v2249_v35, %v2251_v37  ;;  %v2072_v59 = vor.u32 %v2071_v36, %v2070_v21 }
 0x34b   : > { %v5735_v9 = vmul.u32.u64.low %v5700_v17, %v2248_v13  ;;  %v5736_v7 = vmul.u32.u64.high %v5700_v17, %v2248_v13, %v5735_v9  ;;  %v5740_v20 = vmul.u32.u64.low %v5700_v17, %v2252_v22  ;;  %v5741_v43 = vmul.u32.u64.high %v5700_v17, %v2252_v22, %v5740_v20 }
 0x34c   : > { %v3964_v40 = vadd.s32 4294967294, %v2169_v34  ;;  %v2312_v3 = vand.u32 2139095040, %v5703_v26  ;;  %v1976_v5 = vmul.f32 %v1975_v41, %v1973_v8  ;;  %v2244_v55 = vsel %vm2238_vm3, %v2241_v15, %v2243_v23 }
 0x34d   : > { %v2416_v58 = vand.u32 2139095040, %v5705_v39  ;;  %v2077_v19 = vand.u32 2147483647, %v2076_v46  ;;  %v2263_v29 = vadd.s32 1, %v5736_v7  ;;  %v2079_v14 = vcvt.s32.f32 %v2072_v59 }
 0x34e   : > { %vm3965_vm10 = vcmp.lt.s32.totalorder %v3964_v40, 0  ;;  %v2313_v48 = vshrl.u32 %v2312_v3, 23  ;;  %v2316_v36 = vand.u32 8388607, %v6959_v27  ;;  %v2260_v1 = vmul.u32 %v5700_v17, %v2244_v55 }
 0x34f   : > { %v2172_v56 = vsel %vm3965_vm10, 0, %v3964_v40  ;;  %vm2262_vm1 = vc.u32 %v5741_v43, %v5735_v9  ;;  %v1977_v61 = vxor.u32 2147483648, %v1976_v5  ;;  %v2417_v45 = vshrl.u32 %v2416_v58, 23 }
 0x350   : > { %v3970_v41 = vadd.s32 4294967169, %v2313_v48  ;;  %v2264_v50 = vsel %vm2262_vm1, %v2263_v29, %v5736_v7  ;;  %v5755_v60 = vmul.f32 %v2079_v14, %v2077_v19  ;;  %vm1895_vm7 = vcmp.lt.s32.totalorder %v5535_v42, 0 }
 0x351   : > { %v2265_v32 = vadd.s32 %v2264_v50, %v2260_v1  ;;  %v2173_v28 = vsub.s32 32, %v2172_v56  ;;  %v2317_v35 = vor.u32 8388608, %v2316_v36  ;;  %v1881_v17 = vadd.f32 %v5555_v54, %v5753_v57 }
 0x352   : > { %v2319_v62 = vadd.s32 1, %v3970_v41  ;;  %v2177_v8 = vsub.s32 4294967266, %v2172_v56  ;;  %v3974_v13 = vadd.s32 4294967169, %v2417_v45  ;;  %v5762_v30 = vsel %vm1895_vm7, %v1977_v61, %v1976_v5 }
 0x353   : > { %v2266_v21 = vadd.s32 536870912, %v2265_v32  ;;  %v2157_v46 = vadd.s32 %v5680_v16, %v5678_v52  ;;  %v2081_v15 = vxor.u32 2147483648, %v5755_v60  ;;  %v6958_v22 = vand.u32 2147483647, %v5705_v39 }
 0x354   : > { %vm2320_vm6 = vcmp.gt.s32.totalorder %v2319_v62, 0  ;;  %v2174_v54 = vshll.u32 %v5721_v11, %v2172_v56  ;;  %v5771_v59 = vshll.u32 %v2317_v35, 8  ;;  %v5773_v40 = vmul.f32 30.0, %v1881_v17 }
 0x355   : > { %v2321_v34 = vsel %vm2320_vm6, %v2319_v62, 0  ;;  %v5767_v37 = vshrl.u32 %v2266_v21, 30  ;;  %v2175_v7 = vshrl.u32 %v2157_v46, %v2173_v28  ;;  %v2178_v20 = vadd.s32 127, %v2177_v8 }
 0x356   : > { %v2323_v23 = vand.u32 31, %v2321_v34  ;;  %v2423_v52 = vadd.s32 1, %v3974_v13  ;;  %v2322_v16 = vshrl.u32 %v2321_v34, 5  ;;  %vm1999_vm13 = vcmp.lt.s32.totalorder %v5537_v63, 0 }
 0x357   : > { %v2268_v3 = vshll.u32 %v5767_v37, 30  ;;  %v5794_v62 = vor.u32 %v2175_v7, %v2174_v54  ;;  %v2179_v8 = vshll.u32 %v2178_v20, 23  ;;  %vm5812_vm5 = vcmp.le.f32.partialorder %v1893_v44, 0.7853982 }
 0x358   : > { %v2324_v5 = vsub.s32 32, %v2323_v23  ;;  %v2326_v55 = vshll.u32 %v6991_v24, %v2323_v23  ;;  %v2329_v58 = vshll.u32 %v7006_v10, %v2323_v23  ;;  %v2332_v19 = vshll.u32 %v7007_v25, %v2323_v23 }
 0x359   : > { %v5779_v29 = vsub.s32 %v2265_v32, %v2268_v3  ;;  %v2335_v14 = vshll.u32 %v6985_v4, %v2323_v23  ;;  %v2338_v1 = vshll.u32 %v6992_v49, %v2323_v23  ;;  %v5791_v32 = vand.u32 8388607, %v6958_v22 }
 0x35a   : > { %v2327_v11 = vshrl.u32 %v7006_v10, %v2324_v5  ;;  %v2330_v48 = vshrl.u32 %v7007_v25, %v2324_v5  ;;  %v2333_v36 = vshrl.u32 %v6985_v4, %v2324_v5  ;;  %v2336_v56 = vshrl.u32 %v6992_v49, %v2324_v5 }
 0x35b   : > { %v2339_v41 = vshrl.u32 %v6994_v12, %v2324_v5  ;;  %v2271_v61 = vsub.s32 0, %v5779_v29  ;;  %vm2341_vm15 = vcmp.lt.s32.totalorder %v2322_v16, 1  ;;  %vm2424_vm11 = vcmp.gt.s32.totalorder %v2423_v52, 0 }
 0x35c   : > { %v2328_v50 = vor.u32 %v2327_v11, %v2326_v55  ;;  %v2331_v45 = vor.u32 %v2330_v48, %v2329_v58  ;;  %v2334_v28 = vor.u32 %v2333_v36, %v2332_v19  ;;  %v2337_v35 = vor.u32 %v2336_v56, %v2335_v14 }
 0x35d   : > { %v2340_v17 = vor.u32 %v2339_v41, %v2338_v1  ;;  %v3967_v21 = vmin.u32 %v2271_v61, %v5779_v29  ;;  %v2325_v13 = vshrl.u32 %v6991_v24, %v2324_v5  ;;  %vm2342_vm8 = vcmp.lt.s32.totalorder %v2322_v16, 2 }
 0x35e   : > { %vm2344_vm4 = vcmp.lt.s32.totalorder %v2322_v16, 4  ;;  %v2349_v46 = vsel %vm2341_vm15, %v2328_v50, %v2331_v45  ;;  %vm2343_vm9 = vcmp.lt.s32.totalorder %v2322_v16, 3  ;;  %v2353_v7 = vsel %vm2341_vm15, %v2331_v45, %v2334_v28 }
 0x35f   : > { %v2273_v34 = vclz %v3967_v21  ;;  %v2346_v23 = vsel %vm2344_vm4, %v2334_v28, 2102212464  ;;  %v2350_v3 = vsel %vm2344_vm4, %v2337_v35, 920167782  ;;  %v2345_v55 = vsel %vm2341_vm15, %v2325_v13, %v2328_v50 }
 0x360   : > { %v2351_v54 = vsel %vm2343_vm9, %v2334_v28, %v2350_v3  ;;  %v2354_v58 = vsel %vm2344_vm4, %v2340_v17, 1326507024  ;;  %v2347_v11 = vsel %vm2343_vm9, %v2331_v45, %v2346_v23  ;;  %v2180_v14 = vor.u32 4788187, %v2179_v8 }
 0x361   : > { %v3968_v19 = vadd.s32 4294967294, %v2273_v34  ;;  %v2352_v20 = vsel %vm2342_vm8, %v2349_v46, %v2351_v54  ;;  %v2355_v48 = vsel %vm2343_vm9, %v2337_v35, %v2354_v58  ;;  %v2425_v61 = vsel %vm2424_vm11, %v2423_v52, 0 }
 0x362   : > { %v2356_v36 = vsel %vm2342_vm8, %v2353_v7, %v2355_v48  ;;  %v5801_v5 = vmul.u32.u64.low %v5771_v59, %v2352_v20  ;;  %v5802_v56 = vmul.u32.u64.high %v5771_v59, %v2352_v20, %v5801_v5  ;;  %v2348_v28 = vsel %vm2342_vm8, %v2345_v55, %v2347_v11 }
 0x363   : > { %vm3969_vm2 = vcmp.lt.s32.totalorder %v3968_v19, 0  ;;  %v5806_v1 = vmul.u32.u64.low %v5771_v59, %v2356_v36  ;;  %v5807_v41 = vmul.u32.u64.high %v5771_v59, %v2356_v36, %v5806_v1  ;;  %v2427_v35 = vand.u32 31, %v2425_v61 }
 0x364   : > { %v5816_v45 = vsel %vm3969_vm2, 0, %v3968_v19  ;;  %v5823_v17 = vsel %vm5812_vm5, %v5535_v42, %v5762_v30  ;;  %v5830_v44 = vsel %vm1999_vm13, %v2081_v15, %v5755_v60  ;;  %v2261_v52 = vadd.s32 %v5735_v9, %v5741_v43 }
 0x365   : > { %v2281_v16 = vsub.s32 4294967266, %v5816_v45  ;;  %v2367_v8 = vadd.s32 1, %v5802_v56  ;;  %v2421_v21 = vor.u32 8388608, %v5791_v32  ;;  %v2428_v13 = vsub.s32 32, %v2427_v35 }
 0x366   : > { %v6957_v30 = vand.u32 2147483647, %v5773_v40  ;;  %v2181_v46 = vand.u32 2147483647, %v2180_v14  ;;  %v2183_v34 = vcvt.s32.f32 %v5794_v62  ;;  %v2364_v23 = vmul.u32 %v5771_v59, %v2348_v28 }
 0x367   : > { %vm2366_vm0 = vc.u32 %v5807_v41, %v5801_v5  ;;  %v2431_v9 = vshrl.u32 %v7006_v10, %v2428_v13  ;;  %v2434_v43 = vshrl.u32 %v7007_v25, %v2428_v13  ;;  %v2520_v15 = vand.u32 2139095040, %v5773_v40 }
 0x368   : > { %v2368_v60 = vsel %vm2366_vm0, %v2367_v8, %v5802_v56  ;;  %v2282_v32 = vadd.s32 127, %v2281_v16  ;;  %v2426_v55 = vshrl.u32 %v2425_v61, 5  ;;  %v2430_v54 = vshll.u32 %v6991_v24, %v2427_v35 }
 0x369   : > { %v2369_v3 = vadd.s32 %v2368_v60, %v2364_v23  ;;  %v2277_v62 = vsub.s32 32, %v5816_v45  ;;  %v2433_v59 = vshll.u32 %v7006_v10, %v2427_v35  ;;  %v2436_v7 = vshll.u32 %v7007_v25, %v2427_v35 }
 0x36a   : > { %v2437_v58 = vshrl.u32 %v6985_v4, %v2428_v13  ;;  %v2432_v11 = vor.u32 %v2431_v9, %v2430_v54  ;;  %v2439_v20 = vshll.u32 %v6985_v4, %v2427_v35  ;;  %v2440_v48 = vshrl.u32 %v6992_v49, %v2428_v13 }
 0x36b   : > { %v2370_v19 = vadd.s32 536870912, %v2369_v3  ;;  %v2435_v14 = vor.u32 %v2434_v43, %v2433_v59  ;;  %v2442_v56 = vshll.u32 %v6992_v49, %v2427_v35  ;;  %v2443_v1 = vshrl.u32 %v6994_v12, %v2428_v13 }
 0x36c   : > { %v2438_v36 = vor.u32 %v2437_v58, %v2436_v7  ;;  %v2283_v61 = vshll.u32 %v2282_v32, 23  ;;  %v2441_v16 = vor.u32 %v2440_v48, %v2439_v20  ;;  %v2461_v8 = vshll.u32 %v2421_v21, 8 }
 0x36d   : > { %v5855_v28 = vshrl.u32 %v2370_v19, 30  ;;  %v2184_v23 = vmul.f32 %v2183_v34, %v2181_v46  ;;  %v2278_v60 = vshll.u32 %v5779_v29, %v5816_v45  ;;  %v2444_v9 = vor.u32 %v2443_v1, %v2442_v56 }
 0x36e   : > { %v2521_v54 = vshrl.u32 %v2520_v15, 23  ;;  %vm5861_vm12 = vcmp.le.f32.partialorder %v1997_v2, 0.7853982  ;;  %v2279_v35 = vshrl.u32 %v2261_v52, %v2277_v62  ;;  %vm2445_vm3 = vcmp.lt.s32.totalorder %v2426_v55, 1 }
 0x36f   : > { %7059 = vst [vmem:[#allocation5_spill] sm:$0xff] %v5855_v28  ;;  %v2372_v59 = vshll.u32 %v5855_v28, 30  ;;  %vm2448_vm14 = vcmp.lt.s32.totalorder %v2426_v55, 4  ;;  %v2429_v32 = vshrl.u32 %v6991_v24, %v2428_v13  ;;  %v2453_v46 = vsel %vm2445_vm3, %v2432_v11, %v2435_v14 }
 0x370   : > { %v2450_v21 = vsel %vm2448_vm14, %v2438_v36, 2102212464  ;;  %v2454_v34 = vsel %vm2448_vm14, %v2441_v16, 920167782  ;;  %v2284_v7 = vor.u32 4788187, %v2283_v61  ;;  %v2457_v45 = vsel %vm2445_vm3, %v2435_v14, %v2438_v36 }
 0x371   : > { %v5867_v29 = vsub.s32 %v2369_v3, %v2372_v59  ;;  %vm2447_vm10 = vcmp.lt.s32.totalorder %v2426_v55, 3  ;;  %vm2446_vm1 = vcmp.lt.s32.totalorder %v2426_v55, 2  ;;  %v2449_v2 = vsel %vm2445_vm3, %v2429_v32, %v2432_v11 }
 0x372   : > { %v2455_v15 = vsel %vm2447_vm10, %v2438_v36, %v2454_v34  ;;  %v2458_v58 = vsel %vm2448_vm14, %v2444_v9, 1326507024  ;;  %v2451_v62 = vsel %vm2447_vm10, %v2435_v14, %v2450_v21  ;;  %v2280_v48 = vor.u32 %v2279_v35, %v2278_v60 }
 0x373   : > { %v2375_v52 = vsub.s32 0, %v5867_v29  ;;  %v2456_v19 = vsel %vm2446_vm1, %v2453_v46, %v2455_v15  ;;  %v2459_v20 = vsel %vm2447_vm10, %v2441_v16, %v2458_v58  ;;  %v2185_v3 = vxor.u32 2147483648, %v2184_v23 }
 0x374   : > { %v2460_v13 = vsel %vm2446_vm1, %v2457_v45, %v2459_v20  ;;  %v5872_v56 = vmul.u32.u64.low %v2461_v8, %v2456_v19  ;;  %v5873_v1 = vmul.u32.u64.high %v2461_v8, %v2456_v19, %v5872_v56  ;;  %vm2103_vm6 = vcmp.lt.s32.totalorder %v5545_v51, 0 }
 0x375   : > { %v3971_v61 = vmin.u32 %v2375_v52, %v5867_v29  ;;  %v5877_v59 = vmul.u32.u64.low %v2461_v8, %v2460_v13  ;;  %v5878_v11 = vmul.u32.u64.high %v2461_v8, %v2460_v13, %v5877_v59  ;;  %v2285_v36 = vand.u32 2147483647, %v2284_v7 }
 0x376   : > { %v2452_v14 = vsel %vm2446_vm1, %v2449_v2, %v2451_v62  ;;  %v3978_v9 = vadd.s32 4294967169, %v2521_v54  ;;  %v1979_v16 = vsub.s32 4, %v5635_v18  ;;  %4234 = vcosq.f32 %v5823_v17 }
 0x377   : > { %vm5886_vm15 = vcmp.le.f32.partialorder %v2101_v31, 0.7853982  ;;  %v2377_v35 = vclz %v3971_v61  ;;  %v2085_v32 = vsel %vm5861_vm12, %v5537_v63, %v5830_v44  ;;  %v2287_v21 = vcvt.s32.f32 %v2280_v48 }
 0x378   : > { %v2471_v55 = vadd.s32 1, %v5873_v1  ;;  %v2527_v54 = vadd.s32 1, %v3978_v9  ;;  %v2186_v46 = vsel %vm2103_vm6, %v2185_v3, %v2184_v23  ;;  %v2468_v34 = vmul.u32 %v2461_v8, %v2452_v14 }
 0x379   : > { %vm2470_vm11 = vc.u32 %v5878_v11, %v5872_v56  ;;  %v2524_v31 = vand.u32 8388607, %v6957_v30  ;;  %v2288_v7 = vmul.f32 %v2287_v21, %v2285_v36  ;;  %v1883_v44 = vadd.f32 %v5557_v53, %v5753_v57 }
 0x37a   : > { %v2472_v45 = vsel %vm2470_vm11, %v2471_v55, %v5873_v1  ;;  %vm2528_vm8 = vcmp.gt.s32.totalorder %v2527_v54, 0  ;;  %4236 = vsinq.f32 %v5823_v17  ;;  %v3972_v2 = vadd.s32 4294967294, %v2377_v35 }
 0x37b   : > { %v2473_v15 = vadd.s32 %v2472_v45, %v2468_v34  ;;  %v2529_v58 = vsel %vm2528_vm8, %v2527_v54, 0  ;;  %v5908_v8 = vsel %vm1895_vm7, %v1979_v16, %v5635_v18  ;;  %4238 = vcosq.f32 %v2085_v32 }
 0x37c   : > { %vm2207_vm4 = vcmp.lt.s32.totalorder %v5559_v0, 0  ;;  %v2531_v23 = vand.u32 31, %v2529_v58  ;;  %4240 = vsinq.f32 %v2085_v32  ;;  %v5915_v53 = vsel %vm5886_vm15, %v5545_v51, %v2186_v46 }
 0x37d   : > { %v2474_v57 = vadd.s32 536870912, %v2473_v15  ;;  %v2289_v17 = vxor.u32 2147483648, %v2288_v7  ;;  %v2525_v62 = vor.u32 8388608, %v2524_v31  ;;  %v5917_v20 = vmul.f32 30.0, %v1883_v44 }
 0x37e   : > { %v2532_v19 = vsub.s32 32, %v2531_v23  ;;  %vm3973_vm7 = vcmp.lt.s32.totalorder %v3972_v2, 0  ;;  %v2534_v48 = vshll.u32 %v6991_v24, %v2531_v23  ;;  %v2537_v13 = vshll.u32 %v7006_v10, %v2531_v23 }
 0x37f   : > { %v5919_v18 = vshrl.u32 %v2474_v57, 30  ;;  %v2540_v61 = vshll.u32 %v7007_v25, %v2531_v23  ;;  %v2530_v9 = vshrl.u32 %v2529_v58, 5  ;;  %v2543_v16 = vshll.u32 %v6985_v4, %v2531_v23 }
 0x380   : > { %v2535_v1 = vshrl.u32 %v7006_v10, %v2532_v19  ;;  %v2538_v3 = vshrl.u32 %v7007_v25, %v2532_v19  ;;  %v2541_v59 = vshrl.u32 %v6985_v4, %v2532_v19  ;;  %v5927_v36 = vpop.eup %4234  ;;  %v2544_v35 = vshrl.u32 %v6992_v49, %v2532_v19 }
 0x381   : > { %7064 = vst [vmem:[#allocation7_spill] sm:$0xff] %v5919_v18  ;;  %v2476_v14 = vshll.u32 %v5919_v18, 30  ;;  %v2290_v32 = vsel %vm2207_vm4, %v2289_v17, %v2288_v7  ;;  %vm5936_vm9 = vcmp.le.f32.partialorder %v2205_v38, 0.7853982  ;;  %v2565_v45 = vshll.u32 %v2525_v62, 8 }
 0x382   : > { %v2536_v21 = vor.u32 %v2535_v1, %v2534_v48  ;;  %v2539_v55 = vor.u32 %v2538_v3, %v2537_v13  ;;  %v2542_v54 = vor.u32 %v2541_v59, %v2540_v61  ;;  %v2545_v31 = vor.u32 %v2544_v35, %v2543_v16 }
 0x383   : > { %v5940_v34 = vsub.s32 %v2473_v15, %v2476_v14  ;;  %v2083_v44 = vsub.s32 4, %v5660_v47  ;;  %v5944_v58 = vsel %vm3973_vm7, 0, %v3972_v2  ;;  %v2546_v7 = vshll.u32 %v6992_v49, %v2531_v23 }
 0x384   : > { %v2547_v57 = vshrl.u32 %v6994_v12, %v2532_v19  ;;  %v2624_v17 = vand.u32 2139095040, %v5917_v20  ;;  %v5949_v48 = vpop.eup %4236  ;;  %vm2549_vm2 = vcmp.lt.s32.totalorder %v2530_v9, 1  ;;  %vm2551_vm0 = vcmp.lt.s32.totalorder %v2530_v9, 3 }
 0x385   : > { %v2479_v38 = vsub.s32 0, %v5940_v34  ;;  %vm2552_vm3 = vcmp.lt.s32.totalorder %v2530_v9, 4  ;;  %v5952_v15 = vpop.eup %4238  ;;  %v2557_v2 = vsel %vm2549_vm2, %v2536_v21, %v2539_v55  ;;  %v2533_v61 = vshrl.u32 %v6991_v24, %v2532_v19 }
 0x386   : > { %v2548_v62 = vor.u32 %v2547_v57, %v2546_v7  ;;  %v2554_v13 = vsel %vm2552_vm3, %v2542_v54, 2102212464  ;;  %v2558_v1 = vsel %vm2552_vm3, %v2545_v31, 920167782  ;;  %v5955_v3 = vpop.eup %4240  ;;  %vm2550_vm14 = vcmp.lt.s32.totalorder %v2530_v9, 2 }
 0x387   : > { %v3975_v23 = vmin.u32 %v2479_v38, %v5940_v34  ;;  %v2559_v59 = vsel %vm2551_vm0, %v2542_v54, %v2558_v1  ;;  %v2385_v14 = vsub.s32 4294967266, %v5944_v58  ;;  %v2561_v35 = vsel %vm2549_vm2, %v2539_v55, %v2542_v54 }
 0x388   : > { %v2560_v16 = vsel %vm2550_vm14, %v2557_v2, %v2559_v59  ;;  %v2562_v7 = vsel %vm2552_vm3, %v2548_v62, 1326507024  ;;  %v2553_v30 = vsel %vm2549_vm2, %v2533_v61, %v2536_v21  ;;  %v2555_v22 = vsel %vm2551_vm0, %v2539_v55, %v2554_v13 }
 0x389   : > { %v2481_v57 = vclz %v3975_v23  ;;  %v2563_v27 = vsel %vm2551_vm0, %v2545_v31, %v2562_v7  ;;  %v5967_v19 = vmul.u32.u64.low %v2565_v45, %v2560_v16  ;;  %v5968_v52 = vmul.u32.u64.high %v2565_v45, %v2560_v16, %v5967_v19 }
 0x38a   : > { %v2564_v38 = vsel %vm2550_vm14, %v2561_v35, %v2563_v27  ;;  %v2625_v1 = vshrl.u32 %v2624_v17, 23  ;;  %v6965_v54 = vand.u32 2147483647, %v5917_v20  ;;  %4242 = vcosq.f32 %v5915_v53 }
 0x38b   : > { %v3976_v6 = vadd.s32 4294967294, %v2481_v57  ;;  %v5970_v28 = vmul.u32.u64.low %v2565_v45, %v2564_v38  ;;  %v5971_v18 = vmul.u32.u64.high %v2565_v45, %v2564_v38, %v5970_v28  ;;  %v2293_v21 = vsel %vm5936_vm9, %v5559_v0, %v2290_v32 }
 0x38c   : > { %v3982_v55 = vadd.s32 4294967169, %v2625_v1  ;;  %v2381_v31 = vsub.s32 32, %v5944_v58  ;;  %v2386_v27 = vadd.s32 127, %v2385_v14  ;;  %v2556_v62 = vsel %vm2550_vm14, %v2553_v30, %v2555_v22 }
 0x38d   : > { %v2084_v17 = vsel %vm1999_vm13, %v2083_v44, %v5660_v47  ;;  %v7067_v13 = vsub.s32 4, %v5709_v33  ;;  %4244 = vsinq.f32 %v5915_v53  ;;  %v2575_v9 = vadd.s32 1, %v5968_v52 }
 0x38e   : > { %4246 = vcosq.f32 %v2293_v21  ;;  %v2365_v22 = vadd.s32 %v5801_v5, %v5807_v41  ;;  %vm3977_vm13 = vcmp.lt.s32.totalorder %v3976_v6, 0  ;;  %v2628_v47 = vand.u32 8388607, %v6965_v54 }
 0x38f   : > { %v5991_v32 = vsel %vm2103_vm6, %v7067_v13, %v5709_v33  ;;  %v2572_v30 = vmul.u32 %v2565_v45, %v2556_v62  ;;  %vm2574_vm10 = vc.u32 %v5971_v18, %v5967_v19  ;;  %v2631_v44 = vadd.s32 1, %v3982_v55 }
 0x390   : > { %v2086_v33 = vsel %vm5861_vm12, 0, %v2084_v17  ;;  %4248 = vsinq.f32 %v2293_v21  ;;  %v2383_v2 = vshrl.u32 %v2365_v22, %v2381_v31  ;;  %v2387_v53 = vshll.u32 %v2386_v27, 23 }
 0x391   : > { %v2576_v23 = vsel %vm2574_vm10, %v2575_v9, %v5968_v52  ;;  %v6003_v61 = vsel %vm3977_vm13, 0, %v3976_v6  ;;  %vm2632_vm1 = vcmp.gt.s32.totalorder %v2631_v44, 0  ;;  %v2094_v5 = vxor.u32 2147483648, %v5955_v3 }
 0x392   : > { %v2577_v59 = vadd.s32 %v2576_v23, %v2572_v30  ;;  %v2382_v41 = vshll.u32 %v5867_v29, %v5944_v58  ;;  %v2629_v45 = vor.u32 8388608, %v2628_v47  ;;  %v2633_v14 = vsel %vm2632_vm1, %v2631_v44, 0 }
 0x393   : > { %v2090_v16 = vadd.s32 3, %v2086_v33  ;;  %v2469_v43 = vadd.s32 %v5872_v56, %v5878_v11  ;;  %v2635_v7 = vand.u32 31, %v2633_v14  ;;  %v6013_v6 = vor.u32 4788187, %v2387_v53 }
 0x394   : > { %v2578_v35 = vadd.s32 536870912, %v2577_v59  ;;  %v6011_v52 = vor.u32 %v2383_v2, %v2382_v41  ;;  %v2485_v38 = vsub.s32 32, %v6003_v61  ;;  %v2291_v1 = vsub.s32 4, %v5767_v37  ;;  %v6017_v21 = vpop.eup %4242 }
 0x395   : > { %v2489_v58 = vsub.s32 4294967266, %v6003_v61  ;;  %v2636_v11 = vsub.s32 32, %v2635_v7  ;;  %v6025_v55 = vadd.s32 %v5967_v19, %v5971_v18  ;;  %v2634_v31 = vshrl.u32 %v2633_v14, 5 }
 0x396   : > { %v6022_v56 = vshrl.u32 %v2578_v35, 30  ;;  %v6027_v27 = vshll.u32 %v2629_v45, 8  ;;  %v6029_v62 = vand.u32 3, %v2090_v16  ;;  %v2638_v9 = vshll.u32 %v6991_v24, %v2635_v7 }
 0x397   : > { %v6031_v17 = vpop.eup %4244  ;;  %v2639_v22 = vshrl.u32 %v7006_v10, %v2636_v11  ;;  %v2641_v47 = vshll.u32 %v7006_v10, %v2635_v7  ;;  %v2642_v18 = vshrl.u32 %v7007_v25, %v2636_v11  ;;  %v2644_v19 = vshll.u32 %v7007_v25, %v2635_v7 }
 0x398   : > { %v2580_v13 = vshll.u32 %v6022_v56, 30  ;;  %v6037_v30 = vpop.eup %4246  ;;  %v2645_v44 = vshrl.u32 %v6985_v4, %v2636_v11  ;;  %v2648_v33 = vshrl.u32 %v6992_v49, %v2636_v11  ;;  %v6043_v2 = vshrl.u32 %v2469_v43, %v2485_v38 }
 0x399   : > { %v2647_v23 = vshll.u32 %v6985_v4, %v2635_v7  ;;  %v2651_v41 = vshrl.u32 %v6994_v12, %v2636_v11  ;;  %v2640_v14 = vor.u32 %v2639_v22, %v2638_v9  ;;  %v2643_v16 = vor.u32 %v2642_v18, %v2641_v47 }
 0x39a   : > { %v6045_v53 = vsub.s32 %v2577_v59, %v2580_v13  ;;  %v4249_v45 = vpop.eup %4248  ;;  %v2646_v35 = vor.u32 %v2645_v44, %v2644_v19  ;;  %v2650_v54 = vshll.u32 %v6992_v49, %v2635_v7  ;;  %v6050_v29 = vadd.s32 127, %v2489_v58 }
 0x39b   : > { %v2649_v57 = vor.u32 %v2648_v33, %v2647_v23  ;;  %v2292_v59 = vsel %vm2207_vm4, %v2291_v1, %v5767_v37  ;;  %vm2656_vm12 = vcmp.lt.s32.totalorder %v2634_v31, 4  ;;  %vm2093_vm6 = vcmp.eq.s32.totalorder %v6029_v62, 0 }
 0x39c   : > { %v2583_v28 = vsub.s32 0, %v6045_v53  ;;  %v2652_v43 = vor.u32 %v2651_v41, %v2650_v54  ;;  %vm2096_vm11 = vcmp.eq.s32.totalorder %v6029_v62, 2  ;;  %v2637_v13 = vshrl.u32 %v6991_v24, %v2636_v11 }
 0x39d   : > { %vm2653_vm8 = vcmp.lt.s32.totalorder %v2634_v31, 1  ;;  %v2658_v7 = vsel %vm2656_vm12, %v2646_v35, 2102212464  ;;  %vm2655_vm7 = vcmp.lt.s32.totalorder %v2634_v31, 3  ;;  %v2662_v9 = vsel %vm2656_vm12, %v2649_v57, 920167782 }
 0x39e   : > { %v3979_v38 = vmin.u32 %v2583_v28, %v6045_v53  ;;  %v2661_v58 = vsel %vm2653_vm8, %v2640_v14, %v2643_v16  ;;  %v2294_v37 = vsel %vm5936_vm9, 0, %v2292_v59  ;;  %vm2654_vm4 = vcmp.lt.s32.totalorder %v2634_v31, 2 }
 0x39f   : > { %v2657_v1 = vsel %vm2653_vm8, %v2637_v13, %v2640_v14  ;;  %v2663_v22 = vsel %vm2655_vm7, %v2646_v35, %v2662_v9  ;;  %v2659_v47 = vsel %vm2655_vm7, %v2643_v16, %v2658_v7  ;;  %v2665_v28 = vsel %vm2653_vm8, %v2643_v16, %v2646_v35 }
 0x3a0   : > { %v2585_v54 = vclz %v3979_v38  ;;  %v2664_v18 = vsel %vm2654_vm4, %v2661_v58, %v2663_v22  ;;  %v2666_v11 = vsel %vm2656_vm12, %v2652_v43, 1326507024  ;;  %vm2089_vm2 = vweird.f32 %v5537_v63 }
 0x3a1   : > { %v2667_v44 = vsel %vm2655_vm7, %v2649_v57, %v2666_v11  ;;  %v6068_v33 = vmul.u32.u64.low %v6027_v27, %v2664_v18  ;;  %v6069_v23 = vmul.u32.u64.high %v6027_v27, %v2664_v18, %v6068_v33  ;;  %v2095_v41 = vsel %vm2093_vm6, %v5952_v15, %v2094_v5 }
 0x3a2   : > { %v3980_v19 = vadd.s32 4294967294, %v2585_v54  ;;  %v2668_v46 = vsel %vm2654_vm4, %v2665_v28, %v2667_v44  ;;  %v7068_v14 = vxor.u32 2147483648, %v5952_v15  ;;  %v2298_v57 = vadd.s32 3, %v2294_v37 }
 0x3a3   : > { %v2660_v35 = vsel %vm2654_vm4, %v2657_v1, %v2659_v47  ;;  %v6085_v59 = vmul.u32.u64.low %v6027_v27, %v2668_v46  ;;  %v6086_v43 = vmul.u32.u64.high %v6027_v27, %v2668_v46, %v6085_v59  ;;  %v2302_v7 = vxor.u32 2147483648, %v4249_v45 }
 0x3a4   : > { %v2098_v16 = vsel %vm2096_vm11, %v7068_v14, %v5955_v3  ;;  %vm3981_vm9 = vcmp.lt.s32.totalorder %v3980_v19, 0  ;;  %v2299_v13 = vand.u32 3, %v2298_v57  ;;  %v2305_v58 = vxor.u32 2147483648, %v6037_v30 }
 0x3a5   : > { %v2588_v38 = vsel %vm3981_vm9, 0, %v3980_v19  ;;  %v2491_v5 = vshll.u32 %v6050_v29, 23  ;;  %v2679_v15 = vadd.s32 1, %v6069_v23  ;;  %vm2092_vm0 = vcmp.lt.s32.totalorder %v6029_v62, 2 }
 0x3a6   : > { %v2593_v9 = vsub.s32 4294967266, %v2588_v38  ;;  %v2589_v3 = vsub.s32 32, %v2588_v38  ;;  %v2676_v31 = vmul.u32 %v6027_v27, %v2660_v35  ;;  %v2099_v37 = vsel %vm2092_vm0, %v2095_v41, %v2098_v16 }
 0x3a7   : > { %vm2300_vm3 = vcmp.lt.s32.totalorder %v2299_v13, 2  ;;  %vm2678_vm14 = vc.u32 %v6086_v43, %v6068_v33  ;;  %vm2301_vm13 = vcmp.eq.s32.totalorder %v2299_v13, 0  ;;  %vm2304_vm10 = vcmp.eq.s32.totalorder %v2299_v13, 2 }
 0x3a8   : > { %v2594_v54 = vadd.s32 127, %v2593_v9  ;;  %v2680_v1 = vsel %vm2678_vm14, %v2679_v15, %v6069_v23  ;;  %v2303_v29 = vsel %vm2301_vm13, %v6037_v30, %v2302_v7  ;;  %v2306_v22 = vsel %vm2304_vm10, %v2305_v58, %v4249_v45 }
 0x3a9   : > { %v7069_v62 = vsel %vm5812_vm5, 0, %v5908_v8  ;;  %v2681_v18 = vadd.s32 %v2680_v1, %v2676_v31  ;;  %v2100_v27 = vsel %vm2089_vm2, nan, %v2099_v37  ;;  %vm2297_vm1 = vweird.f32 %v5559_v0 }
 0x3aa   : > { %v1986_v47 = vadd.s32 3, %v7069_v62  ;;  %v2307_v28 = vsel %vm2300_vm3, %v2303_v29, %v2306_v22  ;;  %v2595_v11 = vshll.u32 %v2594_v54, 23  ;;  %v1990_v23 = vxor.u32 2147483648, %v5949_v48 }
 0x3ab   : > { %v2308_v19 = vsel %vm2297_vm1, nan, %v2307_v28  ;;  %v2190_v30 = vsel %vm5886_vm15, 0, %v5991_v32  ;;  %v2682_v50 = vadd.s32 536870912, %v2681_v18  ;;  %v1993_v8 = vxor.u32 2147483648, %v5927_v36 }
 0x3ac   : > { %v1987_v44 = vand.u32 3, %v1986_v47  ;;  %v4037_v45 = vpack.c.bf16 %v2308_v19, %v2100_v27  ;;  %v2389_v46 = vand.u32 2147483647, %v6013_v6  ;;  %v2391_v63 = vcvt.s32.f32 %v6011_v52 }
 0x3ad   : > { %v7070_v0 = vshll.u32 %v5940_v34, %v6003_v61  ;;  %v2591_v14 = vshrl.u32 %v6025_v55, %v2589_v3  ;;  %v2492_v16 = vor.u32 4788187, %v2491_v5  ;;  %v2590_v57 = vshll.u32 %v6045_v53, %v2588_v38 }
 0x3ae   : > { %v6117_v60 = vshrl.u32 %v2682_v50, 30  ;;  %4038 = vmatprep.subr.bf16.mxu0 %v4037_v45  ;;  %vm1989_vm5 = vcmp.eq.s32.totalorder %v1987_v44, 0  ;;  %v2596_v32 = vor.u32 4788187, %v2595_v11  ;;  %vm1992_vm15 = vcmp.eq.s32.totalorder %v1987_v44, 2 }
 0x3af   : > { %v2488_v41 = vor.u32 %v6043_v2, %v7070_v0  ;;  %v1991_v35 = vsel %vm1989_vm5, %v5927_v36, %v1990_v23  ;;  %v2194_v6 = vadd.s32 3, %v2190_v30  ;;  %v1994_v34 = vsel %vm1992_vm15, %v1993_v8, %v5949_v48 }
 0x3b0   : > { %v2684_v52 = vshll.u32 %v6117_v60, 30  ;;  %v2198_v61 = vxor.u32 2147483648, %v6031_v17  ;;  %v2201_v55 = vxor.u32 2147483648, %v6017_v21  ;;  %v2392_v2 = vmul.f32 %v2391_v63, %v2389_v46 }
 0x3b1   : > { %v2592_v59 = vor.u32 %v2591_v14, %v2590_v57  ;;  %v2195_v53 = vand.u32 3, %v2194_v6  ;;  %v2493_v38 = vand.u32 2147483647, %v2492_v16  ;;  %v2495_v13 = vcvt.s32.f32 %v2488_v41  ;;  %v7080_v6 = vld [vmem:[#allocation7_spill] sm:$0xff] }
 0x3b2   : > { %v2685_v7 = vsub.s32 %v2681_v18, %v2684_v52  ;;  %vm1988_vm12 = vcmp.lt.s32.totalorder %v1987_v44, 2  ;;  %v2597_v58 = vand.u32 2147483647, %v2596_v32  ;;  %vm1985_vm7 = vweird.f32 %v5535_v42 }
 0x3b3   : > { %v1995_v5 = vsel %vm1988_vm12, %v1991_v35, %v1994_v34  ;;  %vm2197_vm6 = vcmp.eq.s32.totalorder %v2195_v53, 0  ;;  %vm2200_vm11 = vcmp.eq.s32.totalorder %v2195_v53, 2  ;;  %vm2196_vm8 = vcmp.lt.s32.totalorder %v2195_v53, 2  ;;  %v7081_v34 = vld [vmem:[#allocation5_spill] sm:$0xff] }
 0x3b4   : > { %v2687_v36 = vsub.s32 0, %v2685_v7  ;;  %v2199_v9 = vsel %vm2197_vm6, %v6017_v21, %v2198_v61  ;;  %v2202_v48 = vsel %vm2200_vm11, %v2201_v55, %v6031_v17  ;;  %v2599_v15 = vcvt.s32.f32 %v2592_v59 }
 0x3b5   : > { %vm2193_vm4 = vweird.f32 %v5545_v51  ;;  %v2203_v3 = vsel %vm2196_vm8, %v2199_v9, %v2202_v48  ;;  %v2496_v31 = vmul.f32 %v2495_v13, %v2493_v38  ;;  %v1996_v54 = vsel %vm1985_vm7, nan, %v1995_v5 }
 0x3b6   : > { %v3983_v37 = vmin.u32 %v2687_v36, %v2685_v7  ;;  %v2204_v1 = vsel %vm2193_vm4, nan, %v2203_v3  ;;  %v2600_v29 = vmul.f32 %v2599_v15, %v2597_v58  ;;  %v2393_v47 = vxor.u32 2147483648, %v2392_v2 }
 0x3b7   : > { %v4039_v22 = vpack.c.bf16 %v2204_v1, %v1996_v54  ;;  %v2497_v18 = vxor.u32 2147483648, %v2496_v31  ;;  %vm2311_vm2 = vcmp.lt.s32.totalorder %v5703_v26, 0  ;;  %vm2415_vm0 = vcmp.lt.s32.totalorder %v5705_v39, 0 }
 0x3b8   : > { %v2689_v62 = vclz %v3983_v37  ;;  %v2601_v21 = vxor.u32 2147483648, %v2600_v29  ;;  %v2394_v42 = vsel %vm2311_vm2, %v2393_v47, %v2392_v2  ;;  %vm2519_vm3 = vcmp.lt.s32.totalorder %v5773_v40, 0 }
 0x3b9   : > { %4040 = vmatpush1.bf16.msra.mxu0 %v4039_v22  ;;  %v2498_v17 = vsel %vm2415_vm0, %v2497_v18, %v2496_v31  ;;  %v2677_v28 = vadd.s32 %v6068_v33, %v6086_v43  ;;  %v7071_v44 = vand.u32 2147483647, %v5703_v26  ;;  %v7074_v30 = vand.u32 2147483647, %v5705_v39 }
 0x3ba   : > { %v3984_v27 = vadd.s32 4294967294, %v2689_v62  ;;  %v2602_v45 = vsel %vm2519_vm3, %v2601_v21, %v2600_v29  ;;  %v7077_v0 = vand.u32 2147483647, %v5773_v40  ;;  %v2603_v32 = vsub.s32 4, %v6022_v56 }
 0x3bb   : > { %vm6139_vm14 = vcmp.le.f32.partialorder %v7071_v44, 0.7853982  ;;  %vm6145_vm13 = vcmp.le.f32.partialorder %v7074_v30, 0.7853982  ;;  %v2499_v52 = vsub.s32 4, %v7080_v6  ;;  %v2395_v61 = vsub.s32 4, %v7081_v34 }
 0x3bc   : > { %vm3985_vm9 = vcmp.lt.s32.totalorder %v3984_v27, 0  ;;  %v2397_v33 = vsel %vm6139_vm14, %v5703_v26, %v2394_v42  ;;  %v2501_v63 = vsel %vm6145_vm13, %v5705_v39, %v2498_v17  ;;  %vm6159_vm10 = vcmp.le.f32.partialorder %v7077_v0, 0.7853982 }
 0x3bd   : > { %v2692_v51 = vsel %vm3985_vm9, 0, %v3984_v27  ;;  %v2605_v14 = vsel %vm6159_vm10, %v5773_v40, %v2602_v45  ;;  %4250 = vcosq.f32 %v2397_v33  ;;  %v2604_v59 = vsel %vm2519_vm3, %v2603_v32, %v6022_v56 }
 0x3be   : > { %v2693_v11 = vsub.s32 32, %v2692_v51  ;;  %v2697_v19 = vsub.s32 4294967266, %v2692_v51  ;;  %v2694_v43 = vshll.u32 %v2685_v7, %v2692_v51  ;;  %4252 = vcosq.f32 %v2501_v63 }
 0x3bf   : > { %4254 = vcosq.f32 %v2605_v14  ;;  %v2707_v38 = vsub.s32 4, %v6117_v60  ;;  %v2500_v13 = vsel %vm2415_vm0, %v2499_v52, %v7080_v6  ;;  %v2396_v7 = vsel %vm2311_vm2, %v2395_v61, %v7081_v34 }
 0x3c0   : > { %v2695_v8 = vshrl.u32 %v2677_v28, %v2693_v11  ;;  %v2698_v46 = vadd.s32 127, %v2697_v19  ;;  %4256 = vsinq.f32 %v2605_v14  ;;  %v2606_v5 = vsel %vm6159_vm10, 0, %v2604_v59 }
 0x3c1   : > { %4258 = vsinq.f32 %v2501_v63  ;;  %vm2623_vm1 = vcmp.lt.s32.totalorder %v5917_v20, 0  ;;  %v7082_v36 = vand.u32 2147483647, %v5917_v20  ;;  %v2502_v48 = vsel %vm6145_vm13, 0, %v2500_v13  ;;  %v2725_v13 = vld [vmem:[%s6904_s5] sm:$0xff] }
 0x3c2   : > { %v2696_v16 = vor.u32 %v2695_v8, %v2694_v43  ;;  %v2699_v57 = vshll.u32 %v2698_v46, 23  ;;  %4260 = vsinq.f32 %v2397_v33  ;;  %v2708_v15 = vsel %vm2623_vm1, %v2707_v38, %v6117_v60 }
 0x3c3   : > { %vm6184_vm5 = vcmp.le.f32.partialorder %v7082_v36, 0.7853982  ;;  %v2398_v31 = vsel %vm6139_vm14, 0, %v2396_v7  ;;  %v2610_v1 = vadd.s32 3, %v2606_v5  ;;  %v2506_v22 = vadd.s32 3, %v2502_v48  ;;  %v2736_v7 = vpop.permute.xlu0 %2735  ;;  %v2741_v48 = vpop.permute.xlu1 %2740 }
 0x3c4   : > { %v2700_v35 = vor.u32 4788187, %v2699_v57  ;;  %v2703_v2 = vcvt.s32.f32 %v2696_v16  ;;  %v2710_v62 = vsel %vm6184_vm5, 0, %v2708_v15  ;;  %v2402_v18 = vadd.s32 3, %v2398_v31 }
 0x3c5   : > { %v2714_v21 = vadd.s32 3, %v2710_v62  ;;  %v2611_v42 = vand.u32 3, %v2610_v1  ;;  %v2507_v51 = vand.u32 3, %v2506_v22  ;;  %vm2609_vm13 = vweird.f32 %v5773_v40  ;;  %v2726_v40 = vld [vmem:[%s6904_s5 + $0x8] sm:$0xff] }
 0x3c6   : > { %v2701_v55 = vand.u32 2147483647, %v2700_v35  ;;  %v2403_v44 = vand.u32 3, %v2402_v18  ;;  %vm2505_vm10 = vweird.f32 %v5705_v39  ;;  %v7085_v39 = vmov 0.0  }
 0x3c7   : > { %v4251_v3 = vpop.eup %4250  ;;  %v2715_v50 = vand.u32 3, %v2714_v21  ;;  %vm2613_vm15 = vcmp.eq.s32.totalorder %v2611_v42, 0  ;;  %vm2616_vm12 = vcmp.eq.s32.totalorder %v2611_v42, 2  ;;  %vm2509_vm6 = vcmp.eq.s32.totalorder %v2507_v51, 0 }
 0x3c8   : > { %v2704_v53 = vmul.f32 %v2703_v2, %v2701_v55  ;;  %v4253_v54 = vpop.eup %4252  ;;  %v2409_v30 = vxor.u32 2147483648, %v4251_v3  ;;  %vm2512_vm11 = vcmp.eq.s32.totalorder %v2507_v51, 2  ;;  %vm2405_vm8 = vcmp.eq.s32.totalorder %v2403_v44, 0 }
 0x3c9   : > { %v4255_v29 = vpop.eup %4254  ;;  %v2513_v19 = vxor.u32 2147483648, %v4253_v54  ;;  %vm2408_vm7 = vcmp.eq.s32.totalorder %v2403_v44, 2  ;;  %vm2612_vm4 = vcmp.lt.s32.totalorder %v2611_v42, 2  ;;  %vm2508_vm2 = vcmp.lt.s32.totalorder %v2507_v51, 2 }
 0x3ca   : > { %v2705_v58 = vxor.u32 2147483648, %v2704_v53  ;;  %v4257_v47 = vpop.eup %4256  ;;  %v2617_v28 = vxor.u32 2147483648, %v4255_v29  ;;  %vm2720_vm9 = vcmp.eq.s32.totalorder %v2715_v50, 2  ;;  %vm2717_vm0 = vcmp.eq.s32.totalorder %v2715_v50, 0 }
 0x3cb   : > { %v4259_v60 = vpop.eup %4258  ;;  %v2614_v17 = vxor.u32 2147483648, %v4257_v47  ;;  %vm2404_vm3 = vcmp.lt.s32.totalorder %v2403_v44, 2  ;;  %vm2716_vm14 = vcmp.lt.s32.totalorder %v2715_v50, 2 }
 0x3cc   : > { %v2706_v9 = vsel %vm2623_vm1, %v2705_v58, %v2704_v53  ;;  %v4261_v27 = vpop.eup %4260  ;;  %v2510_v11 = vxor.u32 2147483648, %v4259_v60  ;;  %v2618_v33 = vsel %vm2616_vm12, %v2617_v28, %v4257_v47  ;;  %v2514_v46 = vsel %vm2512_vm11, %v2513_v19, %v4259_v60 }
 0x3cd   : > { %v2709_v37 = vsel %vm6184_vm5, %v5917_v20, %v2706_v9  ;;  %v2406_v23 = vxor.u32 2147483648, %v4261_v27  ;;  %v2615_v45 = vsel %vm2613_vm15, %v4255_v29, %v2614_v17  ;;  %v2410_v14 = vsel %vm2408_vm7, %v2409_v30, %v4261_v27 }
 0x3ce   : > { %4262 = vcosq.f32 %v2709_v37  ;;  %v2511_v8 = vsel %vm2509_vm6, %v4253_v54, %v2510_v11  ;;  %v2619_v57 = vsel %vm2612_vm4, %v2615_v45, %v2618_v33  ;;  %vm2713_vm1 = vweird.f32 %v5917_v20  ;;  %v2728_v20 = vld [vmem:[%s6904_s5 + $0x18] sm:$0xff] }
 0x3cf   : > { %4264 = vsinq.f32 %v2709_v37  ;;  %v2407_v41 = vsel %vm2405_vm8, %v4251_v3, %v2406_v23  ;;  %v2515_v32 = vsel %vm2508_vm2, %v2511_v8, %v2514_v46  ;;  %v2620_v61 = vsel %vm2609_vm13, nan, %v2619_v57 }
 0x3d0   : > { %v2411_v52 = vsel %vm2404_vm3, %v2407_v41, %v2410_v14  ;;  %v2516_v55 = vsel %vm2505_vm10, nan, %v2515_v32  ;;  %vm2401_vm5 = vweird.f32 %v5703_v26  ;;  %vm2753_vm15 = vcmask 261120   ;;  %v2727_v26 = vld [vmem:[%s6904_s5 + $0x10] sm:$0xff] }
 0x3d1   : > { %v2412_v53 = vsel %vm2401_vm5, nan, %v2411_v52 }
 0x3d2   : > { %v4043_v38 = vpack.c.bf16 %v2620_v61, %v2412_v53 }
 0x3d8   : > { %v4263_v43 = vpop.eup %4262 }
 0x3d9   : > { %v4265_v63 = vpop.eup %4264  ;;  %v2721_v0 = vxor.u32 2147483648, %v4263_v43 }
 0x3da   : > { %v2718_v16 = vxor.u32 2147483648, %v4265_v63 }
 0x3db   : > { %v2722_v35 = vsel %vm2720_vm9, %v2721_v0, %v4265_v63 }
 0x3dc   : > { %v2719_v6 = vsel %vm2717_vm0, %v4263_v43, %v2718_v16 }
 0x3dd   : > { %v2723_v34 = vsel %vm2716_vm14, %v2719_v6, %v2722_v35 }
 0x3de   : > { %v2724_v2 = vsel %vm2713_vm1, nan, %v2723_v34 }
 0x3df   : > { %v4041_v59 = vpack.c.bf16 %v2724_v2, %v2516_v55 }
 0x3e1   : > { %4042 = vmatprep.subr.bf16.mxu0 %v4041_v59 }
 0x3e2   : > { %4044 = vmatpush1.bf16.msra.mxu0 %v4043_v38 }
 0x3e5   : > { %3986 = vmatmul.mubr.msk.f32.vlgmr.msra.gmra.mrb[6].mxu0 %vm2753_vm15, %v2725_v13 }
 0x3e6   : > { %2836 = vmatprep.mubr.f32.mxu0 %v7085_v39 }
 0x3e9   : > { %3987 = vmatmul.mubr.msk.f32.gmra.mrb[8].mxu0 %vm2753_vm15, %v2726_v40 }
 0x3ea   : > { %2842 = vmatprep.mubr.f32.mxu0 %v7085_v39 }
 0x3ed   : > { %3988 = vmatmul.mubr.msk.f32.gmra.mrb[10].mxu0 %vm2753_vm15, %v2727_v26 }
 0x3ee   : > { %2848 = vmatprep.mubr.f32.mxu0 %v7085_v39 }
 0x3f1   : > { %3989 = vmatmul.mubr.msk.f32.gmra.mrb[12].mxu0 %vm2753_vm15, %v2728_v20 }
 0x4b8   : > { %v2832_v58 = vpop.f32.mrb[6].mxu0 }
 0x4b9   : > { %v2833_v5 = vadd.f32 %v2832_v58, %v2736_v7  ;;  %v2834_v36 = vpop.f32.mrb[7].mxu0 }
 0x4ba   : > { %v2835_v56 = vadd.f32 %v2834_v36, %v2736_v7 }
 0x4bb   : > { %v6221_v9 = vmul.f32 30.0, %v2833_v5 }
 0x4bc   : > { %v6223_v15 = vmul.f32 30.0, %v2835_v56  ;;  %v2838_v3 = vpop.f32.mrb[8].mxu0 }
 0x4bd   : > { %v2863_v31 = vand.u32 2147483647, %v6221_v9  ;;  %v2866_v37 = vand.u32 2139095040, %v6221_v9  ;;  %v2839_v54 = vadd.f32 %v2838_v3, %v2741_v48  ;;  %v2840_v1 = vpop.f32.mrb[9].mxu0 }
 0x4be   : > { %v2967_v29 = vand.u32 2147483647, %v6223_v15  ;;  %v2970_v22 = vand.u32 2139095040, %v6223_v15  ;;  %v2841_v44 = vadd.f32 %v2840_v1, %v2741_v48 }
 0x4bf   : > { %v2867_v62 = vshrl.u32 %v2866_v37, 23  ;;  %v2870_v47 = vand.u32 8388607, %v2863_v31  ;;  %v6231_v18 = vmul.f32 30.0, %v2839_v54 }
 0x4c0   : > { %v2971_v60 = vshrl.u32 %v2970_v22, 23  ;;  %v2974_v27 = vand.u32 8388607, %v2967_v29  ;;  %v6235_v42 = vpop.f32.mrb[10].mxu0  ;;  %v6245_v14 = vmul.f32 30.0, %v2841_v44 }
 0x4c1   : > { %v3990_v21 = vadd.s32 4294967169, %v2867_v62  ;;  %v3074_v17 = vand.u32 2139095040, %v6231_v18  ;;  %v6238_v28 = vpop.f32.mrb[11].mxu0  ;;  %v2871_v11 = vor.u32 8388608, %v2870_v47  ;;  %v3071_v50 = vand.u32 2147483647, %v6231_v18 }
 0x4c2   : > { %v3994_v51 = vadd.s32 4294967169, %v2971_v60  ;;  %v2975_v23 = vor.u32 8388608, %v2974_v27 }
 0x4c3   : > { %v2873_v19 = vadd.s32 1, %v3990_v21  ;;  %v3075_v45 = vshrl.u32 %v3074_v17, 23  ;;  %v6247_v16 = vshll.u32 %v2871_v11, 8  ;;  %v6255_v35 = vand.u32 8388607, %v3071_v50 }
 0x4c4   : > { %v2977_v30 = vadd.s32 1, %v3994_v51  ;;  %v6241_v33 = vpop.f32.mrb[12].mxu0  ;;  %v6251_v32 = vshll.u32 %v2975_v23, 8 }
 0x4c5   : > { %vm2874_vm12 = vcmp.gt.s32.totalorder %v2873_v19, 0  ;;  %v6243_v43 = vpop.f32.mrb[13].mxu0  ;;  %v3998_v46 = vadd.s32 4294967169, %v3075_v45 }
 0x4c6   : > { %v2875_v8 = vsel %vm2874_vm12, %v2873_v19, 0  ;;  %vm2978_vm6 = vcmp.gt.s32.totalorder %v2977_v30, 0 }
 0x4c7   : > { %v2876_v63 = vshrl.u32 %v2875_v8, 5  ;;  %v2877_v0 = vand.u32 31, %v2875_v8  ;;  %v2979_v41 = vsel %vm2978_vm6, %v2977_v30, 0  ;;  %v6258_v61 = vadd.s32 1, %v3998_v46 }
 0x4c8   : > { %v6249_v57 = vshrl.u32 %v2979_v41, 5  ;;  %v2981_v34 = vand.u32 31, %v2979_v41 }
 0x4c9   : > { %v2878_v6 = vsub.s32 32, %v2877_v0  ;;  %v2880_v52 = vshll.u32 %v6991_v24, %v2877_v0  ;;  %v2883_v55 = vshll.u32 %v7006_v10, %v2877_v0  ;;  %v2886_v2 = vshll.u32 %v7007_v25, %v2877_v0 }
 0x4ca   : > { %v2889_v59 = vshll.u32 %v6985_v4, %v2877_v0  ;;  %v2892_v53 = vshll.u32 %v6992_v49, %v2877_v0  ;;  %vm2895_vm11 = vcmp.lt.s32.totalorder %v2876_v63, 1  ;;  %vm2896_vm8 = vcmp.lt.s32.totalorder %v2876_v63, 2 }
 0x4cb   : > { %v2881_v38 = vshrl.u32 %v7006_v10, %v2878_v6  ;;  %v2884_v13 = vshrl.u32 %v7007_v25, %v2878_v6  ;;  %v2887_v39 = vshrl.u32 %v6985_v4, %v2878_v6  ;;  %v2879_v40 = vshrl.u32 %v6991_v24, %v2878_v6 }
 0x4cc   : > { %v2890_v26 = vshrl.u32 %v6992_v49, %v2878_v6  ;;  %v2893_v20 = vshrl.u32 %v6994_v12, %v2878_v6  ;;  %v2982_v36 = vsub.s32 32, %v2981_v34  ;;  %vm2897_vm7 = vcmp.lt.s32.totalorder %v2876_v63, 3 }
 0x4cd   : > { %v2882_v7 = vor.u32 %v2881_v38, %v2880_v52  ;;  %v2885_v58 = vor.u32 %v2884_v13, %v2883_v55  ;;  %v2888_v5 = vor.u32 %v2887_v39, %v2886_v2  ;;  %vm2898_vm4 = vcmp.lt.s32.totalorder %v2876_v63, 4 }
 0x4ce   : > { %v2891_v56 = vor.u32 %v2890_v26, %v2889_v59  ;;  %v2894_v48 = vor.u32 %v2893_v20, %v2892_v53  ;;  %v2984_v60 = vshll.u32 %v6991_v24, %v2981_v34  ;;  %v2985_v51 = vshrl.u32 %v7006_v10, %v2982_v36 }
 0x4cf   : > { %v2899_v3 = vsel %vm2895_vm11, %v2879_v40, %v2882_v7  ;;  %v2900_v37 = vsel %vm2898_vm4, %v2888_v5, 2102212464  ;;  %v2903_v54 = vsel %vm2895_vm11, %v2882_v7, %v2885_v58  ;;  %v2907_v1 = vsel %vm2895_vm11, %v2885_v58, %v2888_v5 }
 0x4d0   : > { %v2901_v22 = vsel %vm2897_vm7, %v2885_v58, %v2900_v37  ;;  %v2904_v62 = vsel %vm2898_vm4, %v2891_v56, 920167782  ;;  %v2908_v47 = vsel %vm2898_vm4, %v2894_v48, 1326507024  ;;  %v2987_v17 = vshll.u32 %v7006_v10, %v2981_v34 }
 0x4d1   : > { %v2905_v27 = vsel %vm2897_vm7, %v2888_v5, %v2904_v62  ;;  %v2909_v21 = vsel %vm2897_vm7, %v2891_v56, %v2908_v47  ;;  %v2902_v11 = vsel %vm2896_vm8, %v2899_v3, %v2901_v22  ;;  %v2988_v23 = vshrl.u32 %v7007_v25, %v2982_v36 }
 0x4d2   : > { %v2906_v19 = vsel %vm2896_vm8, %v2903_v54, %v2905_v27  ;;  %v2910_v44 = vsel %vm2896_vm8, %v2907_v1, %v2909_v21  ;;  %v2986_v0 = vor.u32 %v2985_v51, %v2984_v60  ;;  %v2990_v6 = vshll.u32 %v7007_v25, %v2981_v34 }
 0x4d3   : > { %v6281_v30 = vmul.u32.u64.low %v6247_v16, %v2910_v44  ;;  %v6282_v45 = vmul.u32.u64.high %v6247_v16, %v2910_v44, %v6281_v30  ;;  %v6285_v8 = vmul.u32.u64.low %v6247_v16, %v2906_v19  ;;  %v6286_v46 = vmul.u32.u64.high %v6247_v16, %v2906_v19, %v6285_v8 }
 0x4d4   : > { %v2989_v41 = vor.u32 %v2988_v23, %v2987_v17  ;;  %v2991_v52 = vshrl.u32 %v6985_v4, %v2982_v36  ;;  %v2983_v63 = vshrl.u32 %v6991_v24, %v2982_v36  ;;  %v2993_v55 = vshll.u32 %v6985_v4, %v2981_v34 }
 0x4d5   : > { %v2994_v2 = vshrl.u32 %v6992_v49, %v2982_v36  ;;  %v2997_v59 = vshrl.u32 %v6994_v12, %v2982_v36  ;;  %v2918_v53 = vmul.u32 %v6247_v16, %v2902_v11  ;;  %v2996_v13 = vshll.u32 %v6992_v49, %v2981_v34 }
 0x4d6   : > { %v2992_v38 = vor.u32 %v2991_v52, %v2990_v6  ;;  %vm2999_vm2 = vcmp.lt.s32.totalorder %v6249_v57, 1  ;;  %vm2920_vm9 = vc.u32 %v6282_v45, %v6285_v8  ;;  %v2921_v39 = vadd.s32 1, %v6286_v46 }
 0x4d7   : > { %v2995_v40 = vor.u32 %v2994_v2, %v2993_v55  ;;  %vm3000_vm0 = vcmp.lt.s32.totalorder %v6249_v57, 2  ;;  %v2998_v26 = vor.u32 %v2997_v59, %v2996_v13  ;;  %vm3001_vm3 = vcmp.lt.s32.totalorder %v6249_v57, 3 }
 0x4d8   : > { %vm3002_vm14 = vcmp.lt.s32.totalorder %v6249_v57, 4  ;;  %v3007_v20 = vsel %vm2999_vm2, %v2986_v0, %v2989_v41  ;;  %v2922_v16 = vsel %vm2920_vm9, %v2921_v39, %v6286_v46  ;;  %v3011_v58 = vsel %vm2999_vm2, %v2989_v41, %v2992_v38 }
 0x4d9   : > { %v3004_v7 = vsel %vm3002_vm14, %v2992_v38, 2102212464  ;;  %v3008_v34 = vsel %vm3002_vm14, %v2995_v40, 920167782  ;;  %v2923_v5 = vadd.s32 %v2922_v16, %v2918_v53  ;;  %v3003_v36 = vsel %vm2999_vm2, %v2983_v63, %v2986_v0 }
 0x4da   : > { %v3009_v56 = vsel %vm3001_vm3, %v2992_v38, %v3008_v34  ;;  %v3012_v48 = vsel %vm3002_vm14, %v2998_v26, 1326507024  ;;  %v3005_v3 = vsel %vm3001_vm3, %v2989_v41, %v3004_v7  ;;  %vm3082_vm13 = vcmp.gt.s32.totalorder %v6258_v61, 0 }
 0x4db   : > { %v3010_v37 = vsel %vm3000_vm0, %v3007_v20, %v3009_v56  ;;  %v3013_v54 = vsel %vm3001_vm3, %v2995_v40, %v3012_v48  ;;  %v2924_v1 = vadd.s32 536870912, %v2923_v5  ;;  %v3083_v21 = vsel %vm3082_vm13, %v6258_v61, 0 }
 0x4dc   : > { %v3014_v22 = vsel %vm3000_vm0, %v3011_v58, %v3013_v54  ;;  %v6311_v62 = vmul.u32.u64.low %v6251_v32, %v3010_v37  ;;  %v6312_v47 = vmul.u32.u64.high %v6251_v32, %v3010_v37, %v6311_v62  ;;  %v3178_v51 = vand.u32 2139095040, %v6245_v14 }
 0x4dd   : > { %v6316_v60 = vmul.u32.u64.low %v6251_v32, %v3014_v22  ;;  %v6317_v27 = vmul.u32.u64.high %v6251_v32, %v3014_v22, %v6316_v60  ;;  %v6321_v17 = vshrl.u32 %v2924_v1, 30  ;;  %v3006_v11 = vsel %vm3000_vm0, %v3003_v36, %v3005_v3 }
 0x4de   : > { %v3085_v19 = vand.u32 31, %v3083_v21  ;;  %v3025_v23 = vadd.s32 1, %v6312_v47  ;;  %v3022_v46 = vmul.u32 %v6251_v32, %v3006_v11  ;;  %v3079_v61 = vor.u32 8388608, %v6255_v35 }
 0x4df   : > { %v2926_v44 = vshll.u32 %v6321_v17, 30  ;;  %vm3024_vm10 = vc.u32 %v6317_v27, %v6311_v62  ;;  %v3179_v0 = vshrl.u32 %v3178_v51, 23  ;;  %v3084_v57 = vshrl.u32 %v3083_v21, 5 }
 0x4e0   : > { %v3086_v30 = vsub.s32 32, %v3085_v19  ;;  %v3026_v6 = vsel %vm3024_vm10, %v3025_v23, %v6312_v47  ;;  %v3088_v52 = vshll.u32 %v6991_v24, %v3085_v19  ;;  %v3091_v2 = vshll.u32 %v7006_v10, %v3085_v19 }
 0x4e1   : > { %v6331_v41 = vsub.s32 %v2923_v5, %v2926_v44  ;;  %v3027_v63 = vadd.s32 %v3026_v6, %v3022_v46  ;;  %v3094_v53 = vshll.u32 %v7007_v25, %v3085_v19  ;;  %v3097_v38 = vshll.u32 %v6985_v4, %v3085_v19 }
 0x4e2   : > { %v3089_v55 = vshrl.u32 %v7006_v10, %v3086_v30  ;;  %v3092_v32 = vshrl.u32 %v7007_v25, %v3086_v30  ;;  %v3095_v35 = vshrl.u32 %v6985_v4, %v3086_v30  ;;  %v3098_v26 = vshrl.u32 %v6992_v49, %v3086_v30 }
 0x4e3   : > { %v2929_v59 = vsub.s32 0, %v6331_v41  ;;  %v3028_v13 = vadd.s32 536870912, %v3027_v63  ;;  %v3100_v7 = vshll.u32 %v6992_v49, %v3085_v19  ;;  %v3101_v34 = vshrl.u32 %v6994_v12, %v3086_v30 }
 0x4e4   : > { %v3090_v39 = vor.u32 %v3089_v55, %v3088_v52  ;;  %v3093_v40 = vor.u32 %v3092_v32, %v3091_v2  ;;  %v3096_v16 = vor.u32 %v3095_v35, %v3094_v53  ;;  %v3099_v5 = vor.u32 %v3098_v26, %v3097_v38 }
 0x4e5   : > { %v3991_v20 = vmin.u32 %v2929_v59, %v6331_v41  ;;  %v6346_v58 = vshrl.u32 %v3028_v13, 30  ;;  %v3175_v36 = vand.u32 2147483647, %v6245_v14  ;;  %v3102_v48 = vor.u32 %v3101_v34, %v3100_v7 }
 0x4e6   : > { %v3119_v3 = vshll.u32 %v3079_v61, 8  ;;  %v4002_v37 = vadd.s32 4294967169, %v3179_v0  ;;  %vm3103_vm1 = vcmp.lt.s32.totalorder %v3084_v57, 1  ;;  %vm3105_vm5 = vcmp.lt.s32.totalorder %v3084_v57, 3 }
 0x4e7   : > { %v2931_v56 = vclz %v3991_v20  ;;  %v3030_v54 = vshll.u32 %v6346_v58, 30  ;;  %vm3106_vm12 = vcmp.lt.s32.totalorder %v3084_v57, 4  ;;  %v3111_v22 = vsel %vm3103_vm1, %v3090_v39, %v3093_v40 }
 0x4e8   : > { %v3112_v47 = vsel %vm3106_vm12, %v3099_v5, 920167782  ;;  %v3115_v60 = vsel %vm3103_vm1, %v3093_v40, %v3096_v16  ;;  %v3108_v51 = vsel %vm3106_vm12, %v3096_v16, 2102212464  ;;  %v3116_v19 = vsel %vm3106_vm12, %v3102_v48, 1326507024 }
 0x4e9   : > { %v3992_v1 = vadd.s32 4294967294, %v2931_v56  ;;  %v6352_v21 = vsub.s32 %v3027_v63, %v3030_v54  ;;  %v3113_v11 = vsel %vm3105_vm5, %v3096_v16, %v3112_v47  ;;  %v3087_v44 = vshrl.u32 %v6991_v24, %v3086_v30  ;;  %v2746_v16 = vpop.permute.xlu0 %2745 }
 0x4ea   : > { %vm3104_vm11 = vcmp.lt.s32.totalorder %v3084_v57, 2  ;;  %v3117_v23 = vsel %vm3105_vm5, %v3099_v5, %v3116_v19  ;;  %v3185_v6 = vadd.s32 1, %v4002_v37  ;;  %v3109_v55 = vsel %vm3105_vm5, %v3093_v40, %v3108_v51 }
 0x4eb   : > { %vm3993_vm6 = vcmp.lt.s32.totalorder %v3992_v1, 0  ;;  %v3033_v46 = vsub.s32 0, %v6352_v21  ;;  %v3114_v61 = vsel %vm3104_vm11, %v3111_v22, %v3113_v11  ;;  %v3118_v0 = vsel %vm3104_vm11, %v3115_v60, %v3117_v23 }
 0x4ec   : > { %v2934_v52 = vsel %vm3993_vm6, 0, %v3992_v1  ;;  %v3107_v63 = vsel %vm3103_vm1, %v3087_v44, %v3090_v39  ;;  %v6363_v32 = vmul.u32.u64.low %v3119_v3, %v3118_v0  ;;  %v6364_v59 = vmul.u32.u64.high %v3119_v3, %v3118_v0, %v6363_v32 }
 0x4ed   : > { %v3995_v2 = vmin.u32 %v3033_v46, %v6352_v21  ;;  %vm3186_vm8 = vcmp.gt.s32.totalorder %v3185_v6, 0  ;;  %v6366_v30 = vmul.u32.u64.low %v3119_v3, %v3114_v61  ;;  %v6367_v53 = vmul.u32.u64.high %v3119_v3, %v3114_v61, %v6366_v30 }
 0x4ee   : > { %v3182_v35 = vand.u32 8388607, %v3175_v36  ;;  %v2935_v38 = vsub.s32 32, %v2934_v52  ;;  %v3187_v26 = vsel %vm3186_vm8, %v3185_v6, 0  ;;  %v2939_v20 = vsub.s32 4294967266, %v2934_v52 }
 0x4ef   : > { %v3035_v13 = vclz %v3995_v2  ;;  %v3110_v39 = vsel %vm3104_vm11, %v3107_v63, %v3109_v55  ;;  %v3189_v40 = vand.u32 31, %v3187_v26  ;;  %v2919_v7 = vadd.s32 %v6285_v8, %v6282_v45 }
 0x4f0   : > { %vm3128_vm7 = vc.u32 %v6364_v59, %v6366_v30  ;;  %v3129_v5 = vadd.s32 1, %v6367_v53  ;;  %v3183_v56 = vor.u32 8388608, %v3182_v35  ;;  %v2845_v48 = vadd.f32 %v6235_v42, %v2746_v16 }
 0x4f1   : > { %v3996_v34 = vadd.s32 4294967294, %v3035_v13  ;;  %v2937_v37 = vshrl.u32 %v2919_v7, %v2935_v38  ;;  %v3126_v54 = vmul.u32 %v3119_v3, %v3110_v39  ;;  %v2847_v57 = vadd.f32 %v6238_v28, %v2746_v16 }
 0x4f2   : > { %v2940_v1 = vadd.s32 127, %v2939_v20  ;;  %v3130_v47 = vsel %vm3128_vm7, %v3129_v5, %v6367_v53  ;;  %v3190_v45 = vsub.s32 32, %v3189_v40  ;;  %v2936_v60 = vshll.u32 %v6331_v41, %v2934_v52 }
 0x4f3   : > { %vm3997_vm4 = vcmp.lt.s32.totalorder %v3996_v34, 0  ;;  %v3131_v8 = vadd.s32 %v3130_v47, %v3126_v54  ;;  %v3023_v51 = vadd.s32 %v6311_v62, %v6317_v27  ;;  %v6386_v11 = vshll.u32 %v3183_v56, 8 }
 0x4f4   : > { %v6380_v22 = vsel %vm3997_vm4, 0, %v3996_v34  ;;  %v6389_v3 = vmul.f32 30.0, %v2845_v48  ;;  %v6391_v28 = vmul.f32 30.0, %v2847_v57  ;;  %v2938_v44 = vor.u32 %v2937_v37, %v2936_v60 }
 0x4f5   : > { %v3043_v42 = vsub.s32 4294967266, %v6380_v22  ;;  %v3132_v19 = vadd.s32 536870912, %v3131_v8  ;;  %v2941_v23 = vshll.u32 %v2940_v1, 23  ;;  %v3193_v46 = vshrl.u32 %v7006_v10, %v3190_v45 }
 0x4f6   : > { %v3196_v61 = vshrl.u32 %v7007_v25, %v3190_v45  ;;  %v3192_v41 = vshll.u32 %v6991_v24, %v3189_v40  ;;  %v3199_v62 = vshrl.u32 %v6985_v4, %v3190_v45  ;;  %v3202_v27 = vshrl.u32 %v6992_v49, %v3190_v45 }
 0x4f7   : > { %v6395_v0 = vshrl.u32 %v3132_v19, 30  ;;  %v3039_v6 = vsub.s32 32, %v6380_v22  ;;  %v3195_v52 = vshll.u32 %v7006_v10, %v3189_v40  ;;  %v3201_v63 = vshll.u32 %v6985_v4, %v3189_v40 }
 0x4f8   : > { %v3205_v55 = vshrl.u32 %v6994_v12, %v3190_v45  ;;  %v3044_v2 = vadd.s32 127, %v3043_v42  ;;  %v3188_v53 = vshrl.u32 %v3187_v26, 5  ;;  %v3198_v35 = vshll.u32 %v7007_v25, %v3189_v40 }
 0x4f9   : > { %v3134_v32 = vshll.u32 %v6395_v0, 30  ;;  %v3194_v38 = vor.u32 %v3193_v46, %v3192_v41  ;;  %v3197_v13 = vor.u32 %v3196_v61, %v3195_v52  ;;  %v3203_v20 = vor.u32 %v3202_v27, %v3201_v63 }
 0x4fa   : > { %v3204_v39 = vshll.u32 %v6992_v49, %v3189_v40  ;;  %v2942_v16 = vor.u32 4788187, %v2941_v23  ;;  %v3200_v34 = vor.u32 %v3199_v62, %v3198_v35  ;;  %v6968_v5 = vand.u32 2147483647, %v6389_v3 }
 0x4fb   : > { %v6407_v7 = vsub.s32 %v3131_v8, %v3134_v32  ;;  %v2945_v56 = vcvt.s32.f32 %v2938_v44  ;;  %v3041_v48 = vshrl.u32 %v3023_v51, %v3039_v6  ;;  %v3191_v37 = vshrl.u32 %v6991_v24, %v3190_v45 }
 0x4fc   : > { %v3206_v54 = vor.u32 %v3205_v55, %v3204_v39  ;;  %v3045_v57 = vshll.u32 %v3044_v2, 23  ;;  %vm3207_vm2 = vcmp.lt.s32.totalorder %v3188_v53, 1  ;;  %vm3210_vm9 = vcmp.lt.s32.totalorder %v3188_v53, 4 }
 0x4fd   : > { %v3137_v26 = vsub.s32 0, %v6407_v7  ;;  %vm3208_vm0 = vcmp.lt.s32.totalorder %v3188_v53, 2  ;;  %vm3209_vm3 = vcmp.lt.s32.totalorder %v3188_v53, 3  ;;  %v3215_v40 = vsel %vm3207_vm2, %v3194_v38, %v3197_v13 }
 0x4fe   : > { %v3216_v1 = vsel %vm3210_vm9, %v3203_v20, 920167782  ;;  %v3212_v8 = vsel %vm3210_vm9, %v3200_v34, 2102212464  ;;  %v3219_v42 = vsel %vm3207_vm2, %v3197_v13, %v3200_v34  ;;  %v2943_v51 = vand.u32 2147483647, %v2942_v16 }
 0x4ff   : > { %v3999_v47 = vmin.u32 %v3137_v26, %v6407_v7  ;;  %v3217_v60 = vsel %vm3209_vm3, %v3200_v34, %v3216_v1  ;;  %v3040_v45 = vshll.u32 %v6352_v21, %v6380_v22  ;;  %v3220_v44 = vsel %vm3210_vm9, %v3206_v54, 1326507024  ;;  %v6439_v26 = vpop.permute.xlu1 %2750 }
 0x500   : > { %v3218_v19 = vsel %vm3208_vm0, %v3215_v40, %v3217_v60  ;;  %v3046_v23 = vor.u32 4788187, %v3045_v57  ;;  %v3211_v61 = vsel %vm3207_vm2, %v3191_v37, %v3194_v38  ;;  %v3221_v41 = vsel %vm3209_vm3, %v3203_v20, %v3220_v44 }
 0x501   : > { %v3139_v46 = vclz %v3999_v47  ;;  %v3213_v62 = vsel %vm3209_vm3, %v3197_v13, %v3212_v8  ;;  %v3222_v27 = vsel %vm3208_vm0, %v3219_v42, %v3221_v41  ;;  %v3042_v63 = vor.u32 %v3041_v48, %v3040_v45 }
 0x502   : > { %v6421_v6 = vmul.u32.u64.low %v6386_v11, %v3218_v19  ;;  %v6422_v52 = vmul.u32.u64.high %v6386_v11, %v3218_v19, %v6421_v6  ;;  %v6426_v21 = vmul.u32.u64.low %v6386_v11, %v3222_v27  ;;  %v6427_v22 = vmul.u32.u64.high %v6386_v11, %v3222_v27, %v6426_v21 }
 0x503   : > { %v4000_v55 = vadd.s32 4294967294, %v3139_v46  ;;  %v3282_v2 = vand.u32 2139095040, %v6389_v3  ;;  %v2946_v32 = vmul.f32 %v2945_v56, %v2943_v51  ;;  %v3214_v35 = vsel %vm3208_vm0, %v3211_v61, %v3213_v62 }
 0x504   : > { %v3386_v38 = vand.u32 2139095040, %v6391_v28  ;;  %v3047_v13 = vand.u32 2147483647, %v3046_v23  ;;  %v3233_v20 = vadd.s32 1, %v6422_v52  ;;  %v3049_v16 = vcvt.s32.f32 %v3042_v63 }
 0x505   : > { %vm4001_vm14 = vcmp.lt.s32.totalorder %v4000_v55, 0  ;;  %v3283_v39 = vshrl.u32 %v3282_v2, 23  ;;  %v3286_v34 = vand.u32 8388607, %v6968_v5  ;;  %v3230_v37 = vmul.u32 %v6386_v11, %v3214_v35 }
 0x506   : > { %v3142_v48 = vsel %vm4001_vm14, 0, %v4000_v55  ;;  %vm3232_vm13 = vc.u32 %v6427_v22, %v6421_v6  ;;  %v2947_v54 = vxor.u32 2147483648, %v2946_v32  ;;  %v3387_v57 = vshrl.u32 %v3386_v38, 23 }
 0x507   : > { %v4006_v56 = vadd.s32 4294967169, %v3283_v39  ;;  %v3234_v53 = vsel %vm3232_vm13, %v3233_v20, %v6422_v52  ;;  %v6441_v40 = vmul.f32 %v3049_v16, %v3047_v13  ;;  %vm2865_vm10 = vcmp.lt.s32.totalorder %v6221_v9, 0 }
 0x508   : > { %v3235_v1 = vadd.s32 %v3234_v53, %v3230_v37  ;;  %v3143_v8 = vsub.s32 32, %v3142_v48  ;;  %v3287_v60 = vor.u32 8388608, %v3286_v34  ;;  %v2851_v11 = vadd.f32 %v6241_v33, %v6439_v26 }
 0x509   : > { %v3289_v47 = vadd.s32 1, %v4006_v56  ;;  %v3147_v42 = vsub.s32 4294967266, %v3142_v48  ;;  %v4010_v45 = vadd.s32 4294967169, %v3387_v57  ;;  %v6448_v19 = vsel %vm2865_vm10, %v2947_v54, %v2946_v32 }
 0x50a   : > { %v3236_v51 = vadd.s32 536870912, %v3235_v1  ;;  %v3127_v44 = vadd.s32 %v6366_v30, %v6364_v59  ;;  %v3051_v46 = vxor.u32 2147483648, %v6441_v40  ;;  %v6967_v62 = vand.u32 2147483647, %v6391_v28 }
 0x50b   : > { %vm3290_vm1 = vcmp.gt.s32.totalorder %v3289_v47, 0  ;;  %v3144_v33 = vshll.u32 %v6407_v7, %v3142_v48  ;;  %v6457_v52 = vshll.u32 %v3287_v60, 8  ;;  %v6459_v63 = vmul.f32 30.0, %v2851_v11 }
 0x50c   : > { %v3291_v23 = vsel %vm3290_vm1, %v3289_v47, 0  ;;  %v6453_v61 = vshrl.u32 %v3236_v51, 30  ;;  %v3145_v27 = vshrl.u32 %v3127_v44, %v3143_v8  ;;  %v3148_v55 = vadd.s32 127, %v3147_v42 }
 0x50d   : > { %v3293_v41 = vand.u32 31, %v3291_v23  ;;  %v3393_v59 = vadd.s32 1, %v4010_v45  ;;  %v3292_v30 = vshrl.u32 %v3291_v23, 5  ;;  %v6477_v57 = vand.u32 8388607, %v6967_v62 }
 0x50e   : > { %v3238_v21 = vshll.u32 %v6453_v61, 30  ;;  %vm2969_vm5 = vcmp.lt.s32.totalorder %v6223_v15, 0  ;;  %v3149_v11 = vshll.u32 %v3148_v55, 23  ;;  %vm6498_vm2 = vcmp.le.f32.partialorder %v2863_v31, 0.7853982 }
 0x50f   : > { %v3294_v2 = vsub.s32 32, %v3293_v41  ;;  %v3296_v32 = vshll.u32 %v6991_v24, %v3293_v41  ;;  %v3299_v35 = vshll.u32 %v7006_v10, %v3293_v41  ;;  %v3302_v38 = vshll.u32 %v7007_v25, %v3293_v41 }
 0x510   : > { %v6465_v13 = vsub.s32 %v3235_v1, %v3238_v21  ;;  %v3305_v39 = vshll.u32 %v6985_v4, %v3293_v41  ;;  %v3308_v48 = vshll.u32 %v6992_v49, %v3293_v41  ;;  %v6480_v1 = vor.u32 %v3145_v27, %v3144_v33 }
 0x511   : > { %v3297_v7 = vshrl.u32 %v7006_v10, %v3294_v2  ;;  %v3300_v20 = vshrl.u32 %v7007_v25, %v3294_v2  ;;  %v3303_v16 = vshrl.u32 %v6985_v4, %v3294_v2  ;;  %v3306_v34 = vshrl.u32 %v6992_v49, %v3294_v2 }
 0x512   : > { %v3309_v37 = vshrl.u32 %v6994_v12, %v3294_v2  ;;  %v3241_v56 = vsub.s32 0, %v6465_v13  ;;  %vm3311_vm12 = vcmp.lt.s32.totalorder %v3292_v30, 1  ;;  %vm3394_vm6 = vcmp.gt.s32.totalorder %v3393_v59, 0 }
 0x513   : > { %v3298_v54 = vor.u32 %v3297_v7, %v3296_v32  ;;  %v3301_v53 = vor.u32 %v3300_v20, %v3299_v35  ;;  %v3304_v47 = vor.u32 %v3303_v16, %v3302_v38  ;;  %v3307_v8 = vor.u32 %v3306_v34, %v3305_v39 }
 0x514   : > { %v3310_v60 = vor.u32 %v3309_v37, %v3308_v48  ;;  %v4003_v42 = vmin.u32 %v3241_v56, %v6465_v13  ;;  %v3295_v51 = vshrl.u32 %v6991_v24, %v3294_v2  ;;  %vm3312_vm11 = vcmp.lt.s32.totalorder %v3292_v30, 2 }
 0x515   : > { %vm3314_vm8 = vcmp.lt.s32.totalorder %v3292_v30, 4  ;;  %v3319_v45 = vsel %vm3311_vm12, %v3298_v54, %v3301_v53  ;;  %vm3313_vm7 = vcmp.lt.s32.totalorder %v3292_v30, 3  ;;  %v3323_v27 = vsel %vm3311_vm12, %v3301_v53, %v3304_v47 }
 0x516   : > { %v3243_v44 = vclz %v4003_v42  ;;  %v3316_v23 = vsel %vm3314_vm8, %v3304_v47, 2102212464  ;;  %v3320_v41 = vsel %vm3314_vm8, %v3307_v8, 920167782  ;;  %v3315_v21 = vsel %vm3311_vm12, %v3295_v51, %v3298_v54 }
 0x517   : > { %v3321_v33 = vsel %vm3313_vm7, %v3304_v47, %v3320_v41  ;;  %v3324_v32 = vsel %vm3314_vm8, %v3310_v60, 1326507024  ;;  %v3317_v38 = vsel %vm3313_vm7, %v3301_v53, %v3316_v23  ;;  %v3150_v20 = vor.u32 4788187, %v3149_v11 }
 0x518   : > { %v4004_v35 = vadd.s32 4294967294, %v3243_v44  ;;  %v3322_v55 = vsel %vm3312_vm11, %v3319_v45, %v3321_v33  ;;  %v3325_v7 = vsel %vm3313_vm7, %v3307_v8, %v3324_v32  ;;  %v3395_v37 = vsel %vm3394_vm6, %v3393_v59, 0 }
 0x519   : > { %v3326_v39 = vsel %vm3312_vm11, %v3323_v27, %v3325_v7  ;;  %v6487_v2 = vmul.u32.u64.low %v6457_v52, %v3322_v55  ;;  %v6488_v16 = vmul.u32.u64.high %v6457_v52, %v3322_v55, %v6487_v2  ;;  %v3318_v53 = vsel %vm3312_vm11, %v3315_v21, %v3317_v38 }
 0x51a   : > { %vm4005_vm4 = vcmp.lt.s32.totalorder %v4004_v35, 0  ;;  %v6492_v34 = vmul.u32.u64.low %v6457_v52, %v3326_v39  ;;  %v6493_v48 = vmul.u32.u64.high %v6457_v52, %v3326_v39, %v6492_v34  ;;  %v3397_v47 = vand.u32 31, %v3395_v37 }
 0x51b   : > { %v6502_v54 = vsel %vm4005_vm4, 0, %v4004_v35  ;;  %v6509_v8 = vsel %vm6498_vm2, %v6221_v9, %v6448_v19  ;;  %v6516_v31 = vsel %vm2969_vm5, %v3051_v46, %v6441_v40  ;;  %v3231_v59 = vadd.s32 %v6421_v6, %v6427_v22 }
 0x51c   : > { %v3251_v30 = vsub.s32 4294967266, %v6502_v54  ;;  %v3337_v60 = vadd.s32 1, %v6488_v16  ;;  %v3391_v11 = vor.u32 8388608, %v6477_v57  ;;  %v3398_v42 = vsub.s32 32, %v3397_v47 }
 0x51d   : > { %v6966_v19 = vand.u32 2147483647, %v6459_v63  ;;  %v3151_v51 = vand.u32 2147483647, %v3150_v20  ;;  %v3153_v45 = vcvt.s32.f32 %v6480_v1  ;;  %v3334_v44 = vmul.u32 %v6457_v52, %v3318_v53 }
 0x51e   : > { %vm3336_vm9 = vc.u32 %v6493_v48, %v6487_v2  ;;  %v3401_v6 = vshrl.u32 %v7006_v10, %v3398_v42  ;;  %v3404_v22 = vshrl.u32 %v7007_v25, %v3398_v42  ;;  %v3490_v46 = vand.u32 2139095040, %v6459_v63 }
 0x51f   : > { %v3338_v40 = vsel %vm3336_vm9, %v3337_v60, %v6488_v16  ;;  %v3252_v57 = vadd.s32 127, %v3251_v30  ;;  %v3396_v41 = vshrl.u32 %v3395_v37, 5  ;;  %v3400_v21 = vshll.u32 %v6991_v24, %v3397_v47 }
 0x520   : > { %v3339_v23 = vadd.s32 %v3338_v40, %v3334_v44  ;;  %v3247_v1 = vsub.s32 32, %v6502_v54  ;;  %v3403_v52 = vshll.u32 %v7006_v10, %v3397_v47  ;;  %v3406_v33 = vshll.u32 %v7007_v25, %v3397_v47 }
 0x521   : > { %v3407_v27 = vshrl.u32 %v6985_v4, %v3398_v42  ;;  %v3402_v35 = vor.u32 %v3401_v6, %v3400_v21  ;;  %v3409_v38 = vshll.u32 %v6985_v4, %v3397_v47  ;;  %v3410_v55 = vshrl.u32 %v6992_v49, %v3398_v42 }
 0x522   : > { %v3340_v32 = vadd.s32 536870912, %v3339_v23  ;;  %v3405_v7 = vor.u32 %v3404_v22, %v3403_v52  ;;  %v3412_v39 = vshll.u32 %v6992_v49, %v3397_v47  ;;  %v3413_v16 = vshrl.u32 %v6994_v12, %v3398_v42 }
 0x523   : > { %v3408_v20 = vor.u32 %v3407_v27, %v3406_v33  ;;  %v3253_v34 = vshll.u32 %v3252_v57, 23  ;;  %v3411_v53 = vor.u32 %v3410_v55, %v3409_v38  ;;  %v3431_v30 = vshll.u32 %v3391_v11, 8 }
 0x524   : > { %v6541_v37 = vshrl.u32 %v3340_v32, 30  ;;  %v3154_v60 = vmul.f32 %v3153_v45, %v3151_v51  ;;  %v3248_v44 = vshll.u32 %v6465_v13, %v6502_v54  ;;  %v3414_v40 = vor.u32 %v3413_v16, %v3412_v39 }
 0x525   : > { %v3491_v6 = vshrl.u32 %v3490_v46, 23  ;;  %vm6547_vm0 = vcmp.le.f32.partialorder %v2967_v29, 0.7853982  ;;  %v3249_v47 = vshrl.u32 %v3231_v59, %v3247_v1  ;;  %vm3415_vm3 = vcmp.lt.s32.totalorder %v3396_v41, 1 }
 0x526   : > { %7088 = vst [vmem:[#allocation4_spill] sm:$0xff] %v6541_v37  ;;  %v3342_v21 = vshll.u32 %v6541_v37, 30  ;;  %vm3418_vm14 = vcmp.lt.s32.totalorder %v3396_v41, 4  ;;  %v3399_v57 = vshrl.u32 %v6991_v24, %v3398_v42  ;;  %v3423_v51 = vsel %vm3415_vm3, %v3402_v35, %v3405_v7 }
 0x527   : > { %v3420_v11 = vsel %vm3418_vm14, %v3408_v20, 2102212464  ;;  %v3424_v45 = vsel %vm3418_vm14, %v3411_v53, 920167782  ;;  %v3254_v52 = vor.u32 4788187, %v3253_v34  ;;  %v3427_v54 = vsel %vm3415_vm3, %v3405_v7, %v3408_v20 }
 0x528   : > { %v6553_v13 = vsub.s32 %v3339_v23, %v3342_v21  ;;  %vm3417_vm13 = vcmp.lt.s32.totalorder %v3396_v41, 3  ;;  %vm3416_vm1 = vcmp.lt.s32.totalorder %v3396_v41, 2  ;;  %v3419_v29 = vsel %vm3415_vm3, %v3399_v57, %v3402_v35 }
 0x529   : > { %v3425_v46 = vsel %vm3417_vm13, %v3408_v20, %v3424_v45  ;;  %v3428_v33 = vsel %vm3418_vm14, %v3414_v40, 1326507024  ;;  %v3421_v1 = vsel %vm3417_vm13, %v3405_v7, %v3420_v11  ;;  %v3250_v38 = vor.u32 %v3249_v47, %v3248_v44 }
 0x52a   : > { %v3345_v59 = vsub.s32 0, %v6553_v13  ;;  %v3426_v27 = vsel %vm3416_vm1, %v3423_v51, %v3425_v46  ;;  %v3429_v32 = vsel %vm3417_vm13, %v3411_v53, %v3428_v33  ;;  %v3155_v23 = vxor.u32 2147483648, %v3154_v60 }
 0x52b   : > { %v3430_v42 = vsel %vm3416_vm1, %v3427_v54, %v3429_v32  ;;  %v6558_v55 = vmul.u32.u64.low %v3431_v30, %v3426_v27  ;;  %v6559_v39 = vmul.u32.u64.high %v3431_v30, %v3426_v27, %v6558_v55  ;;  %vm3073_vm12 = vcmp.lt.s32.totalorder %v6231_v18, 0 }
 0x52c   : > { %v4007_v16 = vmin.u32 %v3345_v59, %v6553_v13  ;;  %v6563_v34 = vmul.u32.u64.low %v3431_v30, %v3430_v42  ;;  %v6564_v35 = vmul.u32.u64.high %v3431_v30, %v3430_v42, %v6563_v34  ;;  %v3255_v20 = vand.u32 2147483647, %v3254_v52 }
 0x52d   : > { %v3422_v7 = vsel %vm3416_vm1, %v3419_v29, %v3421_v1  ;;  %v4014_v40 = vadd.s32 4294967169, %v3491_v6  ;;  %v2949_v53 = vsub.s32 4, %v6321_v17  ;;  %4266 = vcosq.f32 %v6509_v8 }
 0x52e   : > { %vm6572_vm6 = vcmp.le.f32.partialorder %v3071_v50, 0.7853982  ;;  %v3347_v47 = vclz %v4007_v16  ;;  %v3055_v21 = vsel %vm6547_vm0, %v6223_v15, %v6516_v31  ;;  %v3257_v57 = vcvt.s32.f32 %v3250_v38 }
 0x52f   : > { %v3441_v41 = vadd.s32 1, %v6559_v39  ;;  %v3497_v6 = vadd.s32 1, %v4014_v40  ;;  %v3156_v11 = vsel %vm3073_vm12, %v3155_v23, %v3154_v60  ;;  %v3438_v51 = vmul.u32 %v3431_v30, %v3422_v7 }
 0x530   : > { %vm3440_vm11 = vc.u32 %v6564_v35, %v6558_v55  ;;  %v3494_v50 = vand.u32 8388607, %v6966_v19  ;;  %v3258_v45 = vmul.f32 %v3257_v57, %v3255_v20  ;;  %v2853_v31 = vadd.f32 %v6243_v43, %v6439_v26 }
 0x531   : > { %v3442_v52 = vsel %vm3440_vm11, %v3441_v41, %v6559_v39  ;;  %vm3498_vm8 = vcmp.gt.s32.totalorder %v3497_v6, 0  ;;  %4268 = vsinq.f32 %v6509_v8  ;;  %v4008_v54 = vadd.s32 4294967294, %v3347_v47 }
 0x532   : > { %v3443_v29 = vadd.s32 %v3442_v52, %v3438_v51  ;;  %v3499_v46 = vsel %vm3498_vm8, %v3497_v6, 0  ;;  %v6594_v30 = vsel %vm2865_vm10, %v2949_v53, %v6321_v17  ;;  %4270 = vcosq.f32 %v3055_v21 }
 0x533   : > { %vm3177_vm7 = vcmp.lt.s32.totalorder %v6245_v14, 0  ;;  %v3501_v60 = vand.u32 31, %v3499_v46  ;;  %4272 = vsinq.f32 %v3055_v21  ;;  %v6601_v43 = vsel %vm6572_vm6, %v6231_v18, %v3156_v11 }
 0x534   : > { %v3444_v26 = vadd.s32 536870912, %v3443_v29  ;;  %v3259_v8 = vxor.u32 2147483648, %v3258_v45  ;;  %v3495_v59 = vor.u32 8388608, %v3494_v50  ;;  %v6603_v27 = vmul.f32 30.0, %v2853_v31 }
 0x535   : > { %v3502_v1 = vsub.s32 32, %v3501_v60  ;;  %vm4009_vm10 = vcmp.lt.s32.totalorder %v4008_v54, 0  ;;  %v3504_v32 = vshll.u32 %v6991_v24, %v3501_v60  ;;  %v3507_v38 = vshll.u32 %v7006_v10, %v3501_v60 }
 0x536   : > { %v6605_v17 = vshrl.u32 %v3444_v26, 30  ;;  %v3510_v23 = vshll.u32 %v7007_v25, %v3501_v60  ;;  %v3500_v7 = vshrl.u32 %v3499_v46, 5  ;;  %v3513_v40 = vshll.u32 %v6985_v4, %v3501_v60 }
 0x537   : > { %v3505_v42 = vshrl.u32 %v7006_v10, %v3502_v1  ;;  %v3508_v39 = vshrl.u32 %v7007_v25, %v3502_v1  ;;  %v3511_v16 = vshrl.u32 %v6985_v4, %v3502_v1  ;;  %v6613_v34 = vpop.eup %4266  ;;  %v3514_v53 = vshrl.u32 %v6992_v49, %v3502_v1 }
 0x538   : > { %7093 = vst [vmem:[#allocation14_spill] sm:$0xff] %v6605_v17  ;;  %v3446_v20 = vshll.u32 %v6605_v17, 30  ;;  %v3260_v47 = vsel %vm3177_vm7, %v3259_v8, %v3258_v45  ;;  %vm6622_vm4 = vcmp.le.f32.partialorder %v3175_v36, 0.7853982  ;;  %v3535_v50 = vshll.u32 %v3495_v59, 8 }
 0x539   : > { %v3506_v21 = vor.u32 %v3505_v42, %v3504_v32  ;;  %v3509_v57 = vor.u32 %v3508_v39, %v3507_v38  ;;  %v3512_v41 = vor.u32 %v3511_v16, %v3510_v23  ;;  %v3515_v51 = vor.u32 %v3514_v53, %v3513_v40 }
 0x53a   : > { %v6626_v11 = vsub.s32 %v3443_v29, %v3446_v20  ;;  %v3053_v52 = vsub.s32 4, %v6346_v58  ;;  %v6630_v31 = vsel %vm4009_vm10, 0, %v4008_v54  ;;  %v3516_v45 = vshll.u32 %v6992_v49, %v3501_v60 }
 0x53b   : > { %v3517_v46 = vshrl.u32 %v6994_v12, %v3502_v1  ;;  %v3594_v26 = vand.u32 2139095040, %v6603_v27  ;;  %v6635_v8 = vpop.eup %4268  ;;  %vm3519_vm9 = vcmp.lt.s32.totalorder %v3500_v7, 1  ;;  %vm3521_vm3 = vcmp.lt.s32.totalorder %v3500_v7, 3 }
 0x53c   : > { %v3449_v36 = vsub.s32 0, %v6626_v11  ;;  %vm3522_vm14 = vcmp.lt.s32.totalorder %v3500_v7, 4  ;;  %v6638_v29 = vpop.eup %4270  ;;  %v3527_v54 = vsel %vm3519_vm9, %v3506_v21, %v3509_v57  ;;  %v3503_v39 = vshrl.u32 %v6991_v24, %v3502_v1 }
 0x53d   : > { %v3518_v59 = vor.u32 %v3517_v46, %v3516_v45  ;;  %v3524_v32 = vsel %vm3522_vm14, %v3512_v41, 2102212464  ;;  %v3528_v38 = vsel %vm3522_vm14, %v3515_v51, 920167782  ;;  %v6641_v42 = vpop.eup %4272  ;;  %vm3520_vm13 = vcmp.lt.s32.totalorder %v3500_v7, 2 }
 0x53e   : > { %v4011_v60 = vmin.u32 %v3449_v36, %v6626_v11  ;;  %v3529_v23 = vsel %vm3521_vm3, %v3512_v41, %v3528_v38  ;;  %v3355_v16 = vsub.s32 4294967266, %v6630_v31  ;;  %v3531_v40 = vsel %vm3519_vm9, %v3509_v57, %v3512_v41 }
 0x53f   : > { %v3530_v20 = vsel %vm3520_vm13, %v3527_v54, %v3529_v23  ;;  %v3532_v53 = vsel %vm3522_vm14, %v3518_v59, 1326507024  ;;  %v3523_v46 = vsel %vm3519_vm9, %v3503_v39, %v3506_v21  ;;  %v3525_v19 = vsel %vm3521_vm3, %v3509_v57, %v3524_v32 }
 0x540   : > { %v3451_v45 = vclz %v4011_v60  ;;  %v3533_v62 = vsel %vm3521_vm3, %v3515_v51, %v3532_v53  ;;  %v6653_v1 = vmul.u32.u64.low %v3535_v50, %v3530_v20  ;;  %v6654_v5 = vmul.u32.u64.high %v3535_v50, %v3530_v20, %v6653_v1 }
 0x541   : > { %v3534_v36 = vsel %vm3520_vm13, %v3531_v40, %v3533_v62  ;;  %v3595_v38 = vshrl.u32 %v3594_v26, 23  ;;  %v6973_v41 = vand.u32 2147483647, %v6603_v27  ;;  %4274 = vcosq.f32 %v6601_v43 }
 0x542   : > { %v4012_v33 = vadd.s32 4294967294, %v3451_v45  ;;  %v6656_v37 = vmul.u32.u64.low %v3535_v50, %v3534_v36  ;;  %v6657_v17 = vmul.u32.u64.high %v3535_v50, %v3534_v36, %v6656_v37  ;;  %v3263_v21 = vsel %vm6622_vm4, %v6245_v14, %v3260_v47 }
 0x543   : > { %v4018_v57 = vadd.s32 4294967169, %v3595_v38  ;;  %v3351_v51 = vsub.s32 32, %v6630_v31  ;;  %v3356_v62 = vadd.s32 127, %v3355_v16  ;;  %v3526_v59 = vsel %vm3520_vm13, %v3523_v46, %v3525_v19 }
 0x544   : > { %v3054_v26 = vsel %vm2969_vm5, %v3053_v52, %v6346_v58  ;;  %v2952_v37 = vsel %vm6498_vm2, 0, %v6594_v30  ;;  %v7096_v32 = vsub.s32 4, %v6395_v0  ;;  %4276 = vsinq.f32 %v6601_v43 }
 0x545   : > { %v3545_v7 = vadd.s32 1, %v6654_v5  ;;  %4278 = vcosq.f32 %v3263_v21  ;;  %v3335_v19 = vadd.s32 %v6487_v2, %v6493_v48  ;;  %vm4013_vm5 = vcmp.lt.s32.totalorder %v4012_v33, 0 }
 0x546   : > { %v6677_v47 = vsel %vm3073_vm12, %v7096_v32, %v6395_v0  ;;  %v3598_v58 = vand.u32 8388607, %v6973_v41  ;;  %v3542_v52 = vmul.u32 %v3535_v50, %v3526_v59  ;;  %vm3544_vm1 = vc.u32 %v6657_v17, %v6653_v1 }
 0x547   : > { %v3601_v54 = vadd.s32 1, %v4018_v57  ;;  %v3056_v0 = vsel %vm6547_vm0, 0, %v3054_v26  ;;  %4280 = vsinq.f32 %v3263_v21  ;;  %v3353_v60 = vshrl.u32 %v3335_v19, %v3351_v51 }
 0x548   : > { %v3357_v43 = vshll.u32 %v3356_v62, 23  ;;  %v3546_v39 = vsel %vm3544_vm1, %v3545_v7, %v6654_v5  ;;  %v6689_v23 = vsel %vm4013_vm5, 0, %v4012_v33  ;;  %v3064_v2 = vxor.u32 2147483648, %v6641_v42 }
 0x549   : > { %v3547_v16 = vadd.s32 %v3546_v39, %v3542_v52  ;;  %vm3602_vm12 = vcmp.gt.s32.totalorder %v3601_v54, 0  ;;  %v3352_v48 = vshll.u32 %v6553_v13, %v6630_v31  ;;  %v3599_v50 = vor.u32 8388608, %v3598_v58 }
 0x54a   : > { %v3603_v20 = vsel %vm3602_vm12, %v3601_v54, 0  ;;  %v3060_v40 = vadd.s32 3, %v3056_v0  ;;  %v3439_v22 = vadd.s32 %v6558_v55, %v6564_v35  ;;  %v3067_v46 = vxor.u32 2147483648, %v6638_v29 }
 0x54b   : > { %v3548_v53 = vadd.s32 536870912, %v3547_v16  ;;  %v3605_v45 = vand.u32 31, %v3603_v20  ;;  %v6697_v5 = vor.u32 %v3353_v60, %v3352_v48  ;;  %v6699_v33 = vor.u32 4788187, %v3357_v43  ;;  %v6703_v21 = vpop.eup %4274 }
 0x54c   : > { %v3455_v36 = vsub.s32 32, %v6689_v23  ;;  %v3261_v38 = vsub.s32 4, %v6453_v61  ;;  %v3459_v31 = vsub.s32 4294967266, %v6689_v23  ;;  %v6711_v57 = vadd.s32 %v6653_v1, %v6657_v17 }
 0x54d   : > { %v6708_v55 = vshrl.u32 %v3548_v53, 30  ;;  %v3606_v35 = vsub.s32 32, %v3605_v45  ;;  %v3604_v51 = vshrl.u32 %v3603_v20, 5  ;;  %v6713_v62 = vshll.u32 %v3599_v50, 8 }
 0x54e   : > { %v6715_v59 = vand.u32 3, %v3060_v40  ;;  %v6717_v26 = vpop.eup %4276  ;;  %v3608_v7 = vshll.u32 %v6991_v24, %v3605_v45  ;;  %v3611_v58 = vshll.u32 %v7006_v10, %v3605_v45  ;;  %v3614_v1 = vshll.u32 %v7007_v25, %v3605_v45 }
 0x54f   : > { %v3550_v32 = vshll.u32 %v6708_v55, 30  ;;  %v3609_v19 = vshrl.u32 %v7006_v10, %v3606_v35  ;;  %v6723_v52 = vpop.eup %4278  ;;  %v3612_v17 = vshrl.u32 %v7007_v25, %v3606_v35  ;;  %v3615_v54 = vshrl.u32 %v6985_v4, %v3606_v35 }
 0x550   : > { %v3618_v0 = vshrl.u32 %v6992_v49, %v3606_v35  ;;  %v6729_v60 = vshrl.u32 %v3439_v22, %v3455_v36  ;;  %v3617_v39 = vshll.u32 %v6985_v4, %v3605_v45  ;;  %v3621_v48 = vshrl.u32 %v6994_v12, %v3606_v35 }
 0x551   : > { %v6731_v43 = vsub.s32 %v3547_v16, %v3550_v32  ;;  %v4281_v50 = vpop.eup %4280  ;;  %v3610_v10 = vor.u32 %v3609_v19, %v3608_v7  ;;  %v3613_v20 = vor.u32 %v3612_v17, %v3611_v58  ;;  %v3616_v40 = vor.u32 %v3615_v54, %v3614_v1 }
 0x552   : > { %v3620_v53 = vshll.u32 %v6992_v49, %v3605_v45  ;;  %v6736_v41 = vadd.s32 127, %v3459_v31  ;;  %v3619_v13 = vor.u32 %v3618_v0, %v3617_v39  ;;  %v3262_v16 = vsel %vm3177_vm7, %v3261_v38, %v6453_v61 }
 0x553   : > { %v3553_v25 = vsub.s32 0, %v6731_v43  ;;  %vm3626_vm0 = vcmp.lt.s32.totalorder %v3604_v51, 4  ;;  %vm3063_vm11 = vcmp.eq.s32.totalorder %v6715_v59, 0  ;;  %vm3066_vm8 = vcmp.eq.s32.totalorder %v6715_v59, 2 }
 0x554   : > { %v3622_v22 = vor.u32 %v3621_v48, %v3620_v53  ;;  %v3607_v12 = vshrl.u32 %v6991_v24, %v3606_v35  ;;  %vm3623_vm10 = vcmp.lt.s32.totalorder %v3604_v51, 1  ;;  %v3628_v49 = vsel %vm3626_vm0, %v3616_v40, 2102212464 }
 0x555   : > { %v4015_v4 = vmin.u32 %v3553_v25, %v6731_v43  ;;  %vm3625_vm9 = vcmp.lt.s32.totalorder %v3604_v51, 3  ;;  %v3631_v45 = vsel %vm3623_vm10, %v3610_v10, %v3613_v20  ;;  %v3632_v36 = vsel %vm3626_vm0, %v3619_v13, 920167782 }
 0x556   : > { %v3264_v61 = vsel %vm6622_vm4, 0, %v3262_v16  ;;  %vm3624_vm7 = vcmp.lt.s32.totalorder %v3604_v51, 2  ;;  %v3627_v31 = vsel %vm3623_vm10, %v3607_v12, %v3610_v10  ;;  %v3633_v32 = vsel %vm3625_vm9, %v3616_v40, %v3632_v36 }
 0x557   : > { %v3555_v38 = vclz %v4015_v4  ;;  %v3629_v7 = vsel %vm3625_vm9, %v3613_v20, %v3628_v49  ;;  %v3634_v19 = vsel %vm3624_vm7, %v3631_v45, %v3633_v32  ;;  %v3635_v58 = vsel %vm3623_vm10, %v3613_v20, %v3616_v40 }
 0x558   : > { %v3636_v24 = vsel %vm3626_vm0, %v3622_v22, 1326507024  ;;  %vm3059_vm3 = vweird.f32 %v6223_v15  ;;  %v6754_v1 = vmul.u32.u64.low %v6713_v62, %v3634_v19  ;;  %v6755_v54 = vmul.u32.u64.high %v6713_v62, %v3634_v19, %v6754_v1 }
 0x559   : > { %v4016_v35 = vadd.s32 4294967294, %v3555_v38  ;;  %v3637_v17 = vsel %vm3625_vm9, %v3619_v13, %v3636_v24  ;;  %v3065_v0 = vsel %vm3063_vm11, %v6638_v29, %v3064_v2  ;;  %v3068_v39 = vsel %vm3066_vm8, %v3067_v46, %v6641_v42 }
 0x55a   : > { %v3638_v6 = vsel %vm3624_vm7, %v3635_v58, %v3637_v17  ;;  %v3268_v13 = vadd.s32 3, %v3264_v61  ;;  %v3630_v48 = vsel %vm3624_vm7, %v3627_v31, %v3629_v7  ;;  %v3272_v25 = vxor.u32 2147483648, %v4281_v50 }
 0x55b   : > { %vm4017_vm4 = vcmp.lt.s32.totalorder %v4016_v35, 0  ;;  %v6771_v10 = vmul.u32.u64.low %v6713_v62, %v3638_v6  ;;  %v6772_v20 = vmul.u32.u64.high %v6713_v62, %v3638_v6, %v6771_v10  ;;  %v3275_v16 = vxor.u32 2147483648, %v6723_v52 }
 0x55c   : > { %v3558_v40 = vsel %vm4017_vm4, 0, %v4016_v35  ;;  %v3269_v53 = vand.u32 3, %v3268_v13  ;;  %v3461_v2 = vshll.u32 %v6736_v41, 23  ;;  %v3649_v29 = vadd.s32 1, %v6755_v54 }
 0x55d   : > { %v3563_v22 = vsub.s32 4294967266, %v3558_v40  ;;  %vm3062_vm14 = vcmp.lt.s32.totalorder %v6715_v59, 2  ;;  %v3559_v42 = vsub.s32 32, %v3558_v40  ;;  %v3646_v46 = vmul.u32 %v6713_v62, %v3630_v48 }
 0x55e   : > { %v3069_v51 = vsel %vm3062_vm14, %v3065_v0, %v3068_v39  ;;  %vm3270_vm13 = vcmp.lt.s32.totalorder %v3269_v53, 2  ;;  %vm3648_vm5 = vc.u32 %v6772_v20, %v6754_v1  ;;  %vm3271_vm1 = vcmp.eq.s32.totalorder %v3269_v53, 0 }
 0x55f   : > { %v3564_v4 = vadd.s32 127, %v3563_v22  ;;  %vm3274_vm12 = vcmp.eq.s32.totalorder %v3269_v53, 2  ;;  %v3650_v12 = vsel %vm3648_vm5, %v3649_v29, %v6755_v54  ;;  %v3273_v41 = vsel %vm3271_vm1, %v6723_v52, %v3272_v25 }
 0x560   : > { %v3276_v49 = vsel %vm3274_vm12, %v3275_v16, %v4281_v50  ;;  %v2956_v59 = vadd.s32 3, %v2952_v37  ;;  %v3651_v45 = vadd.s32 %v3650_v12, %v3646_v46  ;;  %v3070_v62 = vsel %vm3059_vm3, nan, %v3069_v51 }
 0x561   : > { %vm3267_vm0 = vweird.f32 %v6245_v14  ;;  %v3277_v36 = vsel %vm3270_vm13, %v3273_v41, %v3276_v49  ;;  %v3565_v61 = vshll.u32 %v3564_v4, 23  ;;  %v2960_v32 = vxor.u32 2147483648, %v6635_v8 }
 0x562   : > { %v3278_v38 = vsel %vm3267_vm0, nan, %v3277_v36  ;;  %v2957_v31 = vand.u32 3, %v2956_v59  ;;  %v3160_v52 = vsel %vm6572_vm6, 0, %v6677_v47  ;;  %v3652_v56 = vadd.s32 536870912, %v3651_v45 }
 0x563   : > { %v4045_v50 = vpack.c.bf16 %v3278_v38, %v3070_v62  ;;  %v2963_v30 = vxor.u32 2147483648, %v6613_v34  ;;  %v3359_v37 = vand.u32 2147483647, %v6699_v33  ;;  %v3361_v15 = vcvt.s32.f32 %v6697_v5 }
 0x564   : > { %v7097_v14 = vshll.u32 %v6626_v11, %v6689_v23  ;;  %v3561_v19 = vshrl.u32 %v6711_v57, %v3559_v42  ;;  %v3462_v58 = vor.u32 4788187, %v3461_v2  ;;  %v3560_v24 = vshll.u32 %v6731_v43, %v3558_v40 }
 0x565   : > { %v6803_v44 = vshrl.u32 %v3652_v56, 30  ;;  %4046 = vmatprep.subr.bf16.mxu1 %v4045_v50  ;;  %vm2959_vm2 = vcmp.eq.s32.totalorder %v2957_v31, 0  ;;  %v3566_v47 = vor.u32 4788187, %v3565_v61  ;;  %vm2962_vm6 = vcmp.eq.s32.totalorder %v2957_v31, 2 }
 0x566   : > { %v3458_v7 = vor.u32 %v6729_v60, %v7097_v14  ;;  %v2961_v35 = vsel %vm2959_vm2, %v6613_v34, %v2960_v32  ;;  %v3164_v33 = vadd.s32 3, %v3160_v52  ;;  %v2964_v11 = vsel %vm2962_vm6, %v2963_v30, %v6635_v8 }
 0x567   : > { %v3654_v5 = vshll.u32 %v6803_v44, 30  ;;  %v3168_v23 = vxor.u32 2147483648, %v6717_v26  ;;  %v3171_v57 = vxor.u32 2147483648, %v6703_v21  ;;  %v3362_v60 = vmul.f32 %v3361_v15, %v3359_v37 }
 0x568   : > { %v3562_v17 = vor.u32 %v3561_v19, %v3560_v24  ;;  %v3165_v43 = vand.u32 3, %v3164_v33  ;;  %v3463_v54 = vand.u32 2147483647, %v3462_v58  ;;  %v3465_v6 = vcvt.s32.f32 %v3458_v7  ;;  %v7107_v7 = vld [vmem:[#allocation14_spill] sm:$0xff]  ;;  %v7108_v58 = vld [vmem:[#allocation4_spill] sm:$0xff] }
 0x569   : > { %v3655_v0 = vsub.s32 %v3651_v45, %v3654_v5  ;;  %vm2958_vm11 = vcmp.lt.s32.totalorder %v2957_v31, 2  ;;  %v3567_v39 = vand.u32 2147483647, %v3566_v47  ;;  %vm2955_vm7 = vweird.f32 %v6221_v9 }
 0x56a   : > { %v2965_v13 = vsel %vm2958_vm11, %v2961_v35, %v2964_v11  ;;  %vm3167_vm8 = vcmp.eq.s32.totalorder %v3165_v43, 0  ;;  %vm3170_vm10 = vcmp.eq.s32.totalorder %v3165_v43, 2  ;;  %vm3166_vm9 = vcmp.lt.s32.totalorder %v3165_v43, 2 }
 0x56b   : > { %v3657_v34 = vsub.s32 0, %v3655_v0  ;;  %v3169_v48 = vsel %vm3167_vm8, %v6703_v21, %v3168_v23  ;;  %v3172_v8 = vsel %vm3170_vm10, %v3171_v57, %v6717_v26  ;;  %v3569_v10 = vcvt.s32.f32 %v3562_v17 }
 0x56c   : > { %vm3163_vm3 = vweird.f32 %v6231_v18  ;;  %v3173_v40 = vsel %vm3166_vm9, %v3169_v48, %v3172_v8  ;;  %v3466_v53 = vmul.f32 %v3465_v6, %v3463_v54  ;;  %v2966_v16 = vsel %vm2955_vm7, nan, %v2965_v13 }
 0x56d   : > { %v4019_v25 = vmin.u32 %v3657_v34, %v3655_v0  ;;  %v3174_v2 = vsel %vm3163_vm3, nan, %v3173_v40  ;;  %v3570_v22 = vmul.f32 %v3569_v10, %v3567_v39  ;;  %v3363_v46 = vxor.u32 2147483648, %v3362_v60 }
 0x56e   : > { %v4047_v29 = vpack.c.bf16 %v3174_v2, %v2966_v16  ;;  %v3467_v51 = vxor.u32 2147483648, %v3466_v53  ;;  %vm3281_vm4 = vcmp.lt.s32.totalorder %v6389_v3, 0  ;;  %vm3385_vm13 = vcmp.lt.s32.totalorder %v6391_v28, 0 }
 0x56f   : > { %v3659_v42 = vclz %v4019_v25  ;;  %v3571_v21 = vxor.u32 2147483648, %v3570_v22  ;;  %v3364_v9 = vsel %vm3281_vm4, %v3363_v46, %v3362_v60  ;;  %vm3489_vm5 = vcmp.lt.s32.totalorder %v6459_v63, 0 }
 0x570   : > { %4048 = vmatpush1.bf16.msra.mxu1 %v4047_v29  ;;  %v3468_v26 = vsel %vm3385_vm13, %v3467_v51, %v3466_v53  ;;  %v3647_v12 = vadd.s32 %v6754_v1, %v6772_v20  ;;  %v7098_v59 = vand.u32 2147483647, %v6389_v3  ;;  %v7101_v62 = vand.u32 2147483647, %v6391_v28 }
 0x571   : > { %v4020_v4 = vadd.s32 4294967294, %v3659_v42  ;;  %v3572_v61 = vsel %vm3489_vm5, %v3571_v21, %v3570_v22  ;;  %v7104_v52 = vand.u32 2147483647, %v6459_v63  ;;  %v3573_v15 = vsub.s32 4, %v6708_v55 }
 0x572   : > { %vm6825_vm1 = vcmp.le.f32.partialorder %v7098_v59, 0.7853982  ;;  %vm6831_vm12 = vcmp.le.f32.partialorder %v7101_v62, 0.7853982  ;;  %v3469_v19 = vsub.s32 4, %v7107_v7  ;;  %v3365_v24 = vsub.s32 4, %v7108_v58 }
 0x573   : > { %vm4021_vm14 = vcmp.lt.s32.totalorder %v4020_v4, 0  ;;  %v3367_v1 = vsel %vm6825_vm1, %v6389_v3, %v3364_v9  ;;  %v3471_v32 = vsel %vm6831_vm12, %v6391_v28, %v3468_v26  ;;  %vm6845_vm0 = vcmp.le.f32.partialorder %v7104_v52, 0.7853982 }
 0x574   : > { %v3662_v18 = vsel %vm4021_vm14, 0, %v4020_v4  ;;  %v3575_v50 = vsel %vm6845_vm0, %v6459_v63, %v3572_v61  ;;  %4282 = vcosq.f32 %v3367_v1  ;;  %v3574_v33 = vsel %vm3489_vm5, %v3573_v15, %v6708_v55 }
 0x575   : > { %v3663_v41 = vsub.s32 32, %v3662_v18  ;;  %v3667_v49 = vsub.s32 4294967266, %v3662_v18  ;;  %v3664_v20 = vshll.u32 %v3655_v0, %v3662_v18  ;;  %4284 = vcosq.f32 %v3471_v32 }
 0x576   : > { %4286 = vcosq.f32 %v3575_v50  ;;  %v3677_v11 = vsub.s32 4, %v6803_v44  ;;  %v3470_v23 = vsel %vm3385_vm13, %v3469_v19, %v7107_v7  ;;  %v3366_v57 = vsel %vm3281_vm4, %v3365_v24, %v7108_v58  ;;  %v3695_v24 = vld [vmem:[%s6906_s7] sm:$0x1] }
 0x577   : > { %v3665_v38 = vshrl.u32 %v3647_v12, %v3663_v41  ;;  %v3668_v31 = vadd.s32 127, %v3667_v49  ;;  %4288 = vsinq.f32 %v3575_v50  ;;  %v3576_v17 = vsel %vm6845_vm0, 0, %v3574_v33 }
 0x578   : > { %4290 = vsinq.f32 %v3471_v32  ;;  %vm3593_vm2 = vcmp.lt.s32.totalorder %v6603_v27, 0  ;;  %v7109_v43 = vand.u32 2147483647, %v6603_v27  ;;  %v3472_v6 = vsel %vm6831_vm12, 0, %v3470_v23 }
 0x579   : > { %v3666_v30 = vor.u32 %v3665_v38, %v3664_v20  ;;  %v3669_v37 = vshll.u32 %v3668_v31, 23  ;;  %4292 = vsinq.f32 %v3367_v1  ;;  %v3678_v0 = vsel %vm3593_vm2, %v3677_v11, %v6803_v44 }
 0x57a   : > { %vm6870_vm6 = vcmp.le.f32.partialorder %v7109_v43, 0.7853982  ;;  %v3368_v13 = vsel %vm6825_vm1, 0, %v3366_v57  ;;  %v3580_v8 = vadd.s32 3, %v3576_v17  ;;  %v3476_v40 = vadd.s32 3, %v3472_v6 }
 0x57b   : > { %v3670_v14 = vor.u32 4788187, %v3669_v37  ;;  %v3673_v35 = vcvt.s32.f32 %v3666_v30  ;;  %v3680_v53 = vsel %vm6870_vm6, 0, %v3678_v0  ;;  %v3372_v16 = vadd.s32 3, %v3368_v13 }
 0x57c   : > { %v3684_v22 = vadd.s32 3, %v3680_v53  ;;  %v3581_v29 = vand.u32 3, %v3580_v8  ;;  %v3477_v42 = vand.u32 3, %v3476_v40  ;;  %vm3579_vm0 = vweird.f32 %v6459_v63 }
 0x57d   : > { %v3671_v47 = vand.u32 2147483647, %v3670_v14  ;;  %v3373_v9 = vand.u32 3, %v3372_v16  ;;  %v4322_v8 = vmov 1966171168  }
 0x57e   : > { %v4283_v39 = vpop.eup %4282  ;;  %v3685_v12 = vand.u32 3, %v3684_v22  ;;  %vm3583_vm11 = vcmp.eq.s32.totalorder %v3581_v29, 0  ;;  %vm3586_vm8 = vcmp.eq.s32.totalorder %v3581_v29, 2  ;;  %vm3479_vm10 = vcmp.eq.s32.totalorder %v3477_v42, 0 }
 0x57f   : > { %v3674_v5 = vmul.f32 %v3673_v35, %v3671_v47  ;;  %v4285_v48 = vpop.eup %4284  ;;  %v3379_v26 = vxor.u32 2147483648, %v4283_v39  ;;  %vm3482_vm9 = vcmp.eq.s32.totalorder %v3477_v42, 2  ;;  %vm3375_vm7 = vcmp.eq.s32.totalorder %v3373_v9, 0  ;;  %v3700_v47 = vpop.permute.xlu0 %3699 }
 0x580   : > { %v4287_v10 = vpop.eup %4286  ;;  %v3483_v21 = vxor.u32 2147483648, %v4285_v48  ;;  %vm3378_vm3 = vcmp.eq.s32.totalorder %v3373_v9, 2  ;;  %vm3582_vm4 = vcmp.lt.s32.totalorder %v3581_v29, 2  ;;  %vm3478_vm14 = vcmp.lt.s32.totalorder %v3477_v42, 2 }
 0x581   : > { %v3675_v60 = vxor.u32 2147483648, %v3674_v5  ;;  %v4289_v25 = vpop.eup %4288  ;;  %v3587_v51 = vxor.u32 2147483648, %v4287_v10  ;;  %vm3690_vm13 = vcmp.eq.s32.totalorder %v3685_v12, 2  ;;  %vm3687_vm5 = vcmp.eq.s32.totalorder %v3685_v12, 0 }
 0x582   : > { %v4291_v44 = vpop.eup %4290  ;;  %v3584_v46 = vxor.u32 2147483648, %v4289_v25  ;;  %vm3374_vm1 = vcmp.lt.s32.totalorder %v3373_v9, 2  ;;  %vm3686_vm12 = vcmp.lt.s32.totalorder %v3685_v12, 2 }
 0x583   : > { %v3676_v54 = vsel %vm3593_vm2, %v3675_v60, %v3674_v5  ;;  %v4293_v2 = vpop.eup %4292  ;;  %v3480_v4 = vxor.u32 2147483648, %v4291_v44  ;;  %v3588_v49 = vsel %vm3586_vm8, %v3587_v51, %v4289_v25  ;;  %v3484_v62 = vsel %vm3482_vm9, %v3483_v21, %v4291_v44 }
 0x584   : > { %v3679_v34 = vsel %vm6870_vm6, %v6603_v27, %v3676_v54  ;;  %v3376_v18 = vxor.u32 2147483648, %v4293_v2  ;;  %v3585_v41 = vsel %vm3583_vm11, %v4287_v10, %v3584_v46  ;;  %v3380_v20 = vsel %vm3378_vm3, %v3379_v26, %v4293_v2 }
 0x585   : > { %4294 = vcosq.f32 %v3679_v34  ;;  %v3481_v45 = vsel %vm3479_vm10, %v4285_v48, %v3480_v4  ;;  %v3589_v31 = vsel %vm3582_vm4, %v3585_v41, %v3588_v49  ;;  %vm3475_vm2 = vweird.f32 %v6391_v28 }
 0x586   : > { %4296 = vsinq.f32 %v3679_v34  ;;  %v3377_v1 = vsel %vm3375_vm7, %v4283_v39, %v3376_v18  ;;  %v3485_v32 = vsel %vm3478_vm14, %v3481_v45, %v3484_v62  ;;  %vm3683_vm6 = vweird.f32 %v6603_v27 }
 0x587   : > { %v3381_v50 = vsel %vm3374_vm1, %v3377_v1, %v3380_v20  ;;  %v3590_v37 = vsel %vm3579_vm0, nan, %v3589_v31  ;;  %v3486_v15 = vsel %vm3475_vm2, nan, %v3485_v32  ;;  %vm3371_vm11 = vweird.f32 %v6389_v3 }
 0x588   : > { %v3382_v19 = vsel %vm3371_vm11, nan, %v3381_v50  ;;  %v3702_v28 = vlaneseq  ;;  %v3817_v10 = vunpack.c.l.s4 %v4322_v8 }
 0x589   : > { %v4051_v58 = vpack.c.bf16 %v3590_v37, %v3382_v19 }
 0x58a   : > { %v3703_v63 = vshrl.u32 %v3702_v28, 7  ;;  %v3818_v29 = vunpack.c.0.s8 %v3817_v10  ;;  %vm3833_vm7 = vcmp.lt.s32.totalorder %v3702_v28, 256 }
 0x58c   : > { %v3704_v27 = vsub.s32 0, %v3703_v63  ;;  %v3821_v18 = vsub.s32 %v3818_v29, %v3703_v63 }
 0x58e   : > { %v3705_v35 = vrot.slane %v3700_v47, %v3704_v27 }
 0x58f   : > { %v4295_v59 = vpop.eup %4294 }
 0x590   : > { %v4297_v36 = vpop.eup %4296  ;;  %v3691_v61 = vxor.u32 2147483648, %v4295_v59 }
 0x591   : > { %v3688_v38 = vxor.u32 2147483648, %v4297_v36 }
 0x592   : > { %v3692_v52 = vsel %vm3690_vm13, %v3691_v61, %v4297_v36 }
 0x593   : > { %v3689_v56 = vsel %vm3687_vm5, %v4295_v59, %v3688_v38 }
 0x594   : > { %v3693_v30 = vsel %vm3686_vm12, %v3689_v56, %v3692_v52 }
 0x595   : > { %v3694_v14 = vsel %vm3683_vm6, nan, %v3693_v30 }
 0x596   : > { %v4049_v7 = vpack.c.bf16 %v3694_v14, %v3486_v15 }
 0x598   : > { %4050 = vmatprep.subr.bf16.mxu1 %v4049_v7 }
 0x599   : > { %4052 = vmatpush1.bf16.msra.mxu1 %v4051_v58 }
 0x59c   : > { %4022 = vmatmul.mubr.msk.f32.vlgmr.msra.gmra.mrb[14].mxu1 %vm2753_vm15, %v3695_v24 }
 0x66f   : > { %v3775_v33 = vpop.f32.mrb[14].mxu1 }
 0x670   : > { %v3776_v5 = vadd.f32 %v3775_v33, %v3705_v35  ;;  %v3777_v11 = vpop.f32.mrb[15].mxu1 }
 0x671   : > { %v3778_v3 = vadd.f32 %v3777_v11, %v3705_v35 }
 0x672   : > { %v3780_v23 = vmul.f32 100.0, %v3776_v5 }
 0x673   : > { %v3781_v57 = vmul.f32 100.0, %v3778_v3 }
 0x674   : > { %v3784_v60 = vmin.f32 %v3780_v23, 20.0  ;;  %vm3782_vm10 = vcmp.gt.f32.partialorder %v3780_v23, 20.0 }
 0x675   : > { %v3785_v17 = vmin.f32 %v3781_v57, 20.0  ;;  %vm3783_vm9 = vcmp.gt.f32.partialorder %v3781_v57, 20.0 }
 0x676   : > { %v3786_v43 = vmul.f32 1.442695, %v3784_v60 }
 0x677   : > { %v3788_v55 = vmul.f32 1.442695, %v3785_v17 }
 0x678   : > { %4298 = vpow2.f32 %v3786_v43 }
 0x679   : > { %4300 = vpow2.f32 %v3788_v55 }
 0x682   : > { %v4299_v54 = vpop.eup %4298 }
 0x683   : > { %v4301_v6 = vpop.eup %4300  ;;  %v3790_v0 = vadd.f32 1.0, %v4299_v54  ;;  %v3793_v13 = vmul.f32 -0.5, %v4299_v54  ;;  %v3796_v40 = vand.u32 2147483647, %v4299_v54 }
 0x684   : > { %v3799_v39 = vadd.f32 1.0, %v4301_v6  ;;  %v3802_v34 = vmul.f32 -0.5, %v4301_v6  ;;  %v3805_v25 = vand.u32 2147483647, %v4301_v6 }
 0x685   : > { %4302 = vlog2.f32 %v3790_v0  ;;  %v3794_v48 = vadd.f32 1.0, %v3793_v13  ;;  %vm3797_vm15 = vcmp.lt.f32.partialorder %v3796_v40, 0.0004427343 }
 0x686   : > { %4304 = vlog2.f32 %v3799_v39  ;;  %v3803_v53 = vadd.f32 1.0, %v3802_v34  ;;  %vm3806_vm8 = vcmp.lt.f32.partialorder %v3805_v25, 0.0004427343 }
 0x687   : > { %v3795_v22 = vmul.f32 %v4299_v54, %v3794_v48 }
 0x688   : > { %v3804_v46 = vmul.f32 %v4301_v6, %v3803_v53 }
 0x68f   : > { %v4303_v16 = vpop.eup %4302 }
 0x690   : > { %v4305_v44 = vpop.eup %4304  ;;  %v3792_v2 = vmul.f32 0.6931472, %v4303_v16 }
 0x691   : > { %v3801_v42 = vmul.f32 0.6931472, %v4305_v44 }
 0x692   : > { %v3798_v51 = vsel %vm3797_vm15, %v3795_v22, %v3792_v2 }
 0x693   : > { %v3809_v4 = vmul.f32 0.01, %v3798_v51  ;;  %v3807_v21 = vsel %vm3806_vm8, %v3804_v46, %v3801_v42 }
 0x694   : > { %v3810_v9 = vmul.f32 0.01, %v3807_v21 }
 0x695   : > { %v3811_v26 = vsel %vm3782_vm10, %v3776_v5, %v3809_v4 }
 0x696   : > { %v3812_v12 = vsel %vm3783_vm9, %v3778_v3, %v3810_v9 }
 0x697   : > { %v3815_v41 = vcombine.low %v3811_v26, %v3812_v12 }
 0x699   : > { %v3822_v49 = vrot.slane %v3815_v41, %v3821_v18 }
 0x69b   : > { %v3829_v59 = vrot.slane %v3822_v49, %v3821_v18 }
 0x69d   : > { %3835 = vst.msk [vmem:[%s334_s17] sm:$0x3] %vm3833_vm7, %v3829_v59 }
 0x69e PF: > { %s21_s11 = sadd.s32 1, %s4312_s11  }
 0x69f   : > { %p18_p4 = scmp.ge.s32.totalorder %s21_s11, 4  }
 0x6a1   :  { %20 = sbr.rel (!%p18_p4) target bundleno = 3 (0x3), region = 86 }

</bundles_post_ra>
